<compile_context>
chip_gen: v6e
topology: v6e:2x2x1
jax: 0.10.0
libtpu: 0.0.40
codegen_flags: <defaults>
</compile_context>

<pallas_src>
import functools

import jax
import jax.numpy as jnp
from jax.experimental import pallas as pl
from jax.experimental.pallas import tpu as pltpu


def _round_up(x, m):
  return (x + m - 1) // m * m


def _startblock_kernel(x_ref, w_ref, b_ref, out_ref, patches_scr, *,
                       H, W, K, Cin, Cout, Nb, off, lpad, neg_slope):
  """Fused 'same' KxK conv (stride 1, no conv bias) + folded BN + leaky_relu.

  x_ref:       (1, Nb, Cin, H*W)   lane-dense input block (VMEM)
  w_ref:       (Cout, K*K*Cin)     BN-scaled weights in im2col layout (VMEM)
  b_ref:       (Cout, 1)           folded-BN shift (VMEM)
  out_ref:     (1, Nb, Cout, H*W)  lane-dense output block (VMEM)
  patches_scr: (Nb, K*K*Cin, H*W)  im2col patches scratch (VMEM)
  """
  HW = H * W
  P = K // 2
  dtype = x_ref.dtype

  # Flat window padded in H, held in registers:  [off zeros | x | tail zeros].
  # `off` and the tail are multiples of 128 (lane-aligned concat), so the height halo
  # costs zero VMEM stores and there is no cross-grid-step scratch-init hazard.
  x = x_ref[0]                                                   # (Nb, Cin, HW)
  xwin = jnp.concatenate(
      [jnp.zeros((Nb, Cin, off), dtype), x,
       jnp.zeros((Nb, Cin, lpad - off - HW), dtype)], axis=-1)   # (Nb, Cin, lpad)

  # Width-boundary masks, one per non-zero kw offset, hoisted out of the tap loop.
  col = jax.lax.broadcasted_iota(jnp.int32, (1, 1, HW), 2) % W
  masks = {}
  for dw in range(-P, P + 1):
    if dw != 0:
      masks[dw] = ((col + dw >= 0) & (col + dw < W)).astype(dtype)

  # im2col: each tap is a static lane-shifted slice of xwin (in-register shift work,
  # no masked VMEM loads, no per-tap reshape), stored straight into the patches
  # scratch so each tap's live range is bounded to one iteration.
  for kh in range(K):
    dh = kh - P
    for kw in range(K):
      dw = kw - P
      t = kh * K + kw
      s = off + dh * W + dw                       # static lane offset of this tap
      tap = xwin[:, :, s:s + HW]                  # (Nb, Cin, HW)
      if dw != 0:
        tap = tap * masks[dw]                     # zero width-boundary columns
      patches_scr[:, t * Cin:(t + 1) * Cin, :] = tap

  # One big MXU contraction per batch element + BN shift + leaky_relu, lane-dense out.
  w = w_ref[...]                                  # (Cout, K*K*Cin)
  b = b_ref[...]                                  # (Cout, 1)
  for n in range(Nb):
    y = jnp.dot(w, patches_scr[n], preferred_element_type=jnp.float32) + b
    out_ref[0, n] = jnp.maximum(y, neg_slope * y).astype(out_ref.dtype)


def startblock_forward(x, w, gamma, beta, running_mean, running_var, *,
                       eps=1e-5, negative_slope=0.01, batch_per_step=None,
                       compute_dtype=jnp.float32):
  """StartBlock forward: Conv2d(k7, p3, s1, no bias) -> BatchNorm2d -> leaky_relu.

  x: (N, Cin, H, W) NCHW; w: (Cout, Cin, K, K) OIHW.  Returns (N, Cout, H, W) f32.
  compute_dtype=jnp.bfloat16 uses bf16 MXU operands with f32 accumulation (v6e/v7x);
  re-validate tolerances before enabling.
  """
  N, Cin, H, W = x.shape
  Cout, _, K, _ = w.shape
  P = K // 2
  HW = H * W

  # Batch grouping: Nb elements per grid step.  Default keeps 2 parallel grid steps
  # when possible (v7x has 2 TensorCores); on single-TC v5e/v6e pass batch_per_step=N
  # to collapse everything into one step (grid overhead is the dominant fixed cost).
  if batch_per_step is None:
    batch_per_step = N // 2 if (N >= 2 and N % 2 == 0) else N
  Nb = batch_per_step
  assert N % Nb == 0, "batch_per_step must divide the batch size"
  G = N // Nb

  # Fold eval-mode BatchNorm into the conv: y = conv(x, w) * scale + shift.
  # TODO(synk): training-mode BatchNorm (batch statistics of the conv output) needs a
  # cross-batch reduction and is not folded here.
  scale = (gamma / jnp.sqrt(running_var + eps)).astype(jnp.float32)
  shift = (beta - running_mean * scale).astype(jnp.float32)
  w_folded = w.astype(jnp.float32) * scale[:, None, None, None]
  # (Cout,Cin,K,K) -> (Cout,K,K,Cin) -> (Cout, K*K*Cin); column (kh*K + kw)*Cin + ci
  # matches the kernel's patches row order.
  w_mat = jnp.transpose(w_folded, (0, 2, 3, 1)).reshape(Cout, K * K * Cin)
  w_mat = w_mat.astype(compute_dtype)
  b_col = shift.reshape(Cout, 1)

  # Metadata-only relayout: (N,Cin,H,W) -> (G, Nb, Cin, H*W); lane dim = H*W.
  x_flat = x.astype(compute_dtype).reshape(G, Nb, Cin, HW)

  # 128-aligned front/back halo sizes for the in-register padded flat window.
  halo = _round_up(P * W + P, 128)
  off, lpad = halo, halo + HW + halo

  kernel = functools.partial(_startblock_kernel, H=H, W=W, K=K, Cin=Cin, Cout=Cout,
                             Nb=Nb, off=off, lpad=lpad, neg_slope=negative_slope)
  out = pl.pallas_call(
      kernel,
      out_shape=jax.ShapeDtypeStruct((G, Nb, Cout, HW), jnp.float32),
      grid_spec=pltpu.PrefetchScalarGridSpec(
          num_scalar_prefetch=0,
          grid=(G,),  # one grid step per batch group
          in_specs=[
              pl.BlockSpec((1, Nb, Cin, HW), lambda g: (g, 0, 0, 0)),
              pl.BlockSpec((Cout, K * K * Cin), lambda g: (0, 0)),
              pl.BlockSpec((Cout, 1), lambda g: (0, 0)),
          ],
          out_specs=pl.BlockSpec((1, Nb, Cout, HW), lambda g: (g, 0, 0, 0)),
          scratch_shapes=[pltpu.VMEM((Nb, K * K * Cin, HW), compute_dtype)],
      ),
      compiler_params=pltpu.CompilerParams(
          dimension_semantics=("parallel",)),  # splits groups across v7x's 2 TCs
  )(x_flat, w_mat, b_col)

  # Metadata-only reshape back to NCHW.
  return out.reshape(N, Cout, H, W)


def _ref_forward(x, w, gamma, beta, running_mean, running_var, eps, neg_slope):
  """Pure-JAX (XLA conv) reference for correctness checking."""
  P = w.shape[-1] // 2
  y = jax.lax.conv_general_dilated(
      x.astype(jnp.float32), w.astype(jnp.float32),
      window_strides=(1, 1), padding=[(P, P), (P, P)],
      dimension_numbers=("NCHW", "OIHW", "NCHW"))
  scale = gamma / jnp.sqrt(running_var + eps)
  shift = beta - running_mean * scale
  y = y * scale[None, :, None, None] + shift[None, :, None, None]
  return jnp.where(y >= 0.0, y, neg_slope * y)


if __name__ == "__main__":
  # StartBlock(in_channels=4, out_channels=8); N=4 exercises Nb=2 per step, 2 steps.
  N, Cin, H, W = 4, 4, 16, 16
  Cout, K = 8, 7
  eps = 1e-5
  neg_slope = 0.01  # F.leaky_relu_ default

  key = jax.random.PRNGKey(0)
  key, kx, kw_, kg, kb, km, kv = jax.random.split(key, 7)
  x = jax.random.normal(kx, (N, Cin, H, W), jnp.float32)
  w = jax.random.normal(kw_, (Cout, Cin, K, K), jnp.float32) * 0.1
  gamma = 1.0 + 0.1 * jax.random.normal(kg, (Cout,), jnp.float32)
  beta = 0.1 * jax.random.normal(kb, (Cout,), jnp.float32)
  running_mean = 0.1 * jax.random.normal(km, (Cout,), jnp.float32)
  running_var = jnp.abs(1.0 + 0.1 * jax.random.normal(kv, (Cout,), jnp.float32))

  out = startblock_forward(x, w, gamma, beta, running_mean, running_var,
                           eps=eps, negative_slope=neg_slope)
  jax.block_until_ready(out)

  ref = _ref_forward(x, w, gamma, beta, running_mean, running_var, eps, neg_slope)
  assert out.shape == (N, Cout, H, W)
  assert jnp.allclose(out, ref, atol=1e-4, rtol=1e-4), (
      "mismatch: max abs err = %g" % float(jnp.max(jnp.abs(out - ref))))
  print("KERNEL_OK")
</pallas_src>

<mosaic_0001>
module attributes {stable_mosaic.version = 11 : i64} {
  func.func @_startblock_kernel(%arg0: i32, %arg1: memref<1x2x4x256xf32, #tpu.memory_space<vmem>>, %arg2: memref<8x196xf32, #tpu.memory_space<vmem>>, %arg3: memref<8x1xf32, #tpu.memory_space<vmem>>, %arg4: memref<1x2x8x256xf32, #tpu.memory_space<vmem>>, %arg5: memref<2x196x256xf32, #tpu.memory_space<vmem>>) attributes {dimension_semantics = [#tpu.dimension_semantics<parallel>], iteration_bounds = array<i64: 2>, scalar_prefetch = 0 : i64, scratch_operands = 1 : i64, tpu.core_type = #tpu.core_type<tc>, window_params = [{transform_indices = @transform_0, window_bounds = array<i64: 1, 2, 4, 256>}, {pipeline_mode = #tpu.pipeline_mode<synchronous>, transform_indices = @transform_1, window_bounds = array<i64: 8, 196>}, {pipeline_mode = #tpu.pipeline_mode<synchronous>, transform_indices = @transform_2, window_bounds = array<i64: 8, 1>}, {transform_indices = @transform_3, window_bounds = array<i64: 1, 2, 8, 256>}]} {
    %c0 = arith.constant 0 : index
    %c0_0 = arith.constant 0 : index
    %c0_1 = arith.constant 0 : index
    %c0_2 = arith.constant 0 : index
    %0 = vector.load %arg1[%c0, %c0_0, %c0_1, %c0_2] : memref<1x2x4x256xf32, #tpu.memory_space<vmem>>, vector<1x2x4x256xf32>
    %1 = vector.shape_cast %0 : vector<1x2x4x256xf32> to vector<2x4x256xf32>
    %cst = arith.constant 0.000000e+00 : f32
    %2 = vector.broadcast %cst : f32 to vector<2x4x128xf32>
    %cst_3 = arith.constant 0.000000e+00 : f32
    %3 = vector.broadcast %cst_3 : f32 to vector<2x4x128xf32>
    %4 = tpu.concatenate %2, %1, %3 in 2 : vector<2x4x128xf32>, vector<2x4x256xf32>, vector<2x4x128xf32> -> vector<2x4x512xf32>
    %5 = tpu.iota {dimensions = array<i32: 2>} : vector<1x1x256xi32>
    %c16_i32 = arith.constant 16 : i32
    %c0_i32 = arith.constant 0 : i32
    %6 = arith.cmpi eq, %c16_i32, %c0_i32 : i32
    %c1_i32 = arith.constant 1 : i32
    %7 = arith.select %6, %c1_i32, %c16_i32 : i32
    %8 = vector.broadcast %7 : i32 to vector<1x1x256xi32>
    %9 = arith.remsi %5, %8 : vector<1x1x256xi32>
    %c0_i32_4 = arith.constant 0 : i32
    %10 = vector.broadcast %c0_i32_4 : i32 to vector<1x1x256xi32>
    %11 = arith.cmpi ne, %9, %10 : vector<1x1x256xi32>
    %c0_i32_5 = arith.constant 0 : i32
    %12 = vector.broadcast %c0_i32_5 : i32 to vector<1x1x256xi32>
    %13 = arith.cmpi slt, %9, %12 : vector<1x1x256xi32>
    %c0_i32_6 = arith.constant 0 : i32
    %14 = arith.cmpi slt, %7, %c0_i32_6 : i32
    %15 = vector.broadcast %14 : i1 to vector<1x1x256xi1>
    %16 = vector.broadcast %15 : vector<1x1x256xi1> to vector<1x1x256xi1>
    %17 = arith.xori %13, %16 : vector<1x1x256xi1>
    %18 = arith.andi %17, %11 : vector<1x1x256xi1>
    %19 = vector.broadcast %7 : i32 to vector<1x1x256xi32>
    %20 = arith.addi %9, %19 : vector<1x1x256xi32>
    %21 = arith.select %18, %20, %9 : vector<1x1x256xi1>, vector<1x1x256xi32>
    %c-3_i32 = arith.constant -3 : i32
    %22 = vector.broadcast %c-3_i32 : i32 to vector<1x1x256xi32>
    %23 = arith.addi %21, %22 : vector<1x1x256xi32>
    %c0_i32_7 = arith.constant 0 : i32
    %24 = vector.broadcast %c0_i32_7 : i32 to vector<1x1x256xi32>
    %25 = arith.cmpi sge, %23, %24 : vector<1x1x256xi32>
    %c-3_i32_8 = arith.constant -3 : i32
    %26 = vector.broadcast %c-3_i32_8 : i32 to vector<1x1x256xi32>
    %27 = arith.addi %21, %26 : vector<1x1x256xi32>
    %c16_i32_9 = arith.constant 16 : i32
    %28 = vector.broadcast %c16_i32_9 : i32 to vector<1x1x256xi32>
    %29 = arith.cmpi slt, %27, %28 : vector<1x1x256xi32>
    %30 = arith.andi %25, %29 : vector<1x1x256xi1>
    %31 = arith.extui %30 : vector<1x1x256xi1> to vector<1x1x256xi32>
    %32 = arith.sitofp %31 : vector<1x1x256xi32> to vector<1x1x256xf32>
    %c-2_i32 = arith.constant -2 : i32
    %33 = vector.broadcast %c-2_i32 : i32 to vector<1x1x256xi32>
    %34 = arith.addi %21, %33 : vector<1x1x256xi32>
    %c0_i32_10 = arith.constant 0 : i32
    %35 = vector.broadcast %c0_i32_10 : i32 to vector<1x1x256xi32>
    %36 = arith.cmpi sge, %34, %35 : vector<1x1x256xi32>
    %c-2_i32_11 = arith.constant -2 : i32
    %37 = vector.broadcast %c-2_i32_11 : i32 to vector<1x1x256xi32>
    %38 = arith.addi %21, %37 : vector<1x1x256xi32>
    %c16_i32_12 = arith.constant 16 : i32
    %39 = vector.broadcast %c16_i32_12 : i32 to vector<1x1x256xi32>
    %40 = arith.cmpi slt, %38, %39 : vector<1x1x256xi32>
    %41 = arith.andi %36, %40 : vector<1x1x256xi1>
    %42 = arith.extui %41 : vector<1x1x256xi1> to vector<1x1x256xi32>
    %43 = arith.sitofp %42 : vector<1x1x256xi32> to vector<1x1x256xf32>
    %c-1_i32 = arith.constant -1 : i32
    %44 = vector.broadcast %c-1_i32 : i32 to vector<1x1x256xi32>
    %45 = arith.addi %21, %44 : vector<1x1x256xi32>
    %c0_i32_13 = arith.constant 0 : i32
    %46 = vector.broadcast %c0_i32_13 : i32 to vector<1x1x256xi32>
    %47 = arith.cmpi sge, %45, %46 : vector<1x1x256xi32>
    %c-1_i32_14 = arith.constant -1 : i32
    %48 = vector.broadcast %c-1_i32_14 : i32 to vector<1x1x256xi32>
    %49 = arith.addi %21, %48 : vector<1x1x256xi32>
    %c16_i32_15 = arith.constant 16 : i32
    %50 = vector.broadcast %c16_i32_15 : i32 to vector<1x1x256xi32>
    %51 = arith.cmpi slt, %49, %50 : vector<1x1x256xi32>
    %52 = arith.andi %47, %51 : vector<1x1x256xi1>
    %53 = arith.extui %52 : vector<1x1x256xi1> to vector<1x1x256xi32>
    %54 = arith.sitofp %53 : vector<1x1x256xi32> to vector<1x1x256xf32>
    %c1_i32_16 = arith.constant 1 : i32
    %55 = vector.broadcast %c1_i32_16 : i32 to vector<1x1x256xi32>
    %56 = arith.addi %21, %55 : vector<1x1x256xi32>
    %c0_i32_17 = arith.constant 0 : i32
    %57 = vector.broadcast %c0_i32_17 : i32 to vector<1x1x256xi32>
    %58 = arith.cmpi sge, %56, %57 : vector<1x1x256xi32>
    %c1_i32_18 = arith.constant 1 : i32
    %59 = vector.broadcast %c1_i32_18 : i32 to vector<1x1x256xi32>
    %60 = arith.addi %21, %59 : vector<1x1x256xi32>
    %c16_i32_19 = arith.constant 16 : i32
    %61 = vector.broadcast %c16_i32_19 : i32 to vector<1x1x256xi32>
    %62 = arith.cmpi slt, %60, %61 : vector<1x1x256xi32>
    %63 = arith.andi %58, %62 : vector<1x1x256xi1>
    %64 = arith.extui %63 : vector<1x1x256xi1> to vector<1x1x256xi32>
    %65 = arith.sitofp %64 : vector<1x1x256xi32> to vector<1x1x256xf32>
    %c2_i32 = arith.constant 2 : i32
    %66 = vector.broadcast %c2_i32 : i32 to vector<1x1x256xi32>
    %67 = arith.addi %21, %66 : vector<1x1x256xi32>
    %c0_i32_20 = arith.constant 0 : i32
    %68 = vector.broadcast %c0_i32_20 : i32 to vector<1x1x256xi32>
    %69 = arith.cmpi sge, %67, %68 : vector<1x1x256xi32>
    %c2_i32_21 = arith.constant 2 : i32
    %70 = vector.broadcast %c2_i32_21 : i32 to vector<1x1x256xi32>
    %71 = arith.addi %21, %70 : vector<1x1x256xi32>
    %c16_i32_22 = arith.constant 16 : i32
    %72 = vector.broadcast %c16_i32_22 : i32 to vector<1x1x256xi32>
    %73 = arith.cmpi slt, %71, %72 : vector<1x1x256xi32>
    %74 = arith.andi %69, %73 : vector<1x1x256xi1>
    %75 = arith.extui %74 : vector<1x1x256xi1> to vector<1x1x256xi32>
    %76 = arith.sitofp %75 : vector<1x1x256xi32> to vector<1x1x256xf32>
    %c3_i32 = arith.constant 3 : i32
    %77 = vector.broadcast %c3_i32 : i32 to vector<1x1x256xi32>
    %78 = arith.addi %21, %77 : vector<1x1x256xi32>
    %c0_i32_23 = arith.constant 0 : i32
    %79 = vector.broadcast %c0_i32_23 : i32 to vector<1x1x256xi32>
    %80 = arith.cmpi sge, %78, %79 : vector<1x1x256xi32>
    %c3_i32_24 = arith.constant 3 : i32
    %81 = vector.broadcast %c3_i32_24 : i32 to vector<1x1x256xi32>
    %82 = arith.addi %21, %81 : vector<1x1x256xi32>
    %c16_i32_25 = arith.constant 16 : i32
    %83 = vector.broadcast %c16_i32_25 : i32 to vector<1x1x256xi32>
    %84 = arith.cmpi slt, %82, %83 : vector<1x1x256xi32>
    %85 = arith.andi %80, %84 : vector<1x1x256xi1>
    %86 = arith.extui %85 : vector<1x1x256xi1> to vector<1x1x256xi32>
    %87 = arith.sitofp %86 : vector<1x1x256xi32> to vector<1x1x256xf32>
    %88 = vector.extract_strided_slice %4 {offsets = [0, 0, 77], sizes = [2, 4, 256], strides = [1, 1, 1]} : vector<2x4x512xf32> to vector<2x4x256xf32>
    %89 = vector.broadcast %32 : vector<1x1x256xf32> to vector<2x4x256xf32>
    %90 = arith.mulf %88, %89 : vector<2x4x256xf32>
    %c0_26 = arith.constant 0 : index
    %c0_27 = arith.constant 0 : index
    %c0_28 = arith.constant 0 : index
    %91 = vector.load %arg5[%c0_26, %c0_27, %c0_28] : memref<2x196x256xf32, #tpu.memory_space<vmem>>, vector<2x4x256xf32>
    tpu.vector_store %arg5[%c0_26, %c0_27, %c0_28], %90 {strides = array<i32>} : memref<2x196x256xf32, #tpu.memory_space<vmem>>, vector<2x4x256xf32>,
    %92 = vector.extract_strided_slice %4 {offsets = [0, 0, 78], sizes = [2, 4, 256], strides = [1, 1, 1]} : vector<2x4x512xf32> to vector<2x4x256xf32>
    %93 = vector.broadcast %43 : vector<1x1x256xf32> to vector<2x4x256xf32>
    %94 = arith.mulf %92, %93 : vector<2x4x256xf32>
    %c0_29 = arith.constant 0 : index
    %c4 = arith.constant 4 : index
    %c0_30 = arith.constant 0 : index
    %95 = vector.load %arg5[%c0_29, %c4, %c0_30] : memref<2x196x256xf32, #tpu.memory_space<vmem>>, vector<2x4x256xf32>
    tpu.vector_store %arg5[%c0_29, %c4, %c0_30], %94 {strides = array<i32>} : memref<2x196x256xf32, #tpu.memory_space<vmem>>, vector<2x4x256xf32>,
    %96 = vector.extract_strided_slice %4 {offsets = [0, 0, 79], sizes = [2, 4, 256], strides = [1, 1, 1]} : vector<2x4x512xf32> to vector<2x4x256xf32>
    %97 = vector.broadcast %54 : vector<1x1x256xf32> to vector<2x4x256xf32>
    %98 = arith.mulf %96, %97 : vector<2x4x256xf32>
    %c0_31 = arith.constant 0 : index
    %c8 = arith.constant 8 : index
    %c0_32 = arith.constant 0 : index
    %99 = vector.load %arg5[%c0_31, %c8, %c0_32] : memref<2x196x256xf32, #tpu.memory_space<vmem>>, vector<2x4x256xf32>
    tpu.vector_store %arg5[%c0_31, %c8, %c0_32], %98 {strides = array<i32>} : memref<2x196x256xf32, #tpu.memory_space<vmem>>, vector<2x4x256xf32>,
    %100 = vector.extract_strided_slice %4 {offsets = [0, 0, 80], sizes = [2, 4, 256], strides = [1, 1, 1]} : vector<2x4x512xf32> to vector<2x4x256xf32>
    %c0_33 = arith.constant 0 : index
    %c12 = arith.constant 12 : index
    %c0_34 = arith.constant 0 : index
    %101 = vector.load %arg5[%c0_33, %c12, %c0_34] : memref<2x196x256xf32, #tpu.memory_space<vmem>>, vector<2x4x256xf32>
    tpu.vector_store %arg5[%c0_33, %c12, %c0_34], %100 {strides = array<i32>} : memref<2x196x256xf32, #tpu.memory_space<vmem>>, vector<2x4x256xf32>,
    %102 = vector.extract_strided_slice %4 {offsets = [0, 0, 81], sizes = [2, 4, 256], strides = [1, 1, 1]} : vector<2x4x512xf32> to vector<2x4x256xf32>
    %103 = vector.broadcast %65 : vector<1x1x256xf32> to vector<2x4x256xf32>
    %104 = arith.mulf %102, %103 : vector<2x4x256xf32>
    %c0_35 = arith.constant 0 : index
    %c16 = arith.constant 16 : index
    %c0_36 = arith.constant 0 : index
    %105 = vector.load %arg5[%c0_35, %c16, %c0_36] : memref<2x196x256xf32, #tpu.memory_space<vmem>>, vector<2x4x256xf32>
    tpu.vector_store %arg5[%c0_35, %c16, %c0_36], %104 {strides = array<i32>} : memref<2x196x256xf32, #tpu.memory_space<vmem>>, vector<2x4x256xf32>,
    %106 = vector.extract_strided_slice %4 {offsets = [0, 0, 82], sizes = [2, 4, 256], strides = [1, 1, 1]} : vector<2x4x512xf32> to vector<2x4x256xf32>
    %107 = vector.broadcast %76 : vector<1x1x256xf32> to vector<2x4x256xf32>
    %108 = arith.mulf %106, %107 : vector<2x4x256xf32>
    %c0_37 = arith.constant 0 : index
    %c20 = arith.constant 20 : index
    %c0_38 = arith.constant 0 : index
    %109 = vector.load %arg5[%c0_37, %c20, %c0_38] : memref<2x196x256xf32, #tpu.memory_space<vmem>>, vector<2x4x256xf32>
    tpu.vector_store %arg5[%c0_37, %c20, %c0_38], %108 {strides = array<i32>} : memref<2x196x256xf32, #tpu.memory_space<vmem>>, vector<2x4x256xf32>,
    %110 = vector.extract_strided_slice %4 {offsets = [0, 0, 83], sizes = [2, 4, 256], strides = [1, 1, 1]} : vector<2x4x512xf32> to vector<2x4x256xf32>
    %111 = vector.broadcast %87 : vector<1x1x256xf32> to vector<2x4x256xf32>
    %112 = arith.mulf %110, %111 : vector<2x4x256xf32>
    %c0_39 = arith.constant 0 : index
    %c24 = arith.constant 24 : index
    %c0_40 = arith.constant 0 : index
    %113 = vector.load %arg5[%c0_39, %c24, %c0_40] : memref<2x196x256xf32, #tpu.memory_space<vmem>>, vector<2x4x256xf32>
    tpu.vector_store %arg5[%c0_39, %c24, %c0_40], %112 {strides = array<i32>} : memref<2x196x256xf32, #tpu.memory_space<vmem>>, vector<2x4x256xf32>,
    %114 = vector.extract_strided_slice %4 {offsets = [0, 0, 93], sizes = [2, 4, 256], strides = [1, 1, 1]} : vector<2x4x512xf32> to vector<2x4x256xf32>
    %115 = vector.broadcast %32 : vector<1x1x256xf32> to vector<2x4x256xf32>
    %116 = arith.mulf %114, %115 : vector<2x4x256xf32>
    %c0_41 = arith.constant 0 : index
    %c28 = arith.constant 28 : index
    %c0_42 = arith.constant 0 : index
    %117 = vector.load %arg5[%c0_41, %c28, %c0_42] : memref<2x196x256xf32, #tpu.memory_space<vmem>>, vector<2x4x256xf32>
    tpu.vector_store %arg5[%c0_41, %c28, %c0_42], %116 {strides = array<i32>} : memref<2x196x256xf32, #tpu.memory_space<vmem>>, vector<2x4x256xf32>,
    %118 = vector.extract_strided_slice %4 {offsets = [0, 0, 94], sizes = [2, 4, 256], strides = [1, 1, 1]} : vector<2x4x512xf32> to vector<2x4x256xf32>
    %119 = vector.broadcast %43 : vector<1x1x256xf32> to vector<2x4x256xf32>
    %120 = arith.mulf %118, %119 : vector<2x4x256xf32>
    %c0_43 = arith.constant 0 : index
    %c32 = arith.constant 32 : index
    %c0_44 = arith.constant 0 : index
    %121 = vector.load %arg5[%c0_43, %c32, %c0_44] : memref<2x196x256xf32, #tpu.memory_space<vmem>>, vector<2x4x256xf32>
    tpu.vector_store %arg5[%c0_43, %c32, %c0_44], %120 {strides = array<i32>} : memref<2x196x256xf32, #tpu.memory_space<vmem>>, vector<2x4x256xf32>,
    %122 = vector.extract_strided_slice %4 {offsets = [0, 0, 95], sizes = [2, 4, 256], strides = [1, 1, 1]} : vector<2x4x512xf32> to vector<2x4x256xf32>
    %123 = vector.broadcast %54 : vector<1x1x256xf32> to vector<2x4x256xf32>
    %124 = arith.mulf %122, %123 : vector<2x4x256xf32>
    %c0_45 = arith.constant 0 : index
    %c36 = arith.constant 36 : index
    %c0_46 = arith.constant 0 : index
    %125 = vector.load %arg5[%c0_45, %c36, %c0_46] : memref<2x196x256xf32, #tpu.memory_space<vmem>>, vector<2x4x256xf32>
    tpu.vector_store %arg5[%c0_45, %c36, %c0_46], %124 {strides = array<i32>} : memref<2x196x256xf32, #tpu.memory_space<vmem>>, vector<2x4x256xf32>,
    %126 = vector.extract_strided_slice %4 {offsets = [0, 0, 96], sizes = [2, 4, 256], strides = [1, 1, 1]} : vector<2x4x512xf32> to vector<2x4x256xf32>
    %c0_47 = arith.constant 0 : index
    %c40 = arith.constant 40 : index
    %c0_48 = arith.constant 0 : index
    %127 = vector.load %arg5[%c0_47, %c40, %c0_48] : memref<2x196x256xf32, #tpu.memory_space<vmem>>, vector<2x4x256xf32>
    tpu.vector_store %arg5[%c0_47, %c40, %c0_48], %126 {strides = array<i32>} : memref<2x196x256xf32, #tpu.memory_space<vmem>>, vector<2x4x256xf32>,
    %128 = vector.extract_strided_slice %4 {offsets = [0, 0, 97], sizes = [2, 4, 256], strides = [1, 1, 1]} : vector<2x4x512xf32> to vector<2x4x256xf32>
    %129 = vector.broadcast %65 : vector<1x1x256xf32> to vector<2x4x256xf32>
    %130 = arith.mulf %128, %129 : vector<2x4x256xf32>
    %c0_49 = arith.constant 0 : index
    %c44 = arith.constant 44 : index
    %c0_50 = arith.constant 0 : index
    %131 = vector.load %arg5[%c0_49, %c44, %c0_50] : memref<2x196x256xf32, #tpu.memory_space<vmem>>, vector<2x4x256xf32>
    tpu.vector_store %arg5[%c0_49, %c44, %c0_50], %130 {strides = array<i32>} : memref<2x196x256xf32, #tpu.memory_space<vmem>>, vector<2x4x256xf32>,
    %132 = vector.extract_strided_slice %4 {offsets = [0, 0, 98], sizes = [2, 4, 256], strides = [1, 1, 1]} : vector<2x4x512xf32> to vector<2x4x256xf32>
    %133 = vector.broadcast %76 : vector<1x1x256xf32> to vector<2x4x256xf32>
    %134 = arith.mulf %132, %133 : vector<2x4x256xf32>
    %c0_51 = arith.constant 0 : index
    %c48 = arith.constant 48 : index
    %c0_52 = arith.constant 0 : index
    %135 = vector.load %arg5[%c0_51, %c48, %c0_52] : memref<2x196x256xf32, #tpu.memory_space<vmem>>, vector<2x4x256xf32>
    tpu.vector_store %arg5[%c0_51, %c48, %c0_52], %134 {strides = array<i32>} : memref<2x196x256xf32, #tpu.memory_space<vmem>>, vector<2x4x256xf32>,
    %136 = vector.extract_strided_slice %4 {offsets = [0, 0, 99], sizes = [2, 4, 256], strides = [1, 1, 1]} : vector<2x4x512xf32> to vector<2x4x256xf32>
    %137 = vector.broadcast %87 : vector<1x1x256xf32> to vector<2x4x256xf32>
    %138 = arith.mulf %136, %137 : vector<2x4x256xf32>
    %c0_53 = arith.constant 0 : index
    %c52 = arith.constant 52 : index
    %c0_54 = arith.constant 0 : index
    %139 = vector.load %arg5[%c0_53, %c52, %c0_54] : memref<2x196x256xf32, #tpu.memory_space<vmem>>, vector<2x4x256xf32>
    tpu.vector_store %arg5[%c0_53, %c52, %c0_54], %138 {strides = array<i32>} : memref<2x196x256xf32, #tpu.memory_space<vmem>>, vector<2x4x256xf32>,
    %140 = vector.extract_strided_slice %4 {offsets = [0, 0, 109], sizes = [2, 4, 256], strides = [1, 1, 1]} : vector<2x4x512xf32> to vector<2x4x256xf32>
    %141 = vector.broadcast %32 : vector<1x1x256xf32> to vector<2x4x256xf32>
    %142 = arith.mulf %140, %141 : vector<2x4x256xf32>
    %c0_55 = arith.constant 0 : index
    %c56 = arith.constant 56 : index
    %c0_56 = arith.constant 0 : index
    %143 = vector.load %arg5[%c0_55, %c56, %c0_56] : memref<2x196x256xf32, #tpu.memory_space<vmem>>, vector<2x4x256xf32>
    tpu.vector_store %arg5[%c0_55, %c56, %c0_56], %142 {strides = array<i32>} : memref<2x196x256xf32, #tpu.memory_space<vmem>>, vector<2x4x256xf32>,
    %144 = vector.extract_strided_slice %4 {offsets = [0, 0, 110], sizes = [2, 4, 256], strides = [1, 1, 1]} : vector<2x4x512xf32> to vector<2x4x256xf32>
    %145 = vector.broadcast %43 : vector<1x1x256xf32> to vector<2x4x256xf32>
    %146 = arith.mulf %144, %145 : vector<2x4x256xf32>
    %c0_57 = arith.constant 0 : index
    %c60 = arith.constant 60 : index
    %c0_58 = arith.constant 0 : index
    %147 = vector.load %arg5[%c0_57, %c60, %c0_58] : memref<2x196x256xf32, #tpu.memory_space<vmem>>, vector<2x4x256xf32>
    tpu.vector_store %arg5[%c0_57, %c60, %c0_58], %146 {strides = array<i32>} : memref<2x196x256xf32, #tpu.memory_space<vmem>>, vector<2x4x256xf32>,
    %148 = vector.extract_strided_slice %4 {offsets = [0, 0, 111], sizes = [2, 4, 256], strides = [1, 1, 1]} : vector<2x4x512xf32> to vector<2x4x256xf32>
    %149 = vector.broadcast %54 : vector<1x1x256xf32> to vector<2x4x256xf32>
    %150 = arith.mulf %148, %149 : vector<2x4x256xf32>
    %c0_59 = arith.constant 0 : index
    %c64 = arith.constant 64 : index
    %c0_60 = arith.constant 0 : index
    %151 = vector.load %arg5[%c0_59, %c64, %c0_60] : memref<2x196x256xf32, #tpu.memory_space<vmem>>, vector<2x4x256xf32>
    tpu.vector_store %arg5[%c0_59, %c64, %c0_60], %150 {strides = array<i32>} : memref<2x196x256xf32, #tpu.memory_space<vmem>>, vector<2x4x256xf32>,
    %152 = vector.extract_strided_slice %4 {offsets = [0, 0, 112], sizes = [2, 4, 256], strides = [1, 1, 1]} : vector<2x4x512xf32> to vector<2x4x256xf32>
    %c0_61 = arith.constant 0 : index
    %c68 = arith.constant 68 : index
    %c0_62 = arith.constant 0 : index
    %153 = vector.load %arg5[%c0_61, %c68, %c0_62] : memref<2x196x256xf32, #tpu.memory_space<vmem>>, vector<2x4x256xf32>
    tpu.vector_store %arg5[%c0_61, %c68, %c0_62], %152 {strides = array<i32>} : memref<2x196x256xf32, #tpu.memory_space<vmem>>, vector<2x4x256xf32>,
    %154 = vector.extract_strided_slice %4 {offsets = [0, 0, 113], sizes = [2, 4, 256], strides = [1, 1, 1]} : vector<2x4x512xf32> to vector<2x4x256xf32>
    %155 = vector.broadcast %65 : vector<1x1x256xf32> to vector<2x4x256xf32>
    %156 = arith.mulf %154, %155 : vector<2x4x256xf32>
    %c0_63 = arith.constant 0 : index
    %c72 = arith.constant 72 : index
    %c0_64 = arith.constant 0 : index
    %157 = vector.load %arg5[%c0_63, %c72, %c0_64] : memref<2x196x256xf32, #tpu.memory_space<vmem>>, vector<2x4x256xf32>
    tpu.vector_store %arg5[%c0_63, %c72, %c0_64], %156 {strides = array<i32>} : memref<2x196x256xf32, #tpu.memory_space<vmem>>, vector<2x4x256xf32>,
    %158 = vector.extract_strided_slice %4 {offsets = [0, 0, 114], sizes = [2, 4, 256], strides = [1, 1, 1]} : vector<2x4x512xf32> to vector<2x4x256xf32>
    %159 = vector.broadcast %76 : vector<1x1x256xf32> to vector<2x4x256xf32>
    %160 = arith.mulf %158, %159 : vector<2x4x256xf32>
    %c0_65 = arith.constant 0 : index
    %c76 = arith.constant 76 : index
    %c0_66 = arith.constant 0 : index
    %161 = vector.load %arg5[%c0_65, %c76, %c0_66] : memref<2x196x256xf32, #tpu.memory_space<vmem>>, vector<2x4x256xf32>
    tpu.vector_store %arg5[%c0_65, %c76, %c0_66], %160 {strides = array<i32>} : memref<2x196x256xf32, #tpu.memory_space<vmem>>, vector<2x4x256xf32>,
    %162 = vector.extract_strided_slice %4 {offsets = [0, 0, 115], sizes = [2, 4, 256], strides = [1, 1, 1]} : vector<2x4x512xf32> to vector<2x4x256xf32>
    %163 = vector.broadcast %87 : vector<1x1x256xf32> to vector<2x4x256xf32>
    %164 = arith.mulf %162, %163 : vector<2x4x256xf32>
    %c0_67 = arith.constant 0 : index
    %c80 = arith.constant 80 : index
    %c0_68 = arith.constant 0 : index
    %165 = vector.load %arg5[%c0_67, %c80, %c0_68] : memref<2x196x256xf32, #tpu.memory_space<vmem>>, vector<2x4x256xf32>
    tpu.vector_store %arg5[%c0_67, %c80, %c0_68], %164 {strides = array<i32>} : memref<2x196x256xf32, #tpu.memory_space<vmem>>, vector<2x4x256xf32>,
    %166 = vector.extract_strided_slice %4 {offsets = [0, 0, 125], sizes = [2, 4, 256], strides = [1, 1, 1]} : vector<2x4x512xf32> to vector<2x4x256xf32>
    %167 = vector.broadcast %32 : vector<1x1x256xf32> to vector<2x4x256xf32>
    %168 = arith.mulf %166, %167 : vector<2x4x256xf32>
    %c0_69 = arith.constant 0 : index
    %c84 = arith.constant 84 : index
    %c0_70 = arith.constant 0 : index
    %169 = vector.load %arg5[%c0_69, %c84, %c0_70] : memref<2x196x256xf32, #tpu.memory_space<vmem>>, vector<2x4x256xf32>
    tpu.vector_store %arg5[%c0_69, %c84, %c0_70], %168 {strides = array<i32>} : memref<2x196x256xf32, #tpu.memory_space<vmem>>, vector<2x4x256xf32>,
    %170 = vector.extract_strided_slice %4 {offsets = [0, 0, 126], sizes = [2, 4, 256], strides = [1, 1, 1]} : vector<2x4x512xf32> to vector<2x4x256xf32>
    %171 = vector.broadcast %43 : vector<1x1x256xf32> to vector<2x4x256xf32>
    %172 = arith.mulf %170, %171 : vector<2x4x256xf32>
    %c0_71 = arith.constant 0 : index
    %c88 = arith.constant 88 : index
    %c0_72 = arith.constant 0 : index
    %173 = vector.load %arg5[%c0_71, %c88, %c0_72] : memref<2x196x256xf32, #tpu.memory_space<vmem>>, vector<2x4x256xf32>
    tpu.vector_store %arg5[%c0_71, %c88, %c0_72], %172 {strides = array<i32>} : memref<2x196x256xf32, #tpu.memory_space<vmem>>, vector<2x4x256xf32>,
    %174 = vector.extract_strided_slice %4 {offsets = [0, 0, 127], sizes = [2, 4, 256], strides = [1, 1, 1]} : vector<2x4x512xf32> to vector<2x4x256xf32>
    %175 = vector.broadcast %54 : vector<1x1x256xf32> to vector<2x4x256xf32>
    %176 = arith.mulf %174, %175 : vector<2x4x256xf32>
    %c0_73 = arith.constant 0 : index
    %c92 = arith.constant 92 : index
    %c0_74 = arith.constant 0 : index
    %177 = vector.load %arg5[%c0_73, %c92, %c0_74] : memref<2x196x256xf32, #tpu.memory_space<vmem>>, vector<2x4x256xf32>
    tpu.vector_store %arg5[%c0_73, %c92, %c0_74], %176 {strides = array<i32>} : memref<2x196x256xf32, #tpu.memory_space<vmem>>, vector<2x4x256xf32>,
    %178 = vector.extract_strided_slice %4 {offsets = [0, 0, 128], sizes = [2, 4, 256], strides = [1, 1, 1]} : vector<2x4x512xf32> to vector<2x4x256xf32>
    %c0_75 = arith.constant 0 : index
    %c96 = arith.constant 96 : index
    %c0_76 = arith.constant 0 : index
    %179 = vector.load %arg5[%c0_75, %c96, %c0_76] : memref<2x196x256xf32, #tpu.memory_space<vmem>>, vector<2x4x256xf32>
    tpu.vector_store %arg5[%c0_75, %c96, %c0_76], %178 {strides = array<i32>} : memref<2x196x256xf32, #tpu.memory_space<vmem>>, vector<2x4x256xf32>,
    %180 = vector.extract_strided_slice %4 {offsets = [0, 0, 129], sizes = [2, 4, 256], strides = [1, 1, 1]} : vector<2x4x512xf32> to vector<2x4x256xf32>
    %181 = vector.broadcast %65 : vector<1x1x256xf32> to vector<2x4x256xf32>
    %182 = arith.mulf %180, %181 : vector<2x4x256xf32>
    %c0_77 = arith.constant 0 : index
    %c100 = arith.constant 100 : index
    %c0_78 = arith.constant 0 : index
    %183 = vector.load %arg5[%c0_77, %c100, %c0_78] : memref<2x196x256xf32, #tpu.memory_space<vmem>>, vector<2x4x256xf32>
    tpu.vector_store %arg5[%c0_77, %c100, %c0_78], %182 {strides = array<i32>} : memref<2x196x256xf32, #tpu.memory_space<vmem>>, vector<2x4x256xf32>,
    %184 = vector.extract_strided_slice %4 {offsets = [0, 0, 130], sizes = [2, 4, 256], strides = [1, 1, 1]} : vector<2x4x512xf32> to vector<2x4x256xf32>
    %185 = vector.broadcast %76 : vector<1x1x256xf32> to vector<2x4x256xf32>
    %186 = arith.mulf %184, %185 : vector<2x4x256xf32>
    %c0_79 = arith.constant 0 : index
    %c104 = arith.constant 104 : index
    %c0_80 = arith.constant 0 : index
    %187 = vector.load %arg5[%c0_79, %c104, %c0_80] : memref<2x196x256xf32, #tpu.memory_space<vmem>>, vector<2x4x256xf32>
    tpu.vector_store %arg5[%c0_79, %c104, %c0_80], %186 {strides = array<i32>} : memref<2x196x256xf32, #tpu.memory_space<vmem>>, vector<2x4x256xf32>,
    %188 = vector.extract_strided_slice %4 {offsets = [0, 0, 131], sizes = [2, 4, 256], strides = [1, 1, 1]} : vector<2x4x512xf32> to vector<2x4x256xf32>
    %189 = vector.broadcast %87 : vector<1x1x256xf32> to vector<2x4x256xf32>
    %190 = arith.mulf %188, %189 : vector<2x4x256xf32>
    %c0_81 = arith.constant 0 : index
    %c108 = arith.constant 108 : index
    %c0_82 = arith.constant 0 : index
    %191 = vector.load %arg5[%c0_81, %c108, %c0_82] : memref<2x196x256xf32, #tpu.memory_space<vmem>>, vector<2x4x256xf32>
    tpu.vector_store %arg5[%c0_81, %c108, %c0_82], %190 {strides = array<i32>} : memref<2x196x256xf32, #tpu.memory_space<vmem>>, vector<2x4x256xf32>,
    %192 = vector.extract_strided_slice %4 {offsets = [0, 0, 141], sizes = [2, 4, 256], strides = [1, 1, 1]} : vector<2x4x512xf32> to vector<2x4x256xf32>
    %193 = vector.broadcast %32 : vector<1x1x256xf32> to vector<2x4x256xf32>
    %194 = arith.mulf %192, %193 : vector<2x4x256xf32>
    %c0_83 = arith.constant 0 : index
    %c112 = arith.constant 112 : index
    %c0_84 = arith.constant 0 : index
    %195 = vector.load %arg5[%c0_83, %c112, %c0_84] : memref<2x196x256xf32, #tpu.memory_space<vmem>>, vector<2x4x256xf32>
    tpu.vector_store %arg5[%c0_83, %c112, %c0_84], %194 {strides = array<i32>} : memref<2x196x256xf32, #tpu.memory_space<vmem>>, vector<2x4x256xf32>,
    %196 = vector.extract_strided_slice %4 {offsets = [0, 0, 142], sizes = [2, 4, 256], strides = [1, 1, 1]} : vector<2x4x512xf32> to vector<2x4x256xf32>
    %197 = vector.broadcast %43 : vector<1x1x256xf32> to vector<2x4x256xf32>
    %198 = arith.mulf %196, %197 : vector<2x4x256xf32>
    %c0_85 = arith.constant 0 : index
    %c116 = arith.constant 116 : index
    %c0_86 = arith.constant 0 : index
    %199 = vector.load %arg5[%c0_85, %c116, %c0_86] : memref<2x196x256xf32, #tpu.memory_space<vmem>>, vector<2x4x256xf32>
    tpu.vector_store %arg5[%c0_85, %c116, %c0_86], %198 {strides = array<i32>} : memref<2x196x256xf32, #tpu.memory_space<vmem>>, vector<2x4x256xf32>,
    %200 = vector.extract_strided_slice %4 {offsets = [0, 0, 143], sizes = [2, 4, 256], strides = [1, 1, 1]} : vector<2x4x512xf32> to vector<2x4x256xf32>
    %201 = vector.broadcast %54 : vector<1x1x256xf32> to vector<2x4x256xf32>
    %202 = arith.mulf %200, %201 : vector<2x4x256xf32>
    %c0_87 = arith.constant 0 : index
    %c120 = arith.constant 120 : index
    %c0_88 = arith.constant 0 : index
    %203 = vector.load %arg5[%c0_87, %c120, %c0_88] : memref<2x196x256xf32, #tpu.memory_space<vmem>>, vector<2x4x256xf32>
    tpu.vector_store %arg5[%c0_87, %c120, %c0_88], %202 {strides = array<i32>} : memref<2x196x256xf32, #tpu.memory_space<vmem>>, vector<2x4x256xf32>,
    %204 = vector.extract_strided_slice %4 {offsets = [0, 0, 144], sizes = [2, 4, 256], strides = [1, 1, 1]} : vector<2x4x512xf32> to vector<2x4x256xf32>
    %c0_89 = arith.constant 0 : index
    %c124 = arith.constant 124 : index
    %c0_90 = arith.constant 0 : index
    %205 = vector.load %arg5[%c0_89, %c124, %c0_90] : memref<2x196x256xf32, #tpu.memory_space<vmem>>, vector<2x4x256xf32>
    tpu.vector_store %arg5[%c0_89, %c124, %c0_90], %204 {strides = array<i32>} : memref<2x196x256xf32, #tpu.memory_space<vmem>>, vector<2x4x256xf32>,
    %206 = vector.extract_strided_slice %4 {offsets = [0, 0, 145], sizes = [2, 4, 256], strides = [1, 1, 1]} : vector<2x4x512xf32> to vector<2x4x256xf32>
    %207 = vector.broadcast %65 : vector<1x1x256xf32> to vector<2x4x256xf32>
    %208 = arith.mulf %206, %207 : vector<2x4x256xf32>
    %c0_91 = arith.constant 0 : index
    %c128 = arith.constant 128 : index
    %c0_92 = arith.constant 0 : index
    %209 = vector.load %arg5[%c0_91, %c128, %c0_92] : memref<2x196x256xf32, #tpu.memory_space<vmem>>, vector<2x4x256xf32>
    tpu.vector_store %arg5[%c0_91, %c128, %c0_92], %208 {strides = array<i32>} : memref<2x196x256xf32, #tpu.memory_space<vmem>>, vector<2x4x256xf32>,
    %210 = vector.extract_strided_slice %4 {offsets = [0, 0, 146], sizes = [2, 4, 256], strides = [1, 1, 1]} : vector<2x4x512xf32> to vector<2x4x256xf32>
    %211 = vector.broadcast %76 : vector<1x1x256xf32> to vector<2x4x256xf32>
    %212 = arith.mulf %210, %211 : vector<2x4x256xf32>
    %c0_93 = arith.constant 0 : index
    %c132 = arith.constant 132 : index
    %c0_94 = arith.constant 0 : index
    %213 = vector.load %arg5[%c0_93, %c132, %c0_94] : memref<2x196x256xf32, #tpu.memory_space<vmem>>, vector<2x4x256xf32>
    tpu.vector_store %arg5[%c0_93, %c132, %c0_94], %212 {strides = array<i32>} : memref<2x196x256xf32, #tpu.memory_space<vmem>>, vector<2x4x256xf32>,
    %214 = vector.extract_strided_slice %4 {offsets = [0, 0, 147], sizes = [2, 4, 256], strides = [1, 1, 1]} : vector<2x4x512xf32> to vector<2x4x256xf32>
    %215 = vector.broadcast %87 : vector<1x1x256xf32> to vector<2x4x256xf32>
    %216 = arith.mulf %214, %215 : vector<2x4x256xf32>
    %c0_95 = arith.constant 0 : index
    %c136 = arith.constant 136 : index
    %c0_96 = arith.constant 0 : index
    %217 = vector.load %arg5[%c0_95, %c136, %c0_96] : memref<2x196x256xf32, #tpu.memory_space<vmem>>, vector<2x4x256xf32>
    tpu.vector_store %arg5[%c0_95, %c136, %c0_96], %216 {strides = array<i32>} : memref<2x196x256xf32, #tpu.memory_space<vmem>>, vector<2x4x256xf32>,
    %218 = vector.extract_strided_slice %4 {offsets = [0, 0, 157], sizes = [2, 4, 256], strides = [1, 1, 1]} : vector<2x4x512xf32> to vector<2x4x256xf32>
    %219 = vector.broadcast %32 : vector<1x1x256xf32> to vector<2x4x256xf32>
    %220 = arith.mulf %218, %219 : vector<2x4x256xf32>
    %c0_97 = arith.constant 0 : index
    %c140 = arith.constant 140 : index
    %c0_98 = arith.constant 0 : index
    %221 = vector.load %arg5[%c0_97, %c140, %c0_98] : memref<2x196x256xf32, #tpu.memory_space<vmem>>, vector<2x4x256xf32>
    tpu.vector_store %arg5[%c0_97, %c140, %c0_98], %220 {strides = array<i32>} : memref<2x196x256xf32, #tpu.memory_space<vmem>>, vector<2x4x256xf32>,
    %222 = vector.extract_strided_slice %4 {offsets = [0, 0, 158], sizes = [2, 4, 256], strides = [1, 1, 1]} : vector<2x4x512xf32> to vector<2x4x256xf32>
    %223 = vector.broadcast %43 : vector<1x1x256xf32> to vector<2x4x256xf32>
    %224 = arith.mulf %222, %223 : vector<2x4x256xf32>
    %c0_99 = arith.constant 0 : index
    %c144 = arith.constant 144 : index
    %c0_100 = arith.constant 0 : index
    %225 = vector.load %arg5[%c0_99, %c144, %c0_100] : memref<2x196x256xf32, #tpu.memory_space<vmem>>, vector<2x4x256xf32>
    tpu.vector_store %arg5[%c0_99, %c144, %c0_100], %224 {strides = array<i32>} : memref<2x196x256xf32, #tpu.memory_space<vmem>>, vector<2x4x256xf32>,
    %226 = vector.extract_strided_slice %4 {offsets = [0, 0, 159], sizes = [2, 4, 256], strides = [1, 1, 1]} : vector<2x4x512xf32> to vector<2x4x256xf32>
    %227 = vector.broadcast %54 : vector<1x1x256xf32> to vector<2x4x256xf32>
    %228 = arith.mulf %226, %227 : vector<2x4x256xf32>
    %c0_101 = arith.constant 0 : index
    %c148 = arith.constant 148 : index
    %c0_102 = arith.constant 0 : index
    %229 = vector.load %arg5[%c0_101, %c148, %c0_102] : memref<2x196x256xf32, #tpu.memory_space<vmem>>, vector<2x4x256xf32>
    tpu.vector_store %arg5[%c0_101, %c148, %c0_102], %228 {strides = array<i32>} : memref<2x196x256xf32, #tpu.memory_space<vmem>>, vector<2x4x256xf32>,
    %230 = vector.extract_strided_slice %4 {offsets = [0, 0, 160], sizes = [2, 4, 256], strides = [1, 1, 1]} : vector<2x4x512xf32> to vector<2x4x256xf32>
    %c0_103 = arith.constant 0 : index
    %c152 = arith.constant 152 : index
    %c0_104 = arith.constant 0 : index
    %231 = vector.load %arg5[%c0_103, %c152, %c0_104] : memref<2x196x256xf32, #tpu.memory_space<vmem>>, vector<2x4x256xf32>
    tpu.vector_store %arg5[%c0_103, %c152, %c0_104], %230 {strides = array<i32>} : memref<2x196x256xf32, #tpu.memory_space<vmem>>, vector<2x4x256xf32>,
    %232 = vector.extract_strided_slice %4 {offsets = [0, 0, 161], sizes = [2, 4, 256], strides = [1, 1, 1]} : vector<2x4x512xf32> to vector<2x4x256xf32>
    %233 = vector.broadcast %65 : vector<1x1x256xf32> to vector<2x4x256xf32>
    %234 = arith.mulf %232, %233 : vector<2x4x256xf32>
    %c0_105 = arith.constant 0 : index
    %c156 = arith.constant 156 : index
    %c0_106 = arith.constant 0 : index
    %235 = vector.load %arg5[%c0_105, %c156, %c0_106] : memref<2x196x256xf32, #tpu.memory_space<vmem>>, vector<2x4x256xf32>
    tpu.vector_store %arg5[%c0_105, %c156, %c0_106], %234 {strides = array<i32>} : memref<2x196x256xf32, #tpu.memory_space<vmem>>, vector<2x4x256xf32>,
    %236 = vector.extract_strided_slice %4 {offsets = [0, 0, 162], sizes = [2, 4, 256], strides = [1, 1, 1]} : vector<2x4x512xf32> to vector<2x4x256xf32>
    %237 = vector.broadcast %76 : vector<1x1x256xf32> to vector<2x4x256xf32>
    %238 = arith.mulf %236, %237 : vector<2x4x256xf32>
    %c0_107 = arith.constant 0 : index
    %c160 = arith.constant 160 : index
    %c0_108 = arith.constant 0 : index
    %239 = vector.load %arg5[%c0_107, %c160, %c0_108] : memref<2x196x256xf32, #tpu.memory_space<vmem>>, vector<2x4x256xf32>
    tpu.vector_store %arg5[%c0_107, %c160, %c0_108], %238 {strides = array<i32>} : memref<2x196x256xf32, #tpu.memory_space<vmem>>, vector<2x4x256xf32>,
    %240 = vector.extract_strided_slice %4 {offsets = [0, 0, 163], sizes = [2, 4, 256], strides = [1, 1, 1]} : vector<2x4x512xf32> to vector<2x4x256xf32>
    %241 = vector.broadcast %87 : vector<1x1x256xf32> to vector<2x4x256xf32>
    %242 = arith.mulf %240, %241 : vector<2x4x256xf32>
    %c0_109 = arith.constant 0 : index
    %c164 = arith.constant 164 : index
    %c0_110 = arith.constant 0 : index
    %243 = vector.load %arg5[%c0_109, %c164, %c0_110] : memref<2x196x256xf32, #tpu.memory_space<vmem>>, vector<2x4x256xf32>
    tpu.vector_store %arg5[%c0_109, %c164, %c0_110], %242 {strides = array<i32>} : memref<2x196x256xf32, #tpu.memory_space<vmem>>, vector<2x4x256xf32>,
    %244 = vector.extract_strided_slice %4 {offsets = [0, 0, 173], sizes = [2, 4, 256], strides = [1, 1, 1]} : vector<2x4x512xf32> to vector<2x4x256xf32>
    %245 = vector.broadcast %32 : vector<1x1x256xf32> to vector<2x4x256xf32>
    %246 = arith.mulf %244, %245 : vector<2x4x256xf32>
    %c0_111 = arith.constant 0 : index
    %c168 = arith.constant 168 : index
    %c0_112 = arith.constant 0 : index
    %247 = vector.load %arg5[%c0_111, %c168, %c0_112] : memref<2x196x256xf32, #tpu.memory_space<vmem>>, vector<2x4x256xf32>
    tpu.vector_store %arg5[%c0_111, %c168, %c0_112], %246 {strides = array<i32>} : memref<2x196x256xf32, #tpu.memory_space<vmem>>, vector<2x4x256xf32>,
    %248 = vector.extract_strided_slice %4 {offsets = [0, 0, 174], sizes = [2, 4, 256], strides = [1, 1, 1]} : vector<2x4x512xf32> to vector<2x4x256xf32>
    %249 = vector.broadcast %43 : vector<1x1x256xf32> to vector<2x4x256xf32>
    %250 = arith.mulf %248, %249 : vector<2x4x256xf32>
    %c0_113 = arith.constant 0 : index
    %c172 = arith.constant 172 : index
    %c0_114 = arith.constant 0 : index
    %251 = vector.load %arg5[%c0_113, %c172, %c0_114] : memref<2x196x256xf32, #tpu.memory_space<vmem>>, vector<2x4x256xf32>
    tpu.vector_store %arg5[%c0_113, %c172, %c0_114], %250 {strides = array<i32>} : memref<2x196x256xf32, #tpu.memory_space<vmem>>, vector<2x4x256xf32>,
    %252 = vector.extract_strided_slice %4 {offsets = [0, 0, 175], sizes = [2, 4, 256], strides = [1, 1, 1]} : vector<2x4x512xf32> to vector<2x4x256xf32>
    %253 = vector.broadcast %54 : vector<1x1x256xf32> to vector<2x4x256xf32>
    %254 = arith.mulf %252, %253 : vector<2x4x256xf32>
    %c0_115 = arith.constant 0 : index
    %c176 = arith.constant 176 : index
    %c0_116 = arith.constant 0 : index
    %255 = vector.load %arg5[%c0_115, %c176, %c0_116] : memref<2x196x256xf32, #tpu.memory_space<vmem>>, vector<2x4x256xf32>
    tpu.vector_store %arg5[%c0_115, %c176, %c0_116], %254 {strides = array<i32>} : memref<2x196x256xf32, #tpu.memory_space<vmem>>, vector<2x4x256xf32>,
    %256 = vector.extract_strided_slice %4 {offsets = [0, 0, 176], sizes = [2, 4, 256], strides = [1, 1, 1]} : vector<2x4x512xf32> to vector<2x4x256xf32>
    %c0_117 = arith.constant 0 : index
    %c180 = arith.constant 180 : index
    %c0_118 = arith.constant 0 : index
    %257 = vector.load %arg5[%c0_117, %c180, %c0_118] : memref<2x196x256xf32, #tpu.memory_space<vmem>>, vector<2x4x256xf32>
    tpu.vector_store %arg5[%c0_117, %c180, %c0_118], %256 {strides = array<i32>} : memref<2x196x256xf32, #tpu.memory_space<vmem>>, vector<2x4x256xf32>,
    %258 = vector.extract_strided_slice %4 {offsets = [0, 0, 177], sizes = [2, 4, 256], strides = [1, 1, 1]} : vector<2x4x512xf32> to vector<2x4x256xf32>
    %259 = vector.broadcast %65 : vector<1x1x256xf32> to vector<2x4x256xf32>
    %260 = arith.mulf %258, %259 : vector<2x4x256xf32>
    %c0_119 = arith.constant 0 : index
    %c184 = arith.constant 184 : index
    %c0_120 = arith.constant 0 : index
    %261 = vector.load %arg5[%c0_119, %c184, %c0_120] : memref<2x196x256xf32, #tpu.memory_space<vmem>>, vector<2x4x256xf32>
    tpu.vector_store %arg5[%c0_119, %c184, %c0_120], %260 {strides = array<i32>} : memref<2x196x256xf32, #tpu.memory_space<vmem>>, vector<2x4x256xf32>,
    %262 = vector.extract_strided_slice %4 {offsets = [0, 0, 178], sizes = [2, 4, 256], strides = [1, 1, 1]} : vector<2x4x512xf32> to vector<2x4x256xf32>
    %263 = vector.broadcast %76 : vector<1x1x256xf32> to vector<2x4x256xf32>
    %264 = arith.mulf %262, %263 : vector<2x4x256xf32>
    %c0_121 = arith.constant 0 : index
    %c188 = arith.constant 188 : index
    %c0_122 = arith.constant 0 : index
    %265 = vector.load %arg5[%c0_121, %c188, %c0_122] : memref<2x196x256xf32, #tpu.memory_space<vmem>>, vector<2x4x256xf32>
    tpu.vector_store %arg5[%c0_121, %c188, %c0_122], %264 {strides = array<i32>} : memref<2x196x256xf32, #tpu.memory_space<vmem>>, vector<2x4x256xf32>,
    %266 = vector.extract_strided_slice %4 {offsets = [0, 0, 179], sizes = [2, 4, 256], strides = [1, 1, 1]} : vector<2x4x512xf32> to vector<2x4x256xf32>
    %267 = vector.broadcast %87 : vector<1x1x256xf32> to vector<2x4x256xf32>
    %268 = arith.mulf %266, %267 : vector<2x4x256xf32>
    %c0_123 = arith.constant 0 : index
    %c192 = arith.constant 192 : index
    %c0_124 = arith.constant 0 : index
    %269 = vector.load %arg5[%c0_123, %c192, %c0_124] : memref<2x196x256xf32, #tpu.memory_space<vmem>>, vector<2x4x256xf32>
    tpu.vector_store %arg5[%c0_123, %c192, %c0_124], %268 {strides = array<i32>} : memref<2x196x256xf32, #tpu.memory_space<vmem>>, vector<2x4x256xf32>,
    %c0_125 = arith.constant 0 : index
    %c0_126 = arith.constant 0 : index
    %270 = vector.load %arg2[%c0_125, %c0_126] : memref<8x196xf32, #tpu.memory_space<vmem>>, vector<8x196xf32>
    %c0_127 = arith.constant 0 : index
    %c0_128 = arith.constant 0 : index
    %271 = vector.load %arg3[%c0_127, %c0_128] : memref<8x1xf32, #tpu.memory_space<vmem>>, vector<8x1xf32>
    %c0_129 = arith.constant 0 : index
    %c0_130 = arith.constant 0 : index
    %c0_131 = arith.constant 0 : index
    %272 = vector.load %arg5[%c0_129, %c0_130, %c0_131] : memref<2x196x256xf32, #tpu.memory_space<vmem>>, vector<1x196x256xf32>
    %273 = vector.shape_cast %272 : vector<1x196x256xf32> to vector<196x256xf32>
    %cst_132 = arith.constant dense<0.000000e+00> : vector<8x256xf32>
    %274 = tpu.matmul %270, %273, %cst_132 {dimension_numbers = #tpu.dot_dimension_numbers<[1], [0], [0], [1], [0, 0, 1, 1], [], []>} : vector<8x196xf32>, vector<196x256xf32>, vector<8x256xf32> -> vector<8x256xf32>
    %275 = vector.broadcast %271 : vector<8x1xf32> to vector<8x256xf32>
    %276 = arith.addf %274, %275 : vector<8x256xf32>
    %cst_133 = arith.constant 0.00999999977 : f32
    %277 = vector.broadcast %cst_133 : f32 to vector<8x256xf32>
    %278 = arith.mulf %277, %276 : vector<8x256xf32>
    %279 = arith.maximumf %276, %278 : vector<8x256xf32>
    %c0_134 = arith.constant 0 : index
    %c0_135 = arith.constant 0 : index
    %c0_136 = arith.constant 0 : index
    %c0_137 = arith.constant 0 : index
    %280 = vector.load %arg4[%c0_134, %c0_135, %c0_136, %c0_137] : memref<1x2x8x256xf32, #tpu.memory_space<vmem>>, vector<1x1x8x256xf32>
    %281 = vector.shape_cast %280 : vector<1x1x8x256xf32> to vector<8x256xf32>
    %282 = vector.shape_cast %279 : vector<8x256xf32> to vector<1x1x8x256xf32>
    tpu.vector_store %arg4[%c0_134, %c0_135, %c0_136, %c0_137], %282 {strides = array<i32>} : memref<1x2x8x256xf32, #tpu.memory_space<vmem>>, vector<1x1x8x256xf32>,
    %c1 = arith.constant 1 : index
    %c0_138 = arith.constant 0 : index
    %c0_139 = arith.constant 0 : index
    %283 = vector.load %arg5[%c1, %c0_138, %c0_139] : memref<2x196x256xf32, #tpu.memory_space<vmem>>, vector<1x196x256xf32>
    %284 = vector.shape_cast %283 : vector<1x196x256xf32> to vector<196x256xf32>
    %cst_140 = arith.constant dense<0.000000e+00> : vector<8x256xf32>
    %285 = tpu.matmul %270, %284, %cst_140 {dimension_numbers = #tpu.dot_dimension_numbers<[1], [0], [0], [1], [0, 0, 1, 1], [], []>} : vector<8x196xf32>, vector<196x256xf32>, vector<8x256xf32> -> vector<8x256xf32>
    %286 = vector.broadcast %271 : vector<8x1xf32> to vector<8x256xf32>
    %287 = arith.addf %285, %286 : vector<8x256xf32>
    %cst_141 = arith.constant 0.00999999977 : f32
    %288 = vector.broadcast %cst_141 : f32 to vector<8x256xf32>
    %289 = arith.mulf %288, %287 : vector<8x256xf32>
    %290 = arith.maximumf %287, %289 : vector<8x256xf32>
    %c0_142 = arith.constant 0 : index
    %c1_143 = arith.constant 1 : index
    %c0_144 = arith.constant 0 : index
    %c0_145 = arith.constant 0 : index
    %291 = vector.load %arg4[%c0_142, %c1_143, %c0_144, %c0_145] : memref<1x2x8x256xf32, #tpu.memory_space<vmem>>, vector<1x1x8x256xf32>
    %292 = vector.shape_cast %291 : vector<1x1x8x256xf32> to vector<8x256xf32>
    %293 = vector.shape_cast %290 : vector<8x256xf32> to vector<1x1x8x256xf32>
    tpu.vector_store %arg4[%c0_142, %c1_143, %c0_144, %c0_145], %293 {strides = array<i32>} : memref<1x2x8x256xf32, #tpu.memory_space<vmem>>, vector<1x1x8x256xf32>,
    return
  }
  func.func @transform_0(%arg0: i32) -> (i32, i32, i32, i32) {
    %c0_i32 = arith.constant 0 : i32
    %c0_i32_0 = arith.constant 0 : i32
    %c0_i32_1 = arith.constant 0 : i32
    %c0_i32_2 = arith.constant 0 : i32
    return %arg0, %c0_i32, %c0_i32_0, %c0_i32_1 : i32, i32, i32, i32
  }
  func.func @transform_1(%arg0: i32) -> (i32, i32) {
    %c0_i32 = arith.constant 0 : i32
    %c0_i32_0 = arith.constant 0 : i32
    %c0_i32_1 = arith.constant 0 : i32
    return %c0_i32, %c0_i32_0 : i32, i32
  }
  func.func @transform_2(%arg0: i32) -> (i32, i32) {
    %c0_i32 = arith.constant 0 : i32
    %c0_i32_0 = arith.constant 0 : i32
    %c0_i32_1 = arith.constant 0 : i32
    return %c0_i32, %c0_i32_0 : i32, i32
  }
  func.func @transform_3(%arg0: i32) -> (i32, i32, i32, i32) {
    %c0_i32 = arith.constant 0 : i32
    %c0_i32_0 = arith.constant 0 : i32
    %c0_i32_1 = arith.constant 0 : i32
    %c0_i32_2 = arith.constant 0 : i32
    return %arg0, %c0_i32, %c0_i32_0, %c0_i32_1 : i32, i32, i32, i32
  }
}

</mosaic_0001>

<bundles_post_ra>
// kernel: tpu_custom_call.1
= control target key start
LH: loop header
LB: loop body
LE: loop exit
PB: predicated region body
PF: predicated region fallthrough
CT: control target
= control target key end

     0   :  { %8 = vsyncpa [#allocation4], 0  ;;  %s4460_s0 = inlined_call_operand.hbm [shape: f32[2,2,4,256], index: 0, kind: input, shape index: {}]   ;;  %s4461_s1 = inlined_call_operand.hbm [shape: f32[8,196], index: 1, kind: input, shape index: {}]   ;;  %s4462_s2 = inlined_call_operand.vmem [shape: f32[8,1], index: 2, kind: input, shape index: {}]   ;;  %s4463_s3 = inlined_call_operand.hbm [shape: f32[2,2,8,256], index: 3, kind: output, shape index: {}]  }
   0x1   :  { %10 = vsyncpa [#allocation4 + $0x1], 0 }
   0x2   :  { %11 = vsyncpa [#allocation7], 0 }
   0x3   :  { %12 = vsyncpa [#allocation5], 0 }
   0x4   :  { %14 = vsyncpa [#allocation5 + $0x1], 0  ;;  %s3230_s12 = smov 0   ;;  %s3232_s13 = smov 0  }
   0x5   :  { %s3234_s14 = smov 0   ;;  %s3236_s15 = smov 0  }
   0x6 LB: > { %s3251_s16 = sadd.s32 4294967295, %s3152_s15   ;;  %s2669_s17 = sadd.s32 4294967294, %s3152_s15   ;;  %s3152_s15 = sphi %s3236_s15, %s4654_s15   ;;  %s3148_s14 = sphi %s3234_s14, %s4653_s14   ;;  %s3144_s13 = sphi %s3232_s13, %s4652_s13   ;;  %s3140_s12 = sphi %s3230_s12, %s4651_s12  }
   0x7   : > { %s3255_s18 = sadd.s32 1, %s3152_s15   ;;  %s27_s19 = sadd.s32 1, %s3148_s14 }
   0x8   : > { %s24_s20 = ssub.s32 %s3152_s15, %s3255_s18  ;;  %p34_p0 = scmp.ne.s32.totalorder %s3148_s14, %s3144_s13 }
   0x9   : > { %p25_p1 = scmp.eq.s32.totalorder %s24_s20, 0  ;;  %p35_p2 = scmp.eq.s32.totalorder %s3152_s15, 0 }
   0xa   : > { %p40_p3 = scmp.ne.s32.totalorder %s3144_s13, %s3140_s12  ;;  %p4464_p4 = scmp.eq.s32.totalorder %s3251_s16, 0 }
   0xb   : > { %s3267_s21 = scalar_select %p25_p1, %s3148_s14, %s27_s19  }
   0xc   : > { %p3269_p5 = por %p35_p2, %p34_p0  ;;  %p3275_p6 = por %p4464_p4, %p40_p3 }
   0xd   : > { %p106_p7 = scmp.eq.s32.totalorder %s3251_s16, 1  ;;  %p112_p8 = scmp.eq.s32.totalorder %s2669_s17, 1 }
   0xe   : > { %s4535_s23 = scalar_select %p3275_p6, 1, 0 }
   0xf   : > { %p2670_p9 = scmp.ge.s32.totalorder %s3152_s15, 1  ;;  %p119_p10 = scmp.lt.s32.totalorder %s3152_s15, 3 }
  0x10   : > { %p3282_p11 = por %p106_p7, %p34_p0  ;;  %p3286_p12 = por %p112_p8, %p40_p3 }
  0x11   : > { %p3290_p13 = pnand %p2670_p9, %p119_p10  ;;  %s3154_s27 = smov [#allocation6]  }
  0x12   : > { %s4536_s24 = scalar_select %p3282_p11, 1, 0 }
  0x13   : > { %s4537_s25 = scalar_select %p3286_p12, 1, 0 }
  0x14   : > { %s4538_s26 = scalar_select %p3290_p13, 1, 0 }
  0x15   : > { %p2715_p2 = pneg %p3290_p13  ;;  %s132_s28 = sshll.u32 %s3154_s27, 4  ;;  %s133_s28 = int_to_ptr.vmem [resolvable:$true] %s132_s28 }
  0x16   : > { %p2728_p4 = scmp.lt.s32.totalorder %s3152_s15, 2  ;;  %p4539_p0 = scmp.eq.s32.totalorder %s3251_s16, 0 }
  0x17   : > { %s146_s30 = sand.u32 1, %s3148_s14   ;;  %s3041_s6 = scalar_lea.vmem %s133_s28, 256 }
  0x18   : > { %p3300_p7 = pnand %p2715_p2, %p4539_p0  ;;  %p3307_p3 = pnand %p2728_p4, %p3269_p5 }
  0x19   : > { %s2673_s5 = sshll.u32 %s146_s30, 4  ;;  %p3042_p9 = scmp.ne.s32.totalorder %s133_s28, %s3041_s6 }
  0x1a   : > { %p3032_p8 = pneg %p3300_p7  ;;  %p3049_p12 = scmp.lt.s32.totalorder %s133_s28, %s133_s28 }
  0x1b   : > { %p3050_p11 = scmp.lt.s32.totalorder %s3041_s6, %s3041_s6 }
  0x1c   : > { %p3044_p10 = pnand %p3042_p9, %p3032_p8 }
  0x1d   : > { %p3051_p2 = por %p3050_p11, %p3049_p12 }
  0x1e   : > { %p3045_p1 = pneg %p3044_p10 }
  0x20   : > { %p3052_p0 = pnand %p3051_p2, %p3045_p1 }
  0x22   : > { %3055 = shalt.err (!%p3052_p0)
}
  0x23   : > { %2718 = dma.hbm_to_vmem [thread:$0]  (!%p3300_p7), %s4461_s1, 256, %s133_s28, [#allocation7]  }
  0x24   : > { %s2705_s9 = sshll.u32 %s3152_s15, 8  ;;  %s150_s10 = scalar_lea.vmem [#allocation3], %s2673_s5 }
  0x25   : > { %s157_s11 = sshll.u32 %s150_s10, 4  ;;  %s3322_s20 = scalar_lea.hbm %s4460_s0, %s2705_s9  ;;  %s3324_s11 = int_to_ptr.vmem [resolvable:$true] %s157_s11 }
  0x26   : > { %s3326_s22 = scalar_lea.sflag [#allocation4], %s146_s30  ;;  %s3056_s27 = scalar_lea.hbm %s3322_s20, 256 }
  0x27   : > { %p3057_p4 = scmp.ne.s32.totalorder %s3322_s20, %s3056_s27  ;;  %p3058_p5 = pneg %p3307_p3 }
  0x28   : > { %s3061_s5 = scalar_lea.hbm %s4460_s0, 512  ;;  %p3062_p1 = scmp.lt.s32.totalorder %s3322_s20, %s4460_s0 }
  0x29   : > { %p3059_p11 = pnand %p3058_p5, %p3057_p4  ;;  %p3063_p7 = scmp.lt.s32.totalorder %s3061_s5, %s3056_s27 }
  0x2b   : > { %p3060_p12 = pneg %p3059_p11  ;;  %p3064_p8 = por %p3063_p7, %p3062_p1 }
  0x2d   : > { %p3065_p9 = pnand %p3064_p8, %p3060_p12 }
  0x2f   : > { %3068 = shalt.err (!%p3065_p9)
}
  0x30   : > { %s3069_s30 = scalar_lea.vmem %s3324_s11, 256  ;;  %s3155_s8 = smov [#allocation3]  }
  0x31   : > { %p3070_p10 = scmp.ne.s32.totalorder %s3324_s11, %s3069_s30  ;;  %s3074_s9 = sshll.u32 %s3155_s8, 4  ;;  %s3075_s9 = int_to_ptr.vmem [resolvable:$false] %s3074_s9 }
  0x32   : > { %s3076_s10 = scalar_lea.vmem %s3075_s9, 512  ;;  %p3077_p4 = scmp.lt.s32.totalorder %s3324_s11, %s3075_s9 }
  0x33   : > { %p3072_p2 = pnand %p3070_p10, %p3058_p5  ;;  %p3078_p11 = scmp.lt.s32.totalorder %s3076_s10, %s3069_s30 }
  0x35   : > { %p3073_p0 = pneg %p3072_p2  ;;  %p3079_p6 = por %p3078_p11, %p3077_p4 }
  0x37   : > { %p3080_p13 = pnand %p3079_p6, %p3073_p0 }
  0x39   : > { %3083 = shalt.err (!%p3080_p13)
}
  0x3a   : > { %s3156_s17 = smov 128   ;;  %s3157_s19 = smov 8  }
  0x3b   : > { %2722 = dma.hbm_to_vmem [thread:$0]  (!%p3307_p3), %s3322_s20, 256, %s3324_s11, %s3326_s22, %s3156_s17, %s3156_s17, %s3157_s19  }
  0x3c   : > { %p4542_p5 = scmp.ne.s32.totalorder %s4538_s26, 0 }
  0x3d   : > { %s3350_s27 = sand.u32 (!%p4542_p5), 1, %s3144_s13   ;;  %p4543_p6 = scmp.ne.s32.totalorder (!%p4542_p5), %s4535_s23, 0 }
  0x3e   : > { %169 = sbr.rel (%p4542_p5) target bundleno = 1972 (0x7b4), region = 32  ;;  %s2677_s28 = sshll.u32 (!%p4542_p5), %s3350_s27, 4 }
  0x3f   : > { %s172_s29 = scalar_lea.sflag (!%p4542_p5), [#allocation4], %s3350_s27  ;;  %s175_s5 = scalar_lea.vmem (!%p4542_p5), [#allocation3], %s2677_s28 }
  0x43   : > { %3127 = dma.done.wait (%p4543_p6), %s172_s29, 256  }
  0x44   : > { %3129 = vsyncadd (%p4543_p6), %s172_s29, 4294967040  ;;  %p4544_p13 = scmp.eq.s32.totalorder %s3251_s16, 0 }
  0x46   : > { %3131 = dma.done.wait (%p4544_p13), [#allocation7], 256   ;;  %p4545_p3 = pmov %p4544_p13 }
  0x47   : > { %v210_v0 = vlaneseq  ;;  %v3158_v1 = vmov 0.0   ;;  %s3159_s26 = smov 48   ;;  %v3367_v10 = vld [vmem:[%s175_s5] sm:$0xff]  ;;  %v3369_v11 = vld [vmem:[%s175_s5 + $0x8] sm:$0xff]  ;;  %s4509_s23 = smov 77   ;;  %vm462_vm12 = vcmask 392192  }
  0x48   : > { %3133 = vsyncadd (%p4545_p3), [#allocation7], 4294967040  ;;  %v3363_v2 = vrot.slane %v3158_v1, 4  ;;  %v3372_v15 = vrot.slane %v3367_v10, 4  ;;  %1328 = vst [vmem:[#allocation2 + $0x1c0] sm:$0xf] %v3367_v10  ;;  %v3402_v35 = vcombine.high %v3367_v10, %v3367_v10  ;;  %v3408_v37 = vcombine.high %v3369_v11, %v3369_v11 }
  0x49   : > { %v211_v3 = vand.u32 127, %v210_v0  ;;  %v3376_v17 = vrot.slane %v3369_v11, 4  ;;  %1330 = vst [vmem:[#allocation2 + $0x18] sm:$0xf] %v3369_v11  ;;  %s4501_s4 = smov 78   ;;  %s4495_s11 = smov 81  }
  0x4a   : > { %452 = vrot.lane.b32.xlu0 %v3363_v2, %s3159_s26  ;;  %454 = vrot.lane.b32.xlu1 %v3372_v15, %s3159_s26  ;;  %1329 = vst [vmem:[#allocation2 + $0x30] sm:$0xf] %v3402_v35  ;;  %1331 = vst [vmem:[#allocation2 + $0x58] sm:$0xf] %v3408_v37  ;;  %s4507_s20 = smov 79   ;;  %s4483_s22 = smov 82  }
  0x4b   : > { %v212_v4 = vadd.s32 128, %v211_v3  ;;  %v217_v5 = vand.u32 15, %v211_v3  ;;  %s4489_s6 = smov 83   ;;  %s4472_s7 = smov 93   ;;  %vm758_vm13 = vcmask 261120   ;;  %vm4528_vm14 = vcmask 629760  }
  0x4c   : > { %s4474_s30 = smov 94   ;;  %s3168_s8 = smov 32   ;;  %vm4492_vm15 = vcmask 662528  }
  0x4d   : > { %v224_v6 = vand.u32 15, %v212_v4  ;;  %v237_v7 = vadd.s32 4294967293, %v217_v5  ;;  %v249_v8 = vadd.s32 4294967294, %v217_v5  ;;  %v273_v9 = vadd.s32 1, %v217_v5  ;;  %s4470_s9 = smov 95   ;;  %s4468_s10 = smov 97  }
  0x4e   : > { %v261_v12 = vadd.s32 4294967295, %v217_v5  ;;  %v285_v13 = vadd.s32 2, %v217_v5  ;;  %v297_v14 = vadd.s32 3, %v217_v5  ;;  %458 = vrot.lane.b32.xlu1 %v3376_v17, %s3159_s26  ;;  %s3171_s17 = smov 51   ;;  %s3172_s19 = smov 47  }
  0x4f   : > { %v238_v16 = vadd.s32 4294967293, %v224_v6  ;;  %vm239_vm0 = vcmp.ge.s32.totalorder %v237_v7, 0  ;;  %v250_v19 = vadd.s32 4294967294, %v224_v6  ;;  %vm251_vm1 = vcmp.ge.s32.totalorder %v249_v8, 0  ;;  %s3173_s28 = smov 49   ;;  %s3174_s29 = smov 45  }
  0x50   : > { %v2680_v18 = vsel %vm239_vm0, 1.0, %v3158_v1  ;;  %v274_v20 = vadd.s32 1, %v224_v6  ;;  %v2682_v21 = vsel %vm251_vm1, 1.0, %v3158_v1  ;;  %vm277_vm3 = vcmp.lt.s32.totalorder %v273_v9, 16  ;;  %s3175_s5 = smov 34   ;;  %p4647_p1 = scmp.ne.s32.totalorder %s4536_s24, 0 }
  0x51   : > { %vm240_vm2 = vcmp.ge.s32.totalorder %v238_v16, 0  ;;  %v262_v22 = vadd.s32 4294967295, %v224_v6  ;;  %vm252_vm4 = vcmp.ge.s32.totalorder %v250_v19, 0  ;;  %v2686_v24 = vsel %vm277_vm3, 1.0, %v3158_v1 }
  0x52   : > { %v2681_v23 = vsel %vm240_vm2, 1.0, %v3158_v1  ;;  %vm278_vm5 = vcmp.lt.s32.totalorder %v274_v20, 16  ;;  %v2683_v26 = vsel %vm252_vm4, 1.0, %v3158_v1  ;;  %vm263_vm6 = vcmp.ge.s32.totalorder %v261_v12, 0 }
  0x53   : > { %v3385_v25 = vpack.i.bf16 %v2681_v23, %v2680_v18  ;;  %v2687_v27 = vsel %vm278_vm5, 1.0, %v3158_v1  ;;  %v3389_v28 = vpack.i.bf16 %v2683_v26, %v2682_v21  ;;  %vm264_vm7 = vcmp.ge.s32.totalorder %v262_v22, 0 }
  0x54   : > { %v3395_v29 = vpack.i.bf16 %v2687_v27, %v2686_v24  ;;  %v286_v30 = vadd.s32 2, %v224_v6  ;;  %vm289_vm8 = vcmp.lt.s32.totalorder %v285_v13, 16  ;;  %v298_v31 = vadd.s32 3, %v224_v6 }
  0x55   : > { %2818 = vrot.lane.b32.xlu0 %v3385_v25, %s4509_s23  ;;  %v2684_v32 = vsel %vm263_vm6, 1.0, %v3158_v1  ;;  %v2685_v33 = vsel %vm264_vm7, 1.0, %v3158_v1  ;;  %v2688_v34 = vsel %vm289_vm8, 1.0, %v3158_v1  ;;  %vm301_vm10 = vcmp.lt.s32.totalorder %v297_v14, 16  ;;  %s4515_s23 = smov 113  }
  0x56   : > { %vm290_vm9 = vcmp.lt.s32.totalorder %v286_v30, 16  ;;  %vm302_vm11 = vcmp.lt.s32.totalorder %v298_v31, 16  ;;  %2833 = vrot.lane.b32.xlu1 %v3395_v29, %s4495_s11  ;;  %v3414_v38 = vpack.i.bf16 %v2685_v33, %v2684_v32  ;;  %v2690_v40 = vsel %vm301_vm10, 1.0, %v3158_v1  ;;  %s4499_s11 = smov 110  }
  0x57   : > { %v2689_v36 = vsel %vm290_vm9, 1.0, %v3158_v1  ;;  %v2691_v41 = vsel %vm302_vm11, 1.0, %v3158_v1  ;;  %vm4486_vm0 = vcmask 678912   ;;  %vm4479_vm1 = vcmask 769024  }
  0x58   : > { %v3416_v39 = vpack.i.bf16 %v2689_v36, %v2688_v34  ;;  %v3425_v42 = vpack.i.bf16 %v2691_v41, %v2690_v40  ;;  %vm4527_vm2 = vcmask 646144   ;;  %vm4480_vm3 = vcmask 670720  }
  0x59   : > { %2823 = vrot.lane.b32.xlu0 %v3389_v28, %s4501_s4  ;;  %vm4478_vm4 = vcmask 760832   ;;  %vm4477_vm5 = vcmask 777216   ;;  %vm4498_vm6 = vcmask 637952   ;;  %vm4476_vm7 = vcmask 793600   ;;  %s4505_s4 = smov 111  }
  0x5a   : > { %2838 = vrot.lane.b32.xlu1 %v3416_v39, %s4483_s22  ;;  %vm340_vm8 = vcmask 416768   ;;  %vm506_vm9 = vcmask 384000   ;;  %vm599_vm10 = vcmask 367616   ;;  %vm688_vm11 = vcmask 277504   ;;  %s4487_s22 = smov 99  }
  0x5d   : > { %2828 = vrot.lane.b32.xlu0 %v3414_v38, %s4507_s20  ;;  %s4514_s20 = smov 16  }
  0x5e   : > { %2843 = vrot.lane.b32.xlu1 %v3425_v42, %s4489_s6  ;;  %s4493_s6 = smov 109  }
  0x61   : > { %456 = vrot.lane.b32.xlu0 %v3402_v35, %s3159_s26 }
  0x62   : > { %2848 = vrot.lane.b32.xlu1 %v3385_v25, %s4472_s7  ;;  %s3180_s7 = smov 33  }
  0x65   : > { %460 = vrot.lane.b32.xlu0 %v3408_v37, %s3159_s26  ;;  %s3176_s26 = smov 50  }
  0x66   : > { %2853 = vrot.lane.b32.xlu1 %v3389_v28, %s4474_s30  ;;  %s4481_s30 = smov 98  }
  0x69   : > { %750 = vrot.lane.b32.xlu0 %v3367_v10, %s3168_s8 }
  0x6a   : > { %2858 = vrot.lane.b32.xlu1 %v3414_v38, %s4470_s9  ;;  %s3179_s9 = smov 35  }
  0x6d   : > { %754 = vrot.lane.b32.xlu0 %v3369_v11, %s3168_s8 }
  0x6e   : > { %748 = vrot.lane.b32.xlu1 %v3158_v1, %s3168_s8 }
  0x71   : > { %2863 = vrot.lane.b32.xlu0 %v3395_v29, %s4468_s10  ;;  %s3178_s10 = smov 31  }
  0x72   : > { %752 = vrot.lane.b32.xlu1 %v3402_v35, %s3168_s8 }
  0x76   : > { %756 = vrot.lane.b32.xlu1 %v3408_v37, %s3168_s8  ;;  %s3177_s8 = smov 46  }
  0xbc   : > { %v453_v43 = vpop.permute.xlu0 %452  ;;  %v455_v44 = vpop.permute.xlu1 %454 }
  0xbd   : > { %v463_v45 = vsel %vm462_vm12, %v453_v43, %v455_v44 }
  0xbe   : > { %471 = vst [vmem:[#allocation2 + $0x1a0] sm:$0xf0] %v463_v45 }
  0xc0   : > { %v459_v47 = vpop.permute.xlu1 %458 }
  0xc1   : > { %v465_v49 = vsel %vm462_vm12, %v453_v43, %v459_v47 }
  0xc2   : > { %473 = vst [vmem:[#allocation2 + $0x208] sm:$0xf0] %v465_v49 }
  0xc7   : > { %v3447_v46 = vpop.permute.xlu0 %2818 }
  0xc8   : > { %v2820_v48 = vunpack.i.l.bf16 %v3447_v46  ;;  %v3455_v52 = vpop.permute.xlu1 %2833  ;;  %v2821_v58 = vunpack.i.h.bf16 %v3447_v46 }
  0xc9   : > { %v2835_v53 = vunpack.i.l.bf16 %v3455_v52  ;;  %v2836_v19 = vunpack.i.h.bf16 %v3455_v52 }
  0xca   : > { %v320_v50 = vmul.f32 0.0, %v2820_v48  ;;  %v322_v4 = vmul.f32 %v2821_v58, %v3402_v35  ;;  %v324_v9 = vmul.f32 %v2821_v58, %v3408_v37 }
  0xcb   : > { %v3453_v51 = vpop.permute.xlu0 %2823  ;;  %v486_v54 = vmul.f32 0.0, %v2835_v53  ;;  %v488_v26 = vmul.f32 %v2836_v19, %v3402_v35  ;;  %v490_v36 = vmul.f32 %v2836_v19, %v3408_v37  ;;  %v482_v46 = vsel %vm4492_vm15, %v2835_v53, %v2836_v19 }
  0xcc   : > { %330 = vrot.lane.b32.xlu0 %v320_v50, %s3171_s17  ;;  %v3463_v56 = vpop.permute.xlu1 %2838  ;;  %v2825_v62 = vunpack.i.l.bf16 %v3453_v51  ;;  %v316_v50 = vsel %vm4528_vm14, %v2820_v48, %v2821_v58  ;;  %v487_v58 = vmul.f32 %v482_v46, %v3367_v10  ;;  %v489_v53 = vmul.f32 %v482_v46, %v3369_v11 }
  0xcd   : > { %v2840_v24 = vunpack.i.l.bf16 %v3463_v56  ;;  %vm4497_vm15 = vcmask 891904   ;;  %vm1268_vm14 = vcmask 15360  }
  0xce   : > { %v364_v8 = vmul.f32 0.0, %v2825_v62 }
  0xcf   : > { %v3461_v55 = vpop.permute.xlu0 %2828  ;;  %v530_v40 = vmul.f32 0.0, %v2840_v24 }
  0xd0   : > { %v2830_v57 = vunpack.i.l.bf16 %v3461_v55  ;;  %496 = vrot.lane.b32.xlu0 %v486_v54, %s3172_s19  ;;  %v3470_v60 = vpop.permute.xlu1 %2843  ;;  %v3490_v14 = vunpack.i.h.bf16 %v3461_v55  ;;  %v374_v18 = vrot.slane %v364_v8, 4  ;;  %v2841_v55 = vunpack.i.h.bf16 %v3463_v56 }
  0xd1   : > { %v2845_v63 = vunpack.i.l.bf16 %v3470_v60  ;;  %v540_v49 = vrot.slane %v530_v40, 4 }
  0xd2   : > { %v413_v59 = vmul.f32 0.0, %v2830_v57  ;;  %v415_v23 = vmul.f32 %v3490_v14, %v3402_v35  ;;  %v417_v32 = vmul.f32 %v3490_v14, %v3408_v37 }
  0xd3   : > { %v457_v61 = vpop.permute.xlu0 %456  ;;  %v579_v3 = vmul.f32 0.0, %v2845_v63 }
  0xd4   : > { %v464_v0 = vsel %vm462_vm12, %v455_v44, %v457_v61  ;;  %423 = vrot.lane.b32.xlu1 %v413_v59, %s3173_s28  ;;  %v3479_v5 = vpop.permute.xlu1 %2848 }
  0xd5   : > { %472 = vst [vmem:[#allocation2 + $0x200] sm:$0xf0] %v464_v0  ;;  %589 = vrot.lane.b32.xlu0 %v579_v3, %s3174_s29  ;;  %v2850_v61 = vunpack.i.l.bf16 %v3479_v5  ;;  %v321_v3 = vmul.f32 %v316_v50, %v3367_v10 }
  0xd7   : > { %v461_v6 = vpop.permute.xlu0 %460 }
  0xd8   : > { %v466_v7 = vsel %vm462_vm12, %v459_v47, %v461_v6  ;;  %334 = vrot.lane.b32.xlu1 %v322_v4, %s3171_s17  ;;  %v3487_v12 = vpop.permute.xlu1 %2853  ;;  %v2846_v47 = vunpack.i.h.bf16 %v3470_v60  ;;  %v621_v4 = vmul.f32 0.0, %v2850_v61  ;;  %vm433_vm12 = vcmask 400384  }
  0xd9   : > { %474 = vst [vmem:[#allocation2 + $0x1c8] sm:$0xf0] %v466_v7  ;;  %v2855_v16 = vunpack.i.l.bf16 %v3487_v12  ;;  %v2856_v52 = vunpack.i.h.bf16 %v3487_v12  ;;  %v409_v12 = vsel %vm4527_vm2, %v2830_v57, %v3490_v14  ;;  %vm1137_vm2 = vcmask 113664  }
  0xda   : > { %v581_v0 = vmul.f32 %v2846_v47, %v3402_v35  ;;  %v583_v48 = vmul.f32 %v2846_v47, %v3408_v37  ;;  %v631_v6 = vrot.slane %v621_v4, 4  ;;  %v575_v7 = vsel %vm4486_vm0, %v2845_v63, %v2846_v47 }
  0xdb   : > { %v751_v13 = vpop.permute.xlu0 %750  ;;  %v668_v20 = vmul.f32 0.0, %v2855_v16  ;;  %v672_v63 = vmul.f32 %v2856_v52, %v3408_v37  ;;  %v664_v19 = vsel %vm4479_vm1, %v2855_v16, %v2856_v52  ;;  %v323_v16 = vmul.f32 %v316_v50, %v3369_v11 }
  0xdc   : > { %338 = vrot.lane.b32.xlu1 %v324_v9, %s3171_s17  ;;  %v3497_v22 = vpop.permute.xlu1 %2858  ;;  %v670_v9 = vmul.f32 %v2856_v52, %v3402_v35  ;;  %vm4531_vm1 = vcmask 252928   ;;  %vm4491_vm0 = vcmask 809984  }
  0xdd   : > { %678 = vrot.lane.b32.xlu0 %v668_v20, %s3175_s5  ;;  %v2860_v8 = vunpack.i.l.bf16 %v3497_v22  ;;  %v2861_v46 = vunpack.i.h.bf16 %v3497_v22 }
  0xdf   : > { %v755_v21 = vpop.permute.xlu0 %754  ;;  %v710_v60 = vmul.f32 0.0, %v2860_v8 }
  0xe0   : > { %379 = vrot.lane.b32.xlu1 %v374_v18, %s3176_s26  ;;  %v749_v30 = vpop.permute.xlu1 %748  ;;  %v582_v18 = vmul.f32 %v575_v7, %v3369_v11 }
  0xe1   : > { %500 = vrot.lane.b32.xlu0 %v488_v26, %s3172_s19  ;;  %v759_v33 = vsel %vm758_vm13, %v749_v30, %v751_v13  ;;  %v761_v34 = vsel %vm758_vm13, %v749_v30, %v755_v21  ;;  %v720_v20 = vrot.slane %v710_v60, 4  ;;  %v671_v26 = vmul.f32 %v664_v19, %v3369_v11 }
  0xe2   : > { %767 = vst [vmem:[#allocation2 + $0x130] sm:$0xf] %v759_v33  ;;  %769 = vst [vmem:[#allocation2 + $0x40] sm:$0xf] %v761_v34  ;;  %v414_v33 = vmul.f32 %v409_v12, %v3367_v10 }
  0xe3   : > { %v3505_v27 = vpop.permute.xlu0 %2863 }
  0xe4   : > { %427 = vrot.lane.b32.xlu1 %v415_v23, %s3173_s28  ;;  %v2865_v31 = vunpack.i.l.bf16 %v3505_v27  ;;  %v753_v43 = vpop.permute.xlu1 %752  ;;  %v669_v23 = vmul.f32 %v664_v19, %v3367_v10 }
  0xe5   : > { %504 = vrot.lane.b32.xlu0 %v490_v36, %s3172_s19  ;;  %v760_v45 = vsel %vm758_vm13, %v751_v13, %v753_v43  ;;  %v580_v13 = vmul.f32 %v575_v7, %v3367_v10  ;;  %v416_v36 = vmul.f32 %v409_v12, %v3369_v11  ;;  %v526_v43 = vsel %vm4480_vm3, %v2840_v24, %v2841_v55 }
  0xe6   : > { %v780_v41 = vmul.f32 0.0, %v2865_v31  ;;  %768 = vst [vmem:[#allocation2 + $0x80] sm:$0xf] %v760_v45  ;;  %v2851_v45 = vunpack.i.h.bf16 %v3479_v5  ;;  %v531_v50 = vmul.f32 %v526_v43, %v3367_v10  ;;  %vm4485_vm3 = vcmask 801792  }
  0xe8   : > { %431 = vrot.lane.b32.xlu1 %v417_v32, %s3173_s28  ;;  %v790_v44 = vrot.slane %v780_v41, 4  ;;  %v757_v54 = vpop.permute.xlu1 %756  ;;  %v3579_v32 = vunpack.i.h.bf16 %v3505_v27  ;;  %v532_v41 = vmul.f32 %v2841_v55, %v3402_v35  ;;  %v623_v24 = vmul.f32 %v2851_v45, %v3402_v35 }
  0xe9   : > { %545 = vrot.lane.b32.xlu0 %v540_v49, %s3177_s8  ;;  %v762_v59 = vsel %vm758_vm13, %v755_v21, %v757_v54  ;;  %v3565_v21 = vunpack.i.h.bf16 %v3453_v51  ;;  %v534_v49 = vmul.f32 %v2841_v55, %v3408_v37  ;;  %v541_v54 = vrot.slane %v531_v50, 4 }
  0xea   : > { %770 = vst [vmem:[#allocation2 + $0x120] sm:$0xf] %v762_v59  ;;  %v782_v14 = vmul.f32 %v3579_v32, %v3402_v35  ;;  %v542_v47 = vrot.slane %v532_v41, 4  ;;  %v533_v59 = vmul.f32 %v526_v43, %v3369_v11  ;;  %v784_v51 = vmul.f32 %v3579_v32, %v3408_v37 }
  0xeb   : > { %v366_v30 = vmul.f32 %v3565_v21, %v3402_v35  ;;  %v368_v57 = vmul.f32 %v3565_v21, %v3408_v37  ;;  %v544_v56 = vrot.slane %v534_v49, 4  ;;  %vm555_vm13 = vcmask 375808  }
  0xec   : > { %795 = vrot.lane.b32.xlu1 %v790_v44, %s3178_s10  ;;  %v792_v44 = vrot.slane %v782_v14, 4  ;;  %v794_v12 = vrot.slane %v784_v51, 4 }
  0xed   : > { %593 = vrot.lane.b32.xlu0 %v581_v0, %s3174_s29  ;;  %v376_v34 = vrot.slane %v366_v30, 4  ;;  %v378_v40 = vrot.slane %v368_v57, 4  ;;  %v617_v0 = vsel %vm4478_vm4, %v2850_v61, %v2851_v45  ;;  %v712_v61 = vmul.f32 %v2861_v46, %v3402_v35 }
  0xee   : > { %v622_v4 = vmul.f32 %v617_v0, %v3367_v10  ;;  %vm389_vm4 = vcmask 408576  }
  0xef   : > { %v722_v7 = vrot.slane %v712_v61, 4 }
  0xf0   : > { %332 = vrot.lane.b32.xlu1 %v321_v3, %s3171_s17  ;;  %v625_v3 = vmul.f32 %v2851_v45, %v3408_v37  ;;  %v632_v52 = vrot.slane %v622_v4, 4 }
  0xf1   : > { %597 = vrot.lane.b32.xlu0 %v583_v48, %s3174_s29  ;;  %v633_v48 = vrot.slane %v623_v24, 4 }
  0xf2   : > { %v635_v5 = vrot.slane %v625_v3, 4 }
  0xf4   : > { %498 = vrot.lane.b32.xlu1 %v487_v58, %s3172_s19  ;;  %v543_v58 = vrot.slane %v533_v59, 4 }
  0xf5   : > { %636 = vrot.lane.b32.xlu0 %v631_v6, %s3179_s9  ;;  %v624_v6 = vmul.f32 %v617_v0, %v3369_v11 }
  0xf8   : > { %502 = vrot.lane.b32.xlu1 %v489_v53, %s3172_s19  ;;  %v706_v53 = vsel %vm4477_vm5, %v2860_v8, %v2861_v46  ;;  %vm735_vm5 = vcmask 269312  }
  0xf9   : > { %682 = vrot.lane.b32.xlu0 %v670_v9, %s3175_s5  ;;  %v634_v9 = vrot.slane %v624_v6, 4  ;;  %v711_v60 = vmul.f32 %v706_v53, %v3367_v10  ;;  %v713_v19 = vmul.f32 %v706_v53, %v3369_v11 }
  0xfb   : > { %v721_v8 = vrot.slane %v711_v60, 4 }
  0xfc   : > { %591 = vrot.lane.b32.xlu1 %v580_v13, %s3174_s29  ;;  %v714_v13 = vmul.f32 %v2861_v46, %v3408_v37 }
  0xfd   : > { %686 = vrot.lane.b32.xlu0 %v672_v63, %s3175_s5  ;;  %v360_v63 = vsel %vm4498_vm6, %v2825_v62, %v3565_v21  ;;  %v776_v62 = vsel %vm4476_vm7, %v2865_v31, %v3579_v32  ;;  %v723_v21 = vrot.slane %v713_v19, 4  ;;  %vm646_vm7 = vcmask 285696  }
  0xfe   : > { %v724_v22 = vrot.slane %v714_v13, 4  ;;  %v783_v27 = vmul.f32 %v776_v62, %v3369_v11  ;;  %vm4503_vm6 = vcmask 900096  }
 0x100   : > { %595 = vrot.lane.b32.xlu1 %v582_v18, %s3174_s29  ;;  %v365_v18 = vmul.f32 %v360_v63, %v3367_v10  ;;  %v793_v31 = vrot.slane %v783_v27, 4 }
 0x101   : > { %725 = vrot.lane.b32.xlu0 %v720_v20, %s3180_s7 }
 0x102   : > { %v375_v20 = vrot.slane %v365_v18, 4 }
 0x104   : > { %680 = vrot.lane.b32.xlu1 %v669_v23, %s3175_s5  ;;  %v367_v23 = vmul.f32 %v360_v63, %v3369_v11 }
 0x105   : > { %336 = vrot.lane.b32.xlu0 %v323_v16, %s3171_s17  ;;  %v781_v16 = vmul.f32 %v776_v62, %v3367_v10 }
 0x107   : > { %v791_v30 = vrot.slane %v781_v16, 4 }
 0x108   : > { %684 = vrot.lane.b32.xlu1 %v671_v26, %s3175_s5  ;;  %v377_v26 = vrot.slane %v367_v23, 4 }
 0x109   : > { %425 = vrot.lane.b32.xlu0 %v414_v33, %s3173_s28 }
 0x10c   : > { %383 = vrot.lane.b32.xlu1 %v376_v34, %s3176_s26 }
 0x10d   : > { %429 = vrot.lane.b32.xlu0 %v416_v36, %s3173_s28 }
 0x110   : > { %387 = vrot.lane.b32.xlu1 %v378_v40, %s3176_s26 }
 0x111   : > { %549 = vrot.lane.b32.xlu0 %v542_v47, %s3177_s8 }
 0x114   : > { %799 = vrot.lane.b32.xlu1 %v792_v44, %s3178_s10 }
 0x115   : > { %553 = vrot.lane.b32.xlu0 %v544_v56, %s3177_s8 }
 0x118   : > { %547 = vrot.lane.b32.xlu1 %v541_v54, %s3177_s8 }
 0x119   : > { %640 = vrot.lane.b32.xlu0 %v633_v48, %s3179_s9 }
 0x11c   : > { %551 = vrot.lane.b32.xlu1 %v543_v58, %s3177_s8 }
 0x11d   : > { %644 = vrot.lane.b32.xlu0 %v635_v5, %s3179_s9 }
 0x120   : > { %638 = vrot.lane.b32.xlu1 %v632_v52, %s3179_s9 }
 0x121   : > { %729 = vrot.lane.b32.xlu0 %v722_v7, %s3180_s7 }
 0x124   : > { %642 = vrot.lane.b32.xlu1 %v634_v9, %s3179_s9 }
 0x125   : > { %733 = vrot.lane.b32.xlu0 %v724_v22, %s3180_s7 }
 0x128   : > { %727 = vrot.lane.b32.xlu1 %v721_v8, %s3180_s7 }
 0x129   : > { %381 = vrot.lane.b32.xlu0 %v375_v20, %s3176_s26 }
 0x12c   : > { %731 = vrot.lane.b32.xlu1 %v723_v21, %s3180_s7 }
 0x12d   : > { %385 = vrot.lane.b32.xlu0 %v377_v26, %s3176_s26 }
 0x130   : > { %803 = vrot.lane.b32.xlu1 %v794_v12, %s3178_s10 }
 0x131   : > { %797 = vrot.lane.b32.xlu0 %v791_v30, %s3178_s10 }
 0x135   : > { %801 = vrot.lane.b32.xlu0 %v793_v31, %s3178_s10 }
 0x139   : > { %2868 = vrot.lane.b32.xlu0 %v3416_v39, %s4481_s30  ;;  %s4523_s30 = smov 30  }
 0x13e   : > { %v331_v32 = vpop.permute.xlu0 %330 }
 0x142   : > { %v497_v55 = vpop.permute.xlu0 %496 }
 0x146   : > { %v3651_v33 = vpop.permute.xlu1 %423 }
 0x147   : > { %v590_v57 = vpop.permute.xlu0 %589 }
 0x14a   : > { %v335_v34 = vpop.permute.xlu1 %334 }
 0x14e   : > { %v339_v14 = vpop.permute.xlu1 %338 }
 0x14f   : > { %v679_v36 = vpop.permute.xlu0 %678 }
 0x152   : > { %v3653_v40 = vpop.permute.xlu1 %379 }
 0x153   : > { %v501_v41 = vpop.permute.xlu0 %500 }
 0x156   : > { %v428_v43 = vpop.permute.xlu1 %427 }
 0x157   : > { %v505_v44 = vpop.permute.xlu0 %504 }
 0x15a   : > { %v3655_v45 = vpop.permute.xlu1 %431 }
 0x15b   : > { %v3657_v47 = vpop.permute.xlu0 %545 }
 0x15e   : > { %v3659_v49 = vpop.permute.xlu1 %795 }
 0x15f   : > { %v594_v50 = vpop.permute.xlu0 %593 }
 0x162   : > { %v333_v56 = vpop.permute.xlu1 %332 }
 0x163   : > { %v341_v54 = vsel %vm340_vm8, %v331_v32, %v333_v56  ;;  %v342_v24 = vsel %vm340_vm8, %v333_v56, %v335_v34  ;;  %v598_v59 = vpop.permute.xlu0 %597 }
 0x164   : > { %349 = vst [vmem:[#allocation2 + $0x2e0] sm:$0xf] %v341_v54  ;;  %350 = vst [vmem:[#allocation2 + $0x1f0] sm:$0xf] %v342_v24 }
 0x166   : > { %v499_v0 = vpop.permute.xlu1 %498 }
 0x167   : > { %v507_v3 = vsel %vm506_vm9, %v497_v55, %v499_v0  ;;  %v508_v46 = vsel %vm506_vm9, %v499_v0, %v501_v41  ;;  %v3665_v48 = vpop.permute.xlu0 %636 }
 0x168   : > { %515 = vst [vmem:[#allocation2 + $0x180] sm:$0xf] %v507_v3  ;;  %516 = vst [vmem:[#allocation2 + $0x220] sm:$0xf] %v508_v46 }
 0x16a   : > { %v503_v58 = vpop.permute.xlu1 %502 }
 0x16b   : > { %v509_v4 = vsel %vm506_vm9, %v497_v55, %v503_v58  ;;  %v510_v5 = vsel %vm506_vm9, %v503_v58, %v505_v44  ;;  %v683_v52 = vpop.permute.xlu0 %682 }
 0x16c   : > { %517 = vst [vmem:[#allocation2 + $0x78] sm:$0xf] %v509_v4  ;;  %518 = vst [vmem:[#allocation2 + $0x20] sm:$0xf] %v510_v5 }
 0x16e   : > { %v592_v61 = vpop.permute.xlu1 %591 }
 0x16f   : > { %v600_v6 = vsel %vm599_vm10, %v590_v57, %v592_v61  ;;  %v601_v53 = vsel %vm599_vm10, %v592_v61, %v594_v50  ;;  %v687_v7 = vpop.permute.xlu0 %686 }
 0x170   : > { %608 = vst [vmem:[#allocation2 + $0x160] sm:$0xf] %v600_v6  ;;  %609 = vst [vmem:[#allocation2 + $0x310] sm:$0xf] %v601_v53 }
 0x172   : > { %v596_v9 = vpop.permute.xlu1 %595 }
 0x173   : > { %v602_v13 = vsel %vm599_vm10, %v590_v57, %v596_v9  ;;  %v603_v60 = vsel %vm599_vm10, %v596_v9, %v598_v59  ;;  %v3673_v63 = vpop.permute.xlu0 %725 }
 0x174   : > { %610 = vst [vmem:[#allocation2 + $0x318] sm:$0xf] %v602_v13  ;;  %611 = vst [vmem:[#allocation2 + $0x2e8] sm:$0xf] %v603_v60 }
 0x176   : > { %v681_v22 = vpop.permute.xlu1 %680 }
 0x177   : > { %v689_v8 = vsel %vm688_vm11, %v679_v36, %v681_v22  ;;  %v690_v18 = vsel %vm688_vm11, %v681_v22, %v683_v52  ;;  %v337_v19 = vpop.permute.xlu0 %336 }
 0x178   : > { %697 = vst [vmem:[#allocation2 + $0xc0] sm:$0xf] %v689_v8  ;;  %698 = vst [vmem:[#allocation2 + $0x250] sm:$0xf] %v690_v18  ;;  %v343_v62 = vsel %vm340_vm8, %v331_v32, %v337_v19  ;;  %v344_v20 = vsel %vm340_vm8, %v337_v19, %v339_v14 }
 0x179   : > { %351 = vst [vmem:[#allocation2 + $0x190] sm:$0xf] %v343_v62  ;;  %352 = vst [vmem:[#allocation2 + $0x28] sm:$0xf] %v344_v20 }
 0x17a   : > { %v685_v51 = vpop.permute.xlu1 %684 }
 0x17b   : > { %v691_v21 = vsel %vm688_vm11, %v679_v36, %v685_v51  ;;  %v692_v23 = vsel %vm688_vm11, %v685_v51, %v687_v7  ;;  %v426_v12 = vpop.permute.xlu0 %425 }
 0x17c   : > { %699 = vst [vmem:[#allocation2 + $0xa0] sm:$0xf] %v691_v21  ;;  %700 = vst [vmem:[#allocation2 + $0x168] sm:$0xf] %v692_v23  ;;  %v434_v26 = vsel %vm433_vm12, %v3651_v33, %v426_v12  ;;  %v435_v30 = vsel %vm433_vm12, %v426_v12, %v428_v43 }
 0x17d   : > { %442 = vst [vmem:[#allocation2 + $0x1a0] sm:$0xf] %v434_v26  ;;  %443 = vst [vmem:[#allocation2 + $0x200] sm:$0xf] %v435_v30 }
 0x17e   : > { %v384_v16 = vpop.permute.xlu1 %383 }
 0x17f   : > { %v430_v27 = vpop.permute.xlu0 %429 }
 0x180   : > { %v436_v32 = vsel %vm433_vm12, %v3651_v33, %v430_v27  ;;  %v437_v55 = vsel %vm433_vm12, %v430_v27, %v3655_v45 }
 0x181   : > { %444 = vst [vmem:[#allocation2 + $0x208] sm:$0xf] %v436_v32  ;;  %445 = vst [vmem:[#allocation2 + $0x1c8] sm:$0xf] %v437_v55 }
 0x182   : > { %v388_v31 = vpop.permute.xlu1 %387 }
 0x183   : > { %v550_v34 = vpop.permute.xlu0 %549 }
 0x186   : > { %v800_v57 = vpop.permute.xlu1 %799 }
 0x187   : > { %v554_v14 = vpop.permute.xlu0 %553 }
 0x18a   : > { %v548_v36 = vpop.permute.xlu1 %547 }
 0x18b   : > { %v556_v41 = vsel %vm555_vm13, %v3657_v47, %v548_v36  ;;  %v557_v43 = vsel %vm555_vm13, %v548_v36, %v550_v34  ;;  %v641_v44 = vpop.permute.xlu0 %640 }
 0x18c   : > { %564 = vst [vmem:[#allocation2 + $0x180] sm:$0xf0] %v556_v41  ;;  %565 = vst [vmem:[#allocation2 + $0x220] sm:$0xf0] %v557_v43 }
 0x18e   : > { %v552_v50 = vpop.permute.xlu1 %551 }
 0x18f   : > { %v558_v33 = vsel %vm555_vm13, %v3657_v47, %v552_v50  ;;  %v559_v45 = vsel %vm555_vm13, %v552_v50, %v554_v14  ;;  %v645_v56 = vpop.permute.xlu0 %644 }
 0x190   : > { %566 = vst [vmem:[#allocation2 + $0x78] sm:$0xf0] %v558_v33  ;;  %567 = vst [vmem:[#allocation2 + $0x20] sm:$0xf0] %v559_v45 }
 0x192   : > { %v639_v54 = vpop.permute.xlu1 %638 }
 0x193   : > { %v647_v24 = vsel %vm646_vm7, %v3665_v48, %v639_v54  ;;  %v648_v59 = vsel %vm646_vm7, %v639_v54, %v641_v44  ;;  %v730_v0 = vpop.permute.xlu0 %729 }
 0x194   : > { %655 = vst [vmem:[#allocation2 + $0x160] sm:$0xf0] %v647_v24  ;;  %656 = vst [vmem:[#allocation2 + $0x310] sm:$0xf0] %v648_v59 }
 0x196   : > { %v643_v3 = vpop.permute.xlu1 %642 }
 0x197   : > { %v649_v46 = vsel %vm646_vm7, %v3665_v48, %v643_v3  ;;  %v650_v47 = vsel %vm646_vm7, %v643_v3, %v645_v56  ;;  %v734_v58 = vpop.permute.xlu0 %733 }
 0x198   : > { %657 = vst [vmem:[#allocation2 + $0x318] sm:$0xf0] %v649_v46  ;;  %658 = vst [vmem:[#allocation2 + $0x2e8] sm:$0xf0] %v650_v47 }
 0x19a   : > { %v728_v4 = vpop.permute.xlu1 %727 }
 0x19b   : > { %v736_v5 = vsel %vm735_vm5, %v3673_v63, %v728_v4  ;;  %v737_v52 = vsel %vm735_vm5, %v728_v4, %v730_v0  ;;  %v382_v61 = vpop.permute.xlu0 %381 }
 0x19c   : > { %744 = vst [vmem:[#allocation2 + $0xc0] sm:$0xf0] %v736_v5  ;;  %745 = vst [vmem:[#allocation2 + $0x250] sm:$0xf0] %v737_v52  ;;  %v390_v48 = vsel %vm389_vm4, %v3653_v40, %v382_v61  ;;  %v391_v53 = vsel %vm389_vm4, %v382_v61, %v384_v16 }
 0x19d   : > { %398 = vst [vmem:[#allocation2 + $0x2e0] sm:$0xf0] %v390_v48  ;;  %399 = vst [vmem:[#allocation2 + $0x1f0] sm:$0xf0] %v391_v53 }
 0x19e   : > { %v732_v6 = vpop.permute.xlu1 %731 }
 0x19f   : > { %v738_v7 = vsel %vm735_vm5, %v3673_v63, %v732_v6  ;;  %v739_v9 = vsel %vm735_vm5, %v732_v6, %v734_v58  ;;  %v386_v13 = vpop.permute.xlu0 %385 }
 0x1a0   : > { %746 = vst [vmem:[#allocation2 + $0xa0] sm:$0xf0] %v738_v7  ;;  %747 = vst [vmem:[#allocation2 + $0x168] sm:$0xf0] %v739_v9  ;;  %v392_v60 = vsel %vm389_vm4, %v3653_v40, %v386_v13  ;;  %v393_v22 = vsel %vm389_vm4, %v386_v13, %v388_v31 }
 0x1a1   : > { %400 = vst [vmem:[#allocation2 + $0x190] sm:$0xf0] %v392_v60  ;;  %401 = vst [vmem:[#allocation2 + $0x28] sm:$0xf0] %v393_v22 }
 0x1a2   : > { %v804_v19 = vpop.permute.xlu1 %803 }
 0x1a3   : > { %v798_v8 = vpop.permute.xlu0 %797 }
 0x1a4   : > { %v806_v18 = vsel %vm4531_vm1, %v3659_v49, %v798_v8  ;;  %v807_v63 = vsel %vm4531_vm1, %v798_v8, %v800_v57 }
 0x1a5   : > { %814 = vst [vmem:[#allocation2 + $0x130] sm:$0xf0] %v806_v18  ;;  %815 = vst [vmem:[#allocation2 + $0x80] sm:$0xf0] %v807_v63 }
 0x1a7   : > { %v802_v51 = vpop.permute.xlu0 %801 }
 0x1a8   : > { %v808_v62 = vsel %vm4531_vm1, %v3659_v49, %v802_v51  ;;  %v809_v40 = vsel %vm4531_vm1, %v802_v51, %v804_v19  ;;  %vm1285_vm1 = vcmask 1039360  }
 0x1a9   : > { %816 = vst [vmem:[#allocation2 + $0x40] sm:$0xf0] %v808_v62  ;;  %817 = vst [vmem:[#allocation2 + $0x120] sm:$0xf0] %v809_v40 }
 0x1ab   : > { %v2869_v20 = vpop.permute.xlu0 %2868 }
 0x1ac   : > { %v2871_v21 = vunpack.i.h.bf16 %v2869_v20  ;;  %v2870_v23 = vunpack.i.l.bf16 %v2869_v20 }
 0x1ae   : > { %v827_v12 = vmul.f32 0.0, %v2870_v23  ;;  %v823_v16 = vsel %vm4485_vm3, %v2870_v23, %v2871_v21  ;;  %v829_v49 = vmul.f32 %v2871_v21, %v3402_v35  ;;  %v831_v27 = vmul.f32 %v2871_v21, %v3408_v37 }
 0x1af   : > { %v828_v26 = vmul.f32 %v823_v16, %v3367_v10  ;;  %v830_v30 = vmul.f32 %v823_v16, %v3369_v11  ;;  %vm4529_vm3 = vcmask 244736  }
 0x1b0   : > { %837 = vrot.lane.b32.xlu1 %v827_v12, %s4523_s30 }
 0x1b1   : > { %839 = vrot.lane.b32.xlu0 %v828_v26, %s4523_s30 }
 0x1b4   : > { %841 = vrot.lane.b32.xlu1 %v829_v49, %s4523_s30 }
 0x1b5   : > { %843 = vrot.lane.b32.xlu0 %v830_v30, %s4523_s30 }
 0x1b8   : > { %845 = vrot.lane.b32.xlu1 %v831_v27, %s4523_s30  ;;  %s3199_s30 = smov 1  }
 0x1b9   : > { %2873 = vrot.lane.b32.xlu0 %v3425_v42, %s4487_s22  ;;  %s4524_s22 = smov 29  }
 0x222   : > { %v838_v31 = vpop.permute.xlu1 %837 }
 0x223   : > { %v840_v32 = vpop.permute.xlu0 %839 }
 0x224   : > { %v848_v55 = vsel %vm4529_vm3, %v838_v31, %v840_v32 }
 0x225   : > { %856 = vst [vmem:[#allocation2 + $0x60] sm:$0xf] %v848_v55 }
 0x226   : > { %v842_v34 = vpop.permute.xlu1 %841 }
 0x227   : > { %v849_v57 = vsel %vm4529_vm3, %v840_v32, %v842_v34  ;;  %v844_v14 = vpop.permute.xlu0 %843 }
 0x228   : > { %857 = vst [vmem:[#allocation2 + $0x210] sm:$0xf] %v849_v57  ;;  %v850_v36 = vsel %vm4529_vm3, %v838_v31, %v844_v14 }
 0x229   : > { %858 = vst [vmem:[#allocation2 + $0xe8] sm:$0xf] %v850_v36 }
 0x22a   : > { %v846_v41 = vpop.permute.xlu1 %845 }
 0x22b   : > { %v851_v43 = vsel %vm4529_vm3, %v844_v14, %v846_v41  ;;  %v2874_v44 = vpop.permute.xlu0 %2873  ;;  %vm4533_vm3 = vcmask 7168  }
 0x22c   : > { %859 = vst [vmem:[#allocation2 + $0x2a8] sm:$0xf] %v851_v43  ;;  %v2876_v50 = vunpack.i.h.bf16 %v2874_v44  ;;  %v2875_v33 = vunpack.i.l.bf16 %v2874_v44 }
 0x22e   : > { %v869_v45 = vmul.f32 0.0, %v2875_v33  ;;  %v865_v56 = vsel %vm4491_vm0, %v2875_v33, %v2876_v50  ;;  %v871_v59 = vmul.f32 %v2876_v50, %v3402_v35  ;;  %v873_v47 = vmul.f32 %v2876_v50, %v3408_v37 }
 0x22f   : > { %v870_v54 = vmul.f32 %v865_v56, %v3367_v10  ;;  %v872_v3 = vmul.f32 %v865_v56, %v3369_v11  ;;  %vm4513_vm0 = vcmask 236544  }
 0x230   : > { %v879_v24 = vrot.slane %v869_v45, 4  ;;  %v881_v46 = vrot.slane %v871_v59, 4  ;;  %v883_v4 = vrot.slane %v873_v47, 4 }
 0x231   : > { %v880_v0 = vrot.slane %v870_v54, 4  ;;  %v882_v58 = vrot.slane %v872_v3, 4 }
 0x232   : > { %884 = vrot.lane.b32.xlu1 %v879_v24, %s4524_s22 }
 0x233   : > { %886 = vrot.lane.b32.xlu0 %v880_v0, %s4524_s22 }
 0x236   : > { %888 = vrot.lane.b32.xlu1 %v881_v46, %s4524_s22 }
 0x237   : > { %890 = vrot.lane.b32.xlu0 %v882_v58, %s4524_s22 }
 0x23a   : > { %892 = vrot.lane.b32.xlu1 %v883_v4, %s4524_s22  ;;  %s3200_s22 = smov 2  }
 0x23b   : > { %2878 = vrot.lane.b32.xlu0 %v3385_v25, %s4493_s6  ;;  %s4521_s6 = smov 19  }
 0x2a4   : > { %v885_v5 = vpop.permute.xlu1 %884 }
 0x2a5   : > { %v887_v52 = vpop.permute.xlu0 %886 }
 0x2a6   : > { %v895_v61 = vsel %vm4513_vm0, %v885_v5, %v887_v52 }
 0x2a7   : > { %903 = vst [vmem:[#allocation2 + $0x60] sm:$0xf0] %v895_v61 }
 0x2a8   : > { %v889_v6 = vpop.permute.xlu1 %888 }
 0x2a9   : > { %v896_v48 = vsel %vm4513_vm0, %v887_v52, %v889_v6  ;;  %v891_v53 = vpop.permute.xlu0 %890 }
 0x2aa   : > { %904 = vst [vmem:[#allocation2 + $0x210] sm:$0xf0] %v896_v48  ;;  %v897_v7 = vsel %vm4513_vm0, %v885_v5, %v891_v53 }
 0x2ab   : > { %905 = vst [vmem:[#allocation2 + $0xe8] sm:$0xf0] %v897_v7 }
 0x2ac   : > { %v893_v9 = vpop.permute.xlu1 %892 }
 0x2ad   : > { %v898_v13 = vsel %vm4513_vm0, %v891_v53, %v893_v9  ;;  %v2879_v60 = vpop.permute.xlu0 %2878  ;;  %vm1065_vm0 = vcmask 924672  }
 0x2ae   : > { %906 = vst [vmem:[#allocation2 + $0x2a8] sm:$0xf0] %v898_v13  ;;  %v2881_v22 = vunpack.i.h.bf16 %v2879_v60  ;;  %v2880_v8 = vunpack.i.l.bf16 %v2879_v60 }
 0x2b0   : > { %v916_v18 = vmul.f32 0.0, %v2880_v8  ;;  %v912_v63 = vsel %vm4497_vm15, %v2880_v8, %v2881_v22  ;;  %v918_v51 = vmul.f32 %v2881_v22, %v3402_v35  ;;  %v920_v40 = vmul.f32 %v2881_v22, %v3408_v37 }
 0x2b1   : > { %v917_v19 = vmul.f32 %v912_v63, %v3367_v10  ;;  %v919_v62 = vmul.f32 %v912_v63, %v3369_v11  ;;  %vm4504_vm15 = vcmask 154624  }
 0x2b2   : > { %926 = vrot.lane.b32.xlu1 %v916_v18, %s4521_s6 }
 0x2b3   : > { %928 = vrot.lane.b32.xlu0 %v917_v19, %s4521_s6 }
 0x2b6   : > { %930 = vrot.lane.b32.xlu1 %v918_v51, %s4521_s6 }
 0x2b7   : > { %932 = vrot.lane.b32.xlu0 %v919_v62, %s4521_s6 }
 0x2ba   : > { %934 = vrot.lane.b32.xlu1 %v920_v40, %s4521_s6  ;;  %s4525_s6 = smov 3  }
 0x2bb   : > { %2883 = vrot.lane.b32.xlu0 %v3389_v28, %s4499_s11  ;;  %s4522_s11 = smov 18  }
 0x324   : > { %v927_v20 = vpop.permute.xlu1 %926 }
 0x325   : > { %v929_v21 = vpop.permute.xlu0 %928 }
 0x326   : > { %v937_v23 = vsel %vm4504_vm15, %v927_v20, %v929_v21 }
 0x327   : > { %945 = vst [vmem:[#allocation2 + $0x2c0] sm:$0xf] %v937_v23 }
 0x328   : > { %v931_v12 = vpop.permute.xlu1 %930 }
 0x329   : > { %v938_v16 = vsel %vm4504_vm15, %v929_v21, %v931_v12  ;;  %v933_v26 = vpop.permute.xlu0 %932 }
 0x32a   : > { %946 = vst [vmem:[#allocation2 + $0x2b0] sm:$0xf] %v938_v16  ;;  %v939_v49 = vsel %vm4504_vm15, %v927_v20, %v933_v26 }
 0x32b   : > { %947 = vst [vmem:[#allocation2 + $0xa8] sm:$0xf] %v939_v49 }
 0x32c   : > { %v935_v30 = vpop.permute.xlu1 %934 }
 0x32d   : > { %v940_v27 = vsel %vm4504_vm15, %v933_v26, %v935_v30  ;;  %v2884_v31 = vpop.permute.xlu0 %2883  ;;  %vm4511_vm15 = vcmask 908288  }
 0x32e   : > { %948 = vst [vmem:[#allocation2 + $0x240] sm:$0xf] %v940_v27  ;;  %v2886_v32 = vunpack.i.h.bf16 %v2884_v31  ;;  %v2885_v55 = vunpack.i.l.bf16 %v2884_v31 }
 0x330   : > { %v958_v34 = vmul.f32 0.0, %v2885_v55  ;;  %v954_v57 = vsel %vm4503_vm6, %v2885_v55, %v2886_v32  ;;  %v960_v41 = vmul.f32 %v2886_v32, %v3402_v35  ;;  %v962_v33 = vmul.f32 %v2886_v32, %v3408_v37 }
 0x331   : > { %v959_v14 = vmul.f32 %v954_v57, %v3367_v10  ;;  %v961_v44 = vmul.f32 %v954_v57, %v3369_v11  ;;  %vm4512_vm6 = vcmask 146432  }
 0x332   : > { %v968_v36 = vrot.slane %v958_v34, 4  ;;  %v970_v50 = vrot.slane %v960_v41, 4  ;;  %v972_v56 = vrot.slane %v962_v33, 4 }
 0x333   : > { %v969_v43 = vrot.slane %v959_v14, 4  ;;  %v971_v45 = vrot.slane %v961_v44, 4 }
 0x334   : > { %973 = vrot.lane.b32.xlu1 %v968_v36, %s4522_s11 }
 0x335   : > { %975 = vrot.lane.b32.xlu0 %v969_v43, %s4522_s11 }
 0x338   : > { %977 = vrot.lane.b32.xlu1 %v970_v50, %s4522_s11 }
 0x339   : > { %979 = vrot.lane.b32.xlu0 %v971_v45, %s4522_s11 }
 0x33c   : > { %981 = vrot.lane.b32.xlu1 %v972_v56, %s4522_s11  ;;  %s3198_s11 = smov 13  }
 0x33d   : > { %2888 = vrot.lane.b32.xlu0 %v3414_v38, %s4505_s4  ;;  %s4520_s4 = smov 17  }
 0x3a6   : > { %v974_v54 = vpop.permute.xlu1 %973 }
 0x3a7   : > { %v976_v24 = vpop.permute.xlu0 %975 }
 0x3a8   : > { %v984_v59 = vsel %vm4512_vm6, %v974_v54, %v976_v24 }
 0x3a9   : > { %992 = vst [vmem:[#allocation2 + $0x2c0] sm:$0xf0] %v984_v59 }
 0x3aa   : > { %v978_v0 = vpop.permute.xlu1 %977 }
 0x3ab   : > { %v985_v3 = vsel %vm4512_vm6, %v976_v24, %v978_v0  ;;  %v980_v46 = vpop.permute.xlu0 %979 }
 0x3ac   : > { %993 = vst [vmem:[#allocation2 + $0x2b0] sm:$0xf0] %v985_v3  ;;  %v986_v47 = vsel %vm4512_vm6, %v974_v54, %v980_v46 }
 0x3ad   : > { %994 = vst [vmem:[#allocation2 + $0xa8] sm:$0xf0] %v986_v47 }
 0x3ae   : > { %v982_v58 = vpop.permute.xlu1 %981 }
 0x3af   : > { %v987_v4 = vsel %vm4512_vm6, %v980_v46, %v982_v58  ;;  %v2889_v5 = vpop.permute.xlu0 %2888  ;;  %vm1048_vm6 = vcmask 130048  }
 0x3b0   : > { %995 = vst [vmem:[#allocation2 + $0x240] sm:$0xf0] %v987_v4  ;;  %v2891_v52 = vunpack.i.h.bf16 %v2889_v5  ;;  %v2890_v61 = vunpack.i.l.bf16 %v2889_v5 }
 0x3b2   : > { %v1005_v6 = vmul.f32 0.0, %v2890_v61  ;;  %v1001_v48 = vsel %vm4511_vm15, %v2890_v61, %v2891_v52  ;;  %v1007_v7 = vmul.f32 %v2891_v52, %v3402_v35  ;;  %v1009_v13 = vmul.f32 %v2891_v52, %v3408_v37 }
 0x3b3   : > { %v1006_v53 = vmul.f32 %v1001_v48, %v3367_v10  ;;  %v1008_v9 = vmul.f32 %v1001_v48, %v3369_v11  ;;  %vm4517_vm15 = vcmask 138240  }
 0x3b4   : > { %1015 = vrot.lane.b32.xlu1 %v1005_v6, %s4520_s4 }
 0x3b5   : > { %1017 = vrot.lane.b32.xlu0 %v1006_v53, %s4520_s4 }
 0x3b8   : > { %1019 = vrot.lane.b32.xlu1 %v1007_v7, %s4520_s4 }
 0x3b9   : > { %1021 = vrot.lane.b32.xlu0 %v1008_v9, %s4520_s4 }
 0x3bc   : > { %1023 = vrot.lane.b32.xlu1 %v1009_v13, %s4520_s4  ;;  %s3196_s4 = smov 115  }
 0x3bd   : > { %1038 = vrot.lane.b32.xlu0 %v3363_v2, %s4514_s20 }
 0x3c0   : > { %1040 = vrot.lane.b32.xlu1 %v3372_v15, %s4514_s20 }
 0x3c1   : > { %1042 = vrot.lane.b32.xlu0 %v3402_v35, %s4514_s20 }
 0x3c4   : > { %1044 = vrot.lane.b32.xlu1 %v3376_v17, %s4514_s20 }
 0x3c5   : > { %1046 = vrot.lane.b32.xlu0 %v3408_v37, %s4514_s20  ;;  %s3193_s20 = smov 15  }
 0x3c8   : > { %2893 = vrot.lane.b32.xlu1 %v3395_v29, %s4515_s23  ;;  %s4518_s23 = smov 114  }
 0x426   : > { %v1016_v60 = vpop.permute.xlu1 %1015 }
 0x427   : > { %v1018_v22 = vpop.permute.xlu0 %1017 }
 0x428   : > { %v1026_v8 = vsel %vm4517_vm15, %v1016_v60, %v1018_v22 }
 0x429   : > { %1034 = vst [vmem:[#allocation2 + $0x1e0] sm:$0xf] %v1026_v8 }
 0x42a   : > { %v1020_v18 = vpop.permute.xlu1 %1019 }
 0x42b   : > { %v1027_v63 = vsel %vm4517_vm15, %v1018_v22, %v1020_v18  ;;  %v1022_v19 = vpop.permute.xlu0 %1021 }
 0x42c   : > { %1035 = vst [vmem:[#allocation2 + $0x308] sm:$0xf] %v1027_v63  ;;  %v1028_v51 = vsel %vm4517_vm15, %v1016_v60, %v1022_v19 }
 0x42d   : > { %1036 = vst [vmem:[#allocation2 + $0xe0] sm:$0xf] %v1028_v51 }
 0x42e   : > { %v1024_v62 = vpop.permute.xlu1 %1023 }
 0x42f   : > { %v1029_v40 = vsel %vm4517_vm15, %v1022_v19, %v1024_v62  ;;  %v1039_v20 = vpop.permute.xlu0 %1038  ;;  %vm1107_vm15 = vcmask 932864  }
 0x430   : > { %1037 = vst [vmem:[#allocation2 + $0x270] sm:$0xf] %v1029_v40 }
 0x432   : > { %v1041_v21 = vpop.permute.xlu1 %1040 }
 0x433   : > { %v1049_v23 = vsel %vm1048_vm6, %v1039_v20, %v1041_v21  ;;  %v1043_v12 = vpop.permute.xlu0 %1042 }
 0x434   : > { %1057 = vst [vmem:[#allocation2 + $0x1e0] sm:$0xf0] %v1049_v23  ;;  %v1050_v16 = vsel %vm1048_vm6, %v1041_v21, %v1043_v12 }
 0x435   : > { %1058 = vst [vmem:[#allocation2 + $0x308] sm:$0xf0] %v1050_v16 }
 0x436   : > { %v1045_v26 = vpop.permute.xlu1 %1044 }
 0x437   : > { %v1051_v49 = vsel %vm1048_vm6, %v1039_v20, %v1045_v26  ;;  %v1047_v30 = vpop.permute.xlu0 %1046 }
 0x438   : > { %1059 = vst [vmem:[#allocation2 + $0xe0] sm:$0xf0] %v1051_v49  ;;  %v1052_v27 = vsel %vm1048_vm6, %v1045_v26, %v1047_v30  ;;  %vm1090_vm6 = vcmask 121856  }
 0x439   : > { %1060 = vst [vmem:[#allocation2 + $0x270] sm:$0xf0] %v1052_v27 }
 0x43a   : > { %v2894_v31 = vpop.permute.xlu1 %2893 }
 0x43b   : > { %v2896_v32 = vunpack.i.h.bf16 %v2894_v31  ;;  %v2895_v55 = vunpack.i.l.bf16 %v2894_v31 }
 0x43d   : > { %v1066_v34 = vsel %vm1065_vm0, %v2895_v55, %v2896_v32  ;;  %v1070_v57 = vmul.f32 0.0, %v2895_v55  ;;  %v1072_v36 = vmul.f32 %v2896_v32, %v3402_v35  ;;  %v1074_v43 = vmul.f32 %v2896_v32, %v3408_v37 }
 0x43e   : > { %v1071_v14 = vmul.f32 %v1066_v34, %v3367_v10  ;;  %v1073_v41 = vmul.f32 %v1066_v34, %v3369_v11 }
 0x43f   : > { %1080 = vrot.lane.b32.xlu0 %v1070_v57, %s3193_s20 }
 0x440   : > { %1082 = vrot.lane.b32.xlu1 %v1071_v14, %s3193_s20 }
 0x443   : > { %1084 = vrot.lane.b32.xlu0 %v1072_v36, %s3193_s20 }
 0x444   : > { %1086 = vrot.lane.b32.xlu1 %v1073_v41, %s3193_s20 }
 0x447   : > { %1088 = vrot.lane.b32.xlu0 %v1074_v43, %s3193_s20 }
 0x448   : > { %2898 = vrot.lane.b32.xlu1 %v3416_v39, %s4518_s23  ;;  %s3195_s23 = smov 14  }
 0x4b1   : > { %v1081_v44 = vpop.permute.xlu0 %1080 }
 0x4b2   : > { %v1083_v50 = vpop.permute.xlu1 %1082 }
 0x4b3   : > { %v1091_v33 = vsel %vm1090_vm6, %v1081_v44, %v1083_v50 }
 0x4b4   : > { %1099 = vst [vmem:[#allocation2 + $0x1d8] sm:$0xf] %v1091_v33 }
 0x4b5   : > { %v1085_v45 = vpop.permute.xlu0 %1084 }
 0x4b6   : > { %v1092_v56 = vsel %vm1090_vm6, %v1083_v50, %v1085_v45  ;;  %v1087_v54 = vpop.permute.xlu1 %1086 }
 0x4b7   : > { %1100 = vst [vmem:[#allocation2 + $0xd0] sm:$0xf] %v1092_v56  ;;  %v1093_v24 = vsel %vm1090_vm6, %v1081_v44, %v1087_v54 }
 0x4b8   : > { %1101 = vst [vmem:[#allocation2 + $0x110] sm:$0xf] %v1093_v24 }
 0x4b9   : > { %v1089_v59 = vpop.permute.xlu0 %1088 }
 0x4ba   : > { %v1094_v0 = vsel %vm1090_vm6, %v1087_v54, %v1089_v59  ;;  %v2899_v3 = vpop.permute.xlu1 %2898 }
 0x4bb   : > { %1102 = vst [vmem:[#allocation2 + $0x1d0] sm:$0xf] %v1094_v0  ;;  %v2901_v46 = vunpack.i.h.bf16 %v2899_v3  ;;  %v2900_v47 = vunpack.i.l.bf16 %v2899_v3 }
 0x4bd   : > { %v1108_v58 = vsel %vm1107_vm15, %v2900_v47, %v2901_v46  ;;  %v1112_v4 = vmul.f32 0.0, %v2900_v47  ;;  %v1114_v61 = vmul.f32 %v2901_v46, %v3402_v35  ;;  %v1116_v7 = vmul.f32 %v2901_v46, %v3408_v37 }
 0x4be   : > { %v1113_v5 = vmul.f32 %v1108_v58, %v3367_v10  ;;  %v1115_v48 = vmul.f32 %v1108_v58, %v3369_v11 }
 0x4bf   : > { %v1122_v52 = vrot.slane %v1112_v4, 4  ;;  %v1124_v53 = vrot.slane %v1114_v61, 4  ;;  %v1126_v13 = vrot.slane %v1116_v7, 4 }
 0x4c0   : > { %v1123_v6 = vrot.slane %v1113_v5, 4  ;;  %v1125_v9 = vrot.slane %v1115_v48, 4 }
 0x4c1   : > { %1127 = vrot.lane.b32.xlu0 %v1122_v52, %s3195_s23 }
 0x4c2   : > { %1129 = vrot.lane.b32.xlu1 %v1123_v6, %s3195_s23 }
 0x4c5   : > { %1131 = vrot.lane.b32.xlu0 %v1124_v53, %s3195_s23 }
 0x4c6   : > { %1133 = vrot.lane.b32.xlu1 %v1125_v9, %s3195_s23 }
 0x4c9   : > { %1135 = vrot.lane.b32.xlu0 %v1126_v13, %s3195_s23 }
 0x4ca   : > { %2903 = vrot.lane.b32.xlu1 %v3425_v42, %s3196_s4 }
 0x4cd   : > { %2908 = vrot.lane.b32.xlu0 %v3389_v28, %s3195_s23  ;;  %s3201_s23 = smov 127  }
 0x4ce   : > { %2913 = vrot.lane.b32.xlu1 %v3414_v38, %s3193_s20  ;;  %s3202_s20 = smov 125  }
 0x4d1   : > { %2918 = vrot.lane.b32.xlu0 %v3425_v42, %s4525_s6  ;;  %s3203_s6 = smov 126  }
 0x4d2   : > { %2923 = vrot.lane.b32.xlu1 %v3385_v25, %s3198_s11 }
 0x4d5   : > { %2928 = vrot.lane.b32.xlu0 %v3395_v29, %s3199_s30 }
 0x4d6   : > { %2933 = vrot.lane.b32.xlu1 %v3416_v39, %s3200_s22 }
 0x4d9   : > { %2938 = vrot.lane.b32.xlu0 %v3414_v38, %s3201_s23 }
 0x4da   : > { %2943 = vrot.lane.b32.xlu1 %v3385_v25, %s3202_s20 }
 0x4dd   : > { %2948 = vrot.lane.b32.xlu0 %v3389_v28, %s3203_s6 }
 0x4de   : > { %2953 = vrot.lane.b32.xlu1 %v3416_v39, %s3176_s26  ;;  %s3205_s26 = smov 80  }
 0x4e1   : > { %2958 = vrot.lane.b32.xlu0 %v3425_v42, %s3171_s17  ;;  %s4546_s17 = smov 29  }
 0x4e2   : > { %2963 = vrot.lane.b32.xlu1 %v3395_v29, %s3173_s28  ;;  %s4547_s28 = smov 30  }
 0x4e5   : > { %2968 = vrot.lane.b32.xlu0 %v3389_v28, %s3177_s8  ;;  %s4558_s8 = smov 83  }
 0x4e6   : > { %2973 = vrot.lane.b32.xlu1 %v3414_v38, %s3172_s19  ;;  %s4548_s19 = smov 18  }
 0x4e9   : > { %2978 = vrot.lane.b32.xlu0 %v3425_v42, %s3179_s9  ;;  %s4549_s9 = smov 19  }
 0x4ea   : > { %2983 = vrot.lane.b32.xlu1 %v3385_v25, %s3174_s29  ;;  %s4550_s29 = smov 17  }
 0x4ed   : > { %2988 = vrot.lane.b32.xlu0 %v3395_v29, %s3180_s7  ;;  %s4551_s7 = smov 113  }
 0x4ee   : > { %2993 = vrot.lane.b32.xlu1 %v3416_v39, %s3175_s5  ;;  %s4552_s5 = smov 114  }
 0x4f1   : > { %2998 = vrot.lane.b32.xlu0 %v3414_v38, %s3178_s10  ;;  %s3204_s10 = smov 112  }
 0x4f2   : > { %3003 = vrot.lane.b32.xlu1 %v3385_v25, %s4546_s17  ;;  %s4561_s17 = smov 93  }
 0x4f5   : > { %3008 = vrot.lane.b32.xlu0 %v3389_v28, %s4547_s28  ;;  %s3206_s28 = smov 96  }
 0x4f6   : > { %3013 = vrot.lane.b32.xlu1 %v3416_v39, %s4548_s19  ;;  %s4566_s19 = smov 95  }
 0x4f9   : > { %3018 = vrot.lane.b32.xlu0 %v3425_v42, %s4549_s9  ;;  %s4575_s9 = smov 98  }
 0x4fa   : > { %3023 = vrot.lane.b32.xlu1 %v3395_v29, %s4550_s29  ;;  %s4578_s29 = smov 97  }
 0x533   : > { %v1128_v60 = vpop.permute.xlu0 %1127 }
 0x534   : > { %v1130_v22 = vpop.permute.xlu1 %1129 }
 0x535   : > { %v1138_v38 = vsel %vm1137_vm2, %v1128_v60, %v1130_v22 }
 0x536   : > { %1146 = vst [vmem:[#allocation2 + $0x1d8] sm:$0xf0] %v1138_v38 }
 0x537   : > { %v1132_v8 = vpop.permute.xlu0 %1131 }
 0x538   : > { %v1139_v25 = vsel %vm1137_vm2, %v1130_v22, %v1132_v8  ;;  %v1134_v18 = vpop.permute.xlu1 %1133 }
 0x539   : > { %1147 = vst [vmem:[#allocation2 + $0xd0] sm:$0xf0] %v1139_v25  ;;  %v1140_v28 = vsel %vm1137_vm2, %v1128_v60, %v1134_v18 }
 0x53a   : > { %1148 = vst [vmem:[#allocation2 + $0x110] sm:$0xf0] %v1140_v28 }
 0x53b   : > { %v1136_v39 = vpop.permute.xlu0 %1135 }
 0x53c   : > { %v1141_v42 = vsel %vm1137_vm2, %v1134_v18, %v1136_v39  ;;  %v3882_v63 = vpop.permute.xlu1 %2903 }
 0x53d   : > { %1149 = vst [vmem:[#allocation2 + $0x1d0] sm:$0xf0] %v1141_v42 }
 0x53f   : > { %v2909_v23 = vpop.permute.xlu0 %2908 }
 0x540   : > { %v2914_v29 = vpop.permute.xlu1 %2913  ;;  %v2911_v16 = vunpack.i.h.bf16 %v2909_v23  ;;  %v2910_v26 = vunpack.i.l.bf16 %v2909_v23 }
 0x541   : > { %v2916_v19 = vunpack.i.h.bf16 %v2914_v29  ;;  %v2915_v51 = vunpack.i.l.bf16 %v2914_v29 }
 0x542   : > { %v1506_v32 = vsel %vm1137_vm2, %v2910_v26, %v2911_v16  ;;  %v1512_v43 = vmul.f32 0.0, %v2911_v16  ;;  %vm4530_vm2 = vcmask 23552   ;;  %v1513_v46 = vmul.f32 %v2910_v26, %v3369_v11 }
 0x543   : > { %v1557_v62 = vmul.f32 0.0, %v2916_v19  ;;  %v1551_v40 = vsel %vm1090_vm6, %v2915_v51, %v2916_v19  ;;  %v1558_v49 = vmul.f32 %v2915_v51, %v3369_v11  ;;  %v1555_v31 = vmul.f32 %v2915_v51, %v3367_v10  ;;  %v2919_v33 = vpop.permute.xlu0 %2918 }
 0x544   : > { %v1556_v20 = vmul.f32 %v1551_v40, %v3402_v35  ;;  %v1559_v21 = vmul.f32 %v1551_v40, %v3408_v37  ;;  %v2924_v12 = vpop.permute.xlu1 %2923  ;;  %vm4532_vm6 = vcmask 105472   ;;  %v1511_v57 = vmul.f32 %v1506_v32, %v3402_v35 }
 0x545   : > { %1569 = vrot.lane.b32.xlu1 %v1557_v62, %s4551_s7  ;;  %v2926_v30 = vunpack.i.h.bf16 %v2924_v12  ;;  %v2925_v27 = vunpack.i.l.bf16 %v2924_v12  ;;  %v1514_v41 = vmul.f32 %v1506_v32, %v3408_v37  ;;  %v1522_v45 = vrot.slane %v1512_v43, 4 }
 0x546   : > { %1567 = vrot.lane.b32.xlu0 %v1556_v20, %s4551_s7  ;;  %v1521_v36 = vrot.slane %v1511_v57, 4  ;;  %v2921_v54 = vunpack.i.h.bf16 %v2919_v33  ;;  %v2920_v24 = vunpack.i.l.bf16 %v2919_v33  ;;  %v1510_v58 = vmul.f32 %v2910_v26, %v3367_v10 }
 0x547   : > { %v1466_v55 = vsel %vm4532_vm6, %v2925_v27, %v2926_v30  ;;  %v1472_v34 = vmul.f32 0.0, %v2926_v30  ;;  %v1524_v50 = vrot.slane %v1514_v41, 4  ;;  %v1473_v59 = vmul.f32 %v2925_v27, %v3369_v11  ;;  %v2929_v13 = vpop.permute.xlu0 %2928 }
 0x548   : > { %v1471_v14 = vmul.f32 %v1466_v55, %v3402_v35  ;;  %v1474_v44 = vmul.f32 %v1466_v55, %v3408_v37  ;;  %v2934_v56 = vpop.permute.xlu1 %2933  ;;  %v1470_v47 = vmul.f32 %v2925_v27, %v3367_v10  ;;  %v1421_v4 = vsel %vm4530_vm2, %v2920_v24, %v2921_v54 }
 0x549   : > { %1589 = vrot.lane.b32.xlu1 %v3402_v35, %s3204_s10  ;;  %v2936_v0 = vunpack.i.h.bf16 %v2934_v56  ;;  %v2935_v3 = vunpack.i.l.bf16 %v2934_v56  ;;  %v1523_v52 = vrot.slane %v1513_v46, 4  ;;  %v1520_v61 = vrot.slane %v1510_v58, 4 }
 0x54a   : > { %1573 = vrot.lane.b32.xlu0 %v1559_v21, %s4551_s7  ;;  %v1426_v48 = vmul.f32 %v1421_v4, %v3402_v35  ;;  %v1429_v9 = vmul.f32 %v1421_v4, %v3408_v37  ;;  %v1427_v60 = vmul.f32 0.0, %v2921_v54  ;;  %v2931_v8 = vunpack.i.h.bf16 %v2929_v13 }
 0x54b   : > { %v1381_v5 = vsel %vm1268_vm14, %v2935_v3, %v2936_v0  ;;  %v1387_v6 = vmul.f32 0.0, %v2936_v0  ;;  %v2930_v25 = vunpack.i.l.bf16 %v2929_v13  ;;  %v3930_v28 = vpop.permute.xlu0 %2938  ;;  %v1388_v39 = vmul.f32 %v2935_v3, %v3369_v11 }
 0x54c   : > { %v1386_v53 = vmul.f32 %v1381_v5, %v3402_v35  ;;  %v1436_v7 = vrot.slane %v1426_v48, 4  ;;  %v1389_v22 = vmul.f32 %v1381_v5, %v3408_v37  ;;  %v1439_v38 = vrot.slane %v1429_v9, 4 }
 0x54d   : > { %1595 = vrot.lane.b32.xlu1 %v3408_v37, %s3204_s10  ;;  %v1437_v18 = vrot.slane %v1427_v60, 4  ;;  %v1336_v42 = vsel %vm4533_vm3, %v2930_v25, %v2931_v8  ;;  %v1428_v29 = vmul.f32 %v2920_v24, %v3369_v11  ;;  %v1385_v19 = vmul.f32 %v2935_v3, %v3367_v10 }
 0x54e   : > { %1591 = vrot.lane.b32.xlu0 %v3363_v2, %s3204_s10  ;;  %v1425_v51 = vmul.f32 %v2920_v24, %v3367_v10  ;;  %v1342_v62 = vmul.f32 0.0, %v2931_v8  ;;  %v1341_v40 = vmul.f32 %v1336_v42, %v3402_v35  ;;  %vm1243_vm2 = vcmask 1031168  }
 0x54f   : > { %v1438_v20 = vrot.slane %v1428_v29, 4  ;;  %v2949_v21 = vpop.permute.xlu0 %2948  ;;  %v1340_v30 = vmul.f32 %v2930_v25, %v3367_v10  ;;  %v1344_v27 = vmul.f32 %v1336_v42, %v3408_v37  ;;  %v2940_v57 = vunpack.i.l.bf16 %v3930_v28 }
 0x550   : > { %v1435_v23 = vrot.slane %v1425_v51, 4  ;;  %v1352_v12 = vrot.slane %v1342_v62, 4  ;;  %v1351_v16 = vrot.slane %v1341_v40, 4  ;;  %v2951_v26 = vunpack.i.h.bf16 %v2949_v21 }
 0x551   : > { %1571 = vrot.lane.b32.xlu1 %v1558_v49, %s4551_s7  ;;  %v2950_v49 = vunpack.i.l.bf16 %v2949_v21  ;;  %v1350_v55 = vrot.slane %v1340_v30, 4  ;;  %v2905_v58 = vunpack.i.l.bf16 %v3882_v63  ;;  %vm1154_vm6 = vcmask 941056  }
 0x552   : > { %1565 = vrot.lane.b32.xlu0 %v1555_v31, %s4551_s7  ;;  %v3946_v31 = vpop.permute.xlu1 %2943  ;;  %v1250_v56 = vmul.f32 %v2951_v26, %v3402_v35  ;;  %v1252_v3 = vmul.f32 %v2951_v26, %v3408_v37  ;;  %vm1196_vm3 = vcmask 1022976   ;;  %s4587_s7 = smov 109  }
 0x553   : > { %v1244_v32 = vsel %vm1243_vm2, %v2950_v49, %v2951_v26  ;;  %v3968_v24 = vpop.permute.xlu0 %2958  ;;  %v2946_v9 = vunpack.i.h.bf16 %v3946_v31  ;;  %v1159_v30 = vmul.f32 0.0, %v2905_v58 }
 0x554   : > { %v1249_v41 = vmul.f32 %v1244_v32, %v3367_v10  ;;  %v1251_v33 = vmul.f32 %v1244_v32, %v3369_v11 }
 0x555   : > { %1593 = vrot.lane.b32.xlu1 %v3376_v17, %s3204_s10  ;;  %v1203_v40 = vmul.f32 %v2946_v9, %v3402_v35 }
 0x556   : > { %1587 = vrot.lane.b32.xlu0 %v3372_v15, %s3204_s10  ;;  %v3956_v43 = vpop.permute.xlu1 %2953  ;;  %s4590_s10 = smov 99  }
 0x557   : > { %v1213_v26 = vrot.slane %v1203_v40, 4 }
 0x559   : > { %1484 = vrot.lane.b32.xlu1 %v1472_v34, %s3196_s4  ;;  %v2941_v34 = vunpack.i.h.bf16 %v3930_v28 }
 0x55a   : > { %1482 = vrot.lane.b32.xlu0 %v1471_v14, %s3196_s4  ;;  %v1354_v14 = vrot.slane %v1344_v27, 4  ;;  %v3965_v54 = vpop.permute.xlu1 %2963 }
 0x55b   : > { %v1292_v46 = vmul.f32 %v2941_v34, %v3402_v35 }
 0x55d   : > { %1527 = vrot.lane.b32.xlu1 %v1521_v36, %s4552_s5  ;;  %v1343_v36 = vmul.f32 %v2930_v25, %v3369_v11 }
 0x55e   : > { %1488 = vrot.lane.b32.xlu0 %v1474_v44, %s3196_s4  ;;  %v1286_v44 = vsel %vm1285_vm1, %v2940_v57, %v2941_v34  ;;  %v3977_v5 = vpop.permute.xlu1 %2973 }
 0x55f   : > { %v1293_v0 = vmul.f32 %v1286_v44, %v3369_v11 }
 0x561   : > { %1533 = vrot.lane.b32.xlu1 %v1524_v50, %s4552_s5  ;;  %v1353_v50 = vrot.slane %v1343_v36, 4  ;;  %v1303_v4 = vrot.slane %v1293_v0, 4 }
 0x562   : > { %1529 = vrot.lane.b32.xlu0 %v1522_v45, %s4552_s5  ;;  %v1291_v45 = vmul.f32 %v1286_v44, %v3367_v10  ;;  %v3988_v60 = vpop.permute.xlu1 %2983 }
 0x565   : > { %1486 = vrot.lane.b32.xlu1 %v1473_v59, %s3196_s4  ;;  %v1301_v59 = vrot.slane %v1291_v45, 4 }
 0x566   : > { %1480 = vrot.lane.b32.xlu0 %v1470_v47, %s3196_s4  ;;  %v2906_v47 = vunpack.i.h.bf16 %v3882_v63  ;;  %v2945_v63 = vunpack.i.l.bf16 %v3946_v31  ;;  %s4553_s4 = smov 3  }
 0x568   : > { %v1155_v48 = vsel %vm1154_vm6, %v2905_v58, %v2906_v47  ;;  %v1197_v25 = vsel %vm1196_vm3, %v2945_v63, %v2946_v9  ;;  %v1161_v42 = vmul.f32 %v2906_v47, %v3402_v35  ;;  %v1163_v62 = vmul.f32 %v2906_v47, %v3408_v37 }
 0x569   : > { %1531 = vrot.lane.b32.xlu1 %v1523_v52, %s4552_s5  ;;  %v1302_v52 = vrot.slane %v1292_v46, 4  ;;  %v1202_v28 = vmul.f32 %v1197_v25, %v3367_v10  ;;  %v1204_v51 = vmul.f32 %v1197_v25, %v3369_v11  ;;  %v1201_v31 = vmul.f32 0.0, %v2945_v63 }
 0x56a   : > { %1525 = vrot.lane.b32.xlu0 %v1520_v61, %s4552_s5  ;;  %v1294_v61 = vmul.f32 %v2941_v34, %v3408_v37  ;;  %s4599_s5 = smov 111  }
 0x56c   : > { %v1304_v13 = vrot.slane %v1294_v61, 4 }
 0x56d   : > { %1399 = vrot.lane.b32.xlu1 %v1387_v6, %s3203_s6  ;;  %v3980_v6 = vpop.permute.xlu0 %2968 }
 0x56e   : > { %1397 = vrot.lane.b32.xlu0 %v1386_v53, %s3203_s6  ;;  %v1248_v53 = vmul.f32 0.0, %v2950_v49  ;;  %v1205_v49 = vmul.f32 %v2946_v9, %v3408_v37 }
 0x571   : > { %1442 = vrot.lane.b32.xlu1 %v1436_v7, %s3202_s20  ;;  %v1290_v7 = vmul.f32 0.0, %v2940_v57 }
 0x572   : > { %1403 = vrot.lane.b32.xlu0 %v1389_v22, %s3203_s6  ;;  %v3991_v22 = vpop.permute.xlu0 %2978 }
 0x573   : > { %v1300_v8 = vrot.slane %v1290_v7, 4 }
 0x575   : > { %1448 = vrot.lane.b32.xlu1 %v1439_v38, %s3202_s20  ;;  %v1160_v38 = vmul.f32 %v1155_v48, %v3367_v10 }
 0x576   : > { %1444 = vrot.lane.b32.xlu0 %v1437_v18, %s3202_s20  ;;  %v1162_v18 = vmul.f32 %v1155_v48, %v3369_v11  ;;  %v4002_v29 = vpop.permute.xlu0 %2988 }
 0x579   : > { %1401 = vrot.lane.b32.xlu1 %v1388_v39, %s3203_s6  ;;  %v3999_v39 = vpop.permute.xlu1 %2993 }
 0x57a   : > { %1395 = vrot.lane.b32.xlu0 %v1385_v19, %s3203_s6  ;;  %v1212_v19 = vrot.slane %v1202_v28, 4  ;;  %v4013_v21 = vpop.permute.xlu0 %2998  ;;  %s4556_s6 = smov 78  }
 0x57d   : > { %1446 = vrot.lane.b32.xlu1 %v1438_v20, %s3202_s20  ;;  %v4010_v20 = vpop.permute.xlu1 %3003 }
 0x57e   : > { %1440 = vrot.lane.b32.xlu0 %v1435_v23, %s3202_s20  ;;  %v1214_v23 = vrot.slane %v1204_v51, 4  ;;  %v4023_v34 = vpop.permute.xlu0 %3008  ;;  %s4560_s20 = smov 94  }
 0x581   : > { %1359 = vrot.lane.b32.xlu1 %v1352_v12, %s3201_s23  ;;  %v2961_v12 = vunpack.i.h.bf16 %v3968_v24  ;;  %v4020_v27 = vpop.permute.xlu1 %3013 }
 0x582   : > { %1357 = vrot.lane.b32.xlu0 %v1351_v16, %s3201_s23  ;;  %v2960_v16 = vunpack.i.l.bf16 %v3968_v24  ;;  %v2965_v24 = vunpack.i.l.bf16 %v3965_v54 }
 0x583   : > { %v2261_v45 = vmul.f32 0.0, %v2961_v12 }
 0x584   : > { %v2255_v32 = vsel %vm340_vm8, %v2960_v16, %v2961_v12  ;;  %v2262_v0 = vmul.f32 %v2960_v16, %v3369_v11  ;;  %v2259_v47 = vmul.f32 %v2960_v16, %v3367_v10  ;;  %v2177_v12 = vmul.f32 %v2965_v24, %v3369_v11 }
 0x585   : > { %1355 = vrot.lane.b32.xlu1 %v1350_v55, %s3201_s23  ;;  %v1215_v55 = vrot.slane %v1205_v49, 4  ;;  %v2260_v57 = vmul.f32 %v2255_v32, %v3402_v35  ;;  %v4029_v36 = vpop.permute.xlu1 %3023  ;;  %v2263_v44 = vmul.f32 %v2255_v32, %v3408_v37  ;;  %vm4570_vm8 = vcmask 23552  }
 0x586   : > { %1363 = vrot.lane.b32.xlu0 %v1354_v14, %s3201_s23  ;;  %v1211_v14 = vrot.slane %v1201_v31, 4 }
 0x589   : > { %1260 = vrot.lane.b32.xlu1 %v1249_v41, %s3200_s22  ;;  %v4032_v41 = vpop.permute.xlu0 %3018 }
 0x58a   : > { %1361 = vrot.lane.b32.xlu0 %v1353_v50, %s3201_s23  ;;  %v2956_v50 = vunpack.i.h.bf16 %v3956_v43  ;;  %s4559_s23 = smov 82  }
 0x58d   : > { %1264 = vrot.lane.b32.xlu1 %v1251_v33, %s3200_s22  ;;  %v2955_v33 = vunpack.i.l.bf16 %v3956_v43 }
 0x58e   : > { %1262 = vrot.lane.b32.xlu0 %v1250_v56, %s3200_s22  ;;  %v2966_v56 = vunpack.i.h.bf16 %v3965_v54 }
 0x58f   : > { %v2217_v16 = vmul.f32 %v2955_v33, %v3369_v11 }
 0x590   : > { %v2170_v58 = vsel %vm433_vm12, %v2965_v24, %v2966_v56  ;;  %v2176_v54 = vmul.f32 0.0, %v2966_v56  ;;  %vm4574_vm12 = vmmov %vm4570_vm8 }
 0x591   : > { %1307 = vrot.lane.b32.xlu1 %v1301_v59, %s3199_s30  ;;  %v2175_v48 = vmul.f32 %v2170_v58, %v3402_v35 }
 0x592   : > { %1266 = vrot.lane.b32.xlu0 %v1252_v3, %s3200_s22  ;;  %v2210_v3 = vsel %vm389_vm4, %v2955_v33, %v2956_v50  ;;  %vm1597_vm4 = vcmask 916480  }
 0x593   : > { %v2218_v63 = vmul.f32 %v2210_v3, %v3408_v37 }
 0x595   : > { %1311 = vrot.lane.b32.xlu1 %v1303_v4, %s3199_s30 }
 0x596   : > { %1309 = vrot.lane.b32.xlu0 %v1302_v52, %s3199_s30  ;;  %v2215_v52 = vmul.f32 %v2210_v3, %v3402_v35 }
 0x598   : > { %v2225_v9 = vrot.slane %v2215_v52, 4 }
 0x599   : > { %1258 = vrot.lane.b32.xlu1 %v1248_v53, %s3200_s22  ;;  %s4554_s22 = smov 77  }
 0x59a   : > { %1313 = vrot.lane.b32.xlu0 %v1304_v13, %s3199_s30  ;;  %v2216_v13 = vmul.f32 0.0, %v2956_v50 }
 0x59d   : > { %1171 = vrot.lane.b32.xlu1 %v1160_v38, %s3198_s11 }
 0x59e   : > { %1305 = vrot.lane.b32.xlu0 %v1300_v8, %s3199_s30  ;;  %v2178_v8 = vmul.f32 %v2170_v58, %v3408_v37  ;;  %s4557_s30 = smov 81  }
 0x5a1   : > { %1175 = vrot.lane.b32.xlu1 %v1162_v18, %s3198_s11 }
 0x5a2   : > { %1173 = vrot.lane.b32.xlu0 %v1161_v42, %s3198_s11  ;;  %v2228_v42 = vrot.slane %v2218_v63, 4 }
 0x5a5   : > { %1218 = vrot.lane.b32.xlu1 %v1212_v19, %s4553_s4  ;;  %v2226_v19 = vrot.slane %v2216_v13, 4 }
 0x5a6   : > { %1177 = vrot.lane.b32.xlu0 %v1163_v62, %s3198_s11 }
 0x5a9   : > { %1222 = vrot.lane.b32.xlu1 %v1214_v23, %s4553_s4 }
 0x5aa   : > { %1220 = vrot.lane.b32.xlu0 %v1213_v26, %s4553_s4 }
 0x5ad   : > { %1169 = vrot.lane.b32.xlu1 %v1159_v30, %s3198_s11  ;;  %s4555_s11 = smov 79  }
 0x5ae   : > { %1224 = vrot.lane.b32.xlu0 %v1215_v55, %s4553_s4  ;;  %v2174_v55 = vmul.f32 %v2965_v24, %v3367_v10 }
 0x5b1   : > { %2271 = vrot.lane.b32.xlu1 %v2260_v57, %s4554_s22  ;;  %v2214_v57 = vmul.f32 %v2955_v33, %v3367_v10 }
 0x5b2   : > { %1216 = vrot.lane.b32.xlu0 %v1211_v14, %s4553_s4  ;;  %v2976_v14 = vunpack.i.h.bf16 %v3977_v5  ;;  %s4601_s4 = smov 110  }
 0x5b4   : > { %v2113_v33 = vmul.f32 0.0, %v2976_v14 }
 0x5b5   : > { %2277 = vrot.lane.b32.xlu1 %v2263_v44, %s4554_s22  ;;  %v2975_v44 = vunpack.i.l.bf16 %v3977_v5 }
 0x5b6   : > { %2273 = vrot.lane.b32.xlu0 %v2261_v45, %s4554_s22  ;;  %v2227_v45 = vrot.slane %v2217_v16, 4 }
 0x5b7   : > { %v1570_v59 = vpop.permute.xlu1 %1569  ;;  %v2107_v24 = vsel %vm506_vm9, %v2975_v44, %v2976_v14  ;;  %vm4571_vm9 = vcmask 244736  }
 0x5b8   : > { %v1568_v46 = vpop.permute.xlu0 %1567 }
 0x5b9   : > { %v1576_v43 = vsel %vm1065_vm0, %v1568_v46, %v1570_v59  ;;  %2275 = vrot.lane.b32.xlu1 %v2262_v0, %s4554_s22  ;;  %v2224_v0 = vrot.slane %v2214_v57, 4 }
 0x5ba   : > { %1584 = vst [vmem:[#allocation2 + $0x258] sm:$0xf] %v1576_v43  ;;  %2269 = vrot.lane.b32.xlu0 %v2259_v47, %s4554_s22  ;;  %v2112_v43 = vmul.f32 %v2107_v24, %v3402_v35 }
 0x5bb   : > { %v1590_v4 = vpop.permute.xlu1 %1589 }
 0x5bc   : > { %v1574_v61 = vpop.permute.xlu0 %1573 }
 0x5bd   : > { %v1578_v53 = vsel %vm1065_vm0, %v1574_v61, %v1570_v59  ;;  %2188 = vrot.lane.b32.xlu1 %v2176_v54, %s4555_s11 }
 0x5be   : > { %1586 = vst [vmem:[#allocation2 + $0x260] sm:$0xf] %v1578_v53  ;;  %2186 = vrot.lane.b32.xlu0 %v2175_v48, %s4555_s11  ;;  %v2115_v48 = vmul.f32 %v2107_v24, %v3408_v37 }
 0x5bf   : > { %v1596_v7 = vpop.permute.xlu1 %1595 }
 0x5c0   : > { %v1592_v38 = vpop.permute.xlu0 %1591 }
 0x5c1   : > { %v1599_v25 = vsel %vm1597_vm4, %v1590_v4, %v1592_v38  ;;  %v1601_v18 = vsel %vm1597_vm4, %v1596_v7, %v1592_v38  ;;  %2231 = vrot.lane.b32.xlu1 %v2225_v9, %s4556_s6  ;;  %v2114_v38 = vmul.f32 %v2975_v44, %v3369_v11 }
 0x5c2   : > { %1607 = vst [vmem:[#allocation2 + $0x258] sm:$0xf0] %v1599_v25  ;;  %1609 = vst [vmem:[#allocation2 + $0x260] sm:$0xf0] %v1601_v18  ;;  %2192 = vrot.lane.b32.xlu0 %v2178_v8, %s4555_s11  ;;  %v2971_v8 = vunpack.i.h.bf16 %v3980_v6  ;;  %v4096_v25 = vunpack.i.l.bf16 %v3980_v6 }
 0x5c3   : > { %v1572_v28 = vpop.permute.xlu1 %1571 }
 0x5c4   : > { %v1577_v51 = vsel %vm1065_vm0, %v1572_v28, %v1574_v61  ;;  %v1566_v62 = vpop.permute.xlu0 %1565 }
 0x5c5   : > { %1585 = vst [vmem:[#allocation2 + $0xb8] sm:$0xf] %v1577_v51  ;;  %v1575_v40 = vsel %vm1065_vm0, %v1566_v62, %v1568_v46  ;;  %2237 = vrot.lane.b32.xlu1 %v2228_v42, %s4556_s6  ;;  %v2986_v62 = vunpack.i.h.bf16 %v3988_v60 }
 0x5c6   : > { %1583 = vst [vmem:[#allocation2 + $0x1a8] sm:$0xf] %v1575_v40  ;;  %2233 = vrot.lane.b32.xlu0 %v2226_v19, %s4556_s6  ;;  %v2985_v40 = vunpack.i.l.bf16 %v3988_v60 }
 0x5c7   : > { %v1594_v23 = vpop.permute.xlu1 %1593 }
 0x5c8   : > { %v1600_v26 = vsel %vm1597_vm4, %v1594_v23, %v1596_v7  ;;  %v1588_v49 = vpop.permute.xlu0 %1587  ;;  %v2062_v23 = vsel %vm555_vm13, %v4096_v25, %v2971_v8  ;;  %vm4576_vm13 = vmmov %vm4570_vm8 }
 0x5c9   : > { %1608 = vst [vmem:[#allocation2 + $0xb8] sm:$0xf0] %v1600_v26  ;;  %v1598_v30 = vsel %vm1597_vm4, %v1588_v49, %v1590_v4  ;;  %2190 = vrot.lane.b32.xlu1 %v2177_v12, %s4555_s11  ;;  %v2325_v31 = vld [vmem:[#allocation2 + $0x258] sm:$0xff]  ;;  %v2469_v32 = vld [vmem:[#allocation2 + $0x260] sm:$0xff]  ;;  %v2022_v26 = vsel %vm599_vm10, %v2985_v40, %v2986_v62  ;;  %v2028_v49 = vmul.f32 0.0, %v2986_v62 }
 0x5ca   : > { %1606 = vst [vmem:[#allocation2 + $0x1a8] sm:$0xf0] %v1598_v30  ;;  %2360 = vmatprep.subr.mxu0 %v2325_v31  ;;  %2494 = vmatprep.subr.mxu1 %v2469_v32  ;;  %v2067_v30 = vmul.f32 %v2062_v23, %v3402_v35 }
 0x5cb   : > { %2184 = vrot.lane.b32.xlu0 %v2174_v55, %s4555_s11  ;;  %v1485_v50 = vpop.permute.xlu1 %1484 }
 0x5cc   : > { %v1483_v56 = vpop.permute.xlu0 %1482 }
 0x5cd   : > { %v1491_v59 = vsel %vm1154_vm6, %v1483_v56, %v1485_v50  ;;  %2235 = vrot.lane.b32.xlu1 %v2227_v45, %s4556_s6  ;;  %v2068_v45 = vmul.f32 0.0, %v2971_v8 }
 0x5ce   : > { %1499 = vst [vmem:[#allocation2 + $0x2c8] sm:$0xf] %v1491_v59 }
 0x5cf   : > { %2229 = vrot.lane.b32.xlu0 %v2224_v0, %s4556_s6  ;;  %v1528_v5 = vpop.permute.xlu1 %1527  ;;  %v2030_v0 = vmul.f32 %v2022_v26, %v3408_v37  ;;  %s2679_s6 = sshll.u32 %s3350_s27, 5 }
 0x5d0   : > { %v1489_v3 = vpop.permute.xlu0 %1488  ;;  %v2468_v46 = vld [vmem:[#allocation2 + $0xb8] sm:$0xff] }
 0x5d1   : > { %v1493_v47 = vsel %vm1154_vm6, %v1489_v3, %v1485_v50  ;;  %2495 = vmatpush1.msra.mxu1 %v2468_v46  ;;  %2125 = vrot.lane.b32.xlu1 %v2113_v33, %s4557_s30  ;;  %v2324_v58 = vld [vmem:[#allocation2 + $0x1a8] sm:$0xff]  ;;  %v2078_v46 = vrot.slane %v2068_v45, 4 }
 0x5d2   : > { %1501 = vst [vmem:[#allocation2 + $0x238] sm:$0xf] %v1493_v47  ;;  %2361 = vmatpush1.msra.mxu0 %v2324_v58 }
 0x5d3   : > { %2123 = vrot.lane.b32.xlu0 %v2112_v43, %s4557_s30  ;;  %v1534_v54 = vpop.permute.xlu1 %1533  ;;  %v2029_v43 = vmul.f32 %v2985_v40, %v3369_v11 }
 0x5d4   : > { %v1530_v4 = vpop.permute.xlu0 %1529 }
 0x5d5   : > { %v1536_v52 = vsel %vm1107_vm15, %v1528_v5, %v1530_v4  ;;  %v1538_v61 = vsel %vm1107_vm15, %v1534_v54, %v1530_v4  ;;  %2145 = vrot.lane.b32.xlu1 %v3402_v35, %s3205_s26  ;;  %v2981_v4 = vunpack.i.h.bf16 %v3991_v22 }
 0x5d6   : > { %1544 = vst [vmem:[#allocation2 + $0x2c8] sm:$0xf0] %v1536_v52  ;;  %1546 = vst [vmem:[#allocation2 + $0x238] sm:$0xf0] %v1538_v61  ;;  %v4133_v52 = vunpack.i.l.bf16 %v3991_v22  ;;  %v4143_v22 = vunpack.i.l.bf16 %v3999_v39 }
 0x5d7   : > { %2129 = vrot.lane.b32.xlu0 %v2115_v48, %s4557_s30  ;;  %v1487_v53 = vpop.permute.xlu1 %1486 }
 0x5d8   : > { %v1492_v7 = vsel %vm1154_vm6, %v1487_v53, %v1489_v3  ;;  %v1481_v9 = vpop.permute.xlu0 %1480 }
 0x5d9   : > { %1500 = vst [vmem:[#allocation2 + $0x2f8] sm:$0xf] %v1492_v7  ;;  %v1490_v63 = vsel %vm1154_vm6, %v1481_v9, %v1483_v56  ;;  %2151 = vrot.lane.b32.xlu1 %v3408_v37, %s3205_s26  ;;  %vm4577_vm6 = vmmov %vm4570_vm8 }
 0x5da   : > { %1498 = vst [vmem:[#allocation2 + $0x70] sm:$0xf] %v1490_v63  ;;  %v2026_v63 = vmul.f32 %v2985_v40, %v3367_v10 }
 0x5db   : > { %2147 = vrot.lane.b32.xlu0 %v3363_v2, %s3205_s26  ;;  %v1532_v13 = vpop.permute.xlu1 %1531  ;;  %v2111_v2 = vmul.f32 %v2975_v44, %v3367_v10  ;;  %v2077_v44 = vrot.slane %v2067_v30, 4 }
 0x5dc   : > { %v1537_v18 = vsel %vm1107_vm15, %v1532_v13, %v1534_v54  ;;  %v1526_v28 = vpop.permute.xlu0 %1525  ;;  %v2069_v54 = vmul.f32 %v4096_v25, %v3369_v11  ;;  %v2066_v13 = vmul.f32 %v4096_v25, %v3367_v10 }
 0x5dd   : > { %1545 = vst [vmem:[#allocation2 + $0x2f8] sm:$0xf0] %v1537_v18  ;;  %v1535_v42 = vsel %vm1107_vm15, %v1526_v28, %v1528_v5  ;;  %2127 = vrot.lane.b32.xlu1 %v2114_v38, %s4557_s30  ;;  %v2323_v19 = vld [vmem:[#allocation2 + $0x2c8] sm:$0xff]  ;;  %v2467_v51 = vld [vmem:[#allocation2 + $0x238] sm:$0xff]  ;;  %v2996_v38 = vunpack.i.h.bf16 %v3999_v39  ;;  %v1977_v28 = vsel %vm646_vm7, %v4133_v52, %v2981_v4  ;;  %vm4562_vm15 = vcmask 7168  }
 0x5de   : > { %1543 = vst [vmem:[#allocation2 + $0x70] sm:$0xf0] %v1535_v42  ;;  %2362 = vmatprep.subr.mxu0 %v2323_v19  ;;  %2496 = vmatprep.subr.mxu1 %v2467_v51  ;;  %v2079_v18 = vrot.slane %v2069_v54, 4  ;;  %v2076_v25 = vrot.slane %v2066_v13, 4  ;;  %v1982_v62 = vmul.f32 %v1977_v28, %v3402_v35  ;;  %v1985_v30 = vmul.f32 %v1977_v28, %v3408_v37  ;;  %vm4563_vm0 = vmmov %vm4562_vm15 }
 0x5df   : > { %2121 = vrot.lane.b32.xlu0 %v2111_v2, %s4557_s30  ;;  %v1400_v6 = vpop.permute.xlu1 %1399  ;;  %v1937_v39 = vsel %vm688_vm11, %v4143_v22, %v2996_v38  ;;  %v1943_v51 = vmul.f32 0.0, %v2996_v38  ;;  %v1981_v54 = vmul.f32 %v4133_v52, %v3367_v10  ;;  %vm4569_vm7 = vcmask 252928   ;;  %s201_s30 = scalar_lea.vmem [#allocation8], %s2679_s6 }
 0x5e0   : > { %v1398_v12 = vpop.permute.xlu0 %1397 }
 0x5e1   : > { %v1406_v16 = vsel %vm1243_vm2, %v1398_v12, %v1400_v6  ;;  %2149 = vrot.lane.b32.xlu1 %v3376_v17, %s3205_s26  ;;  %v2027_v17 = vmul.f32 %v2022_v26, %v3402_v35  ;;  %v1942_v26 = vmul.f32 %v1937_v39, %v3402_v35 }
 0x5e2   : > { %1414 = vst [vmem:[#allocation2 + $0x300] sm:$0xf] %v1406_v16 }
 0x5e3   : > { %2143 = vrot.lane.b32.xlu0 %v3372_v15, %s3205_s26  ;;  %v1443_v60 = vpop.permute.xlu1 %1442  ;;  %v2070_v15 = vmul.f32 %v2062_v23, %v3408_v37  ;;  %s2586_s26 = sshll.u32 %s201_s30, 4  ;;  %s4411_s26 = int_to_ptr.vmem [resolvable:$true] %s2586_s26 }
 0x5e4   : > { %v1404_v31 = vpop.permute.xlu0 %1403  ;;  %v2466_v32 = vld [vmem:[#allocation2 + $0x2f8] sm:$0xff] }
 0x5e5   : > { %v1408_v55 = vsel %vm1243_vm2, %v1404_v31, %v1400_v6  ;;  %2497 = vmatpush1.msra.mxu1 %v2466_v32  ;;  %2040 = vrot.lane.b32.xlu1 %v2028_v49, %s4558_s8  ;;  %v2322_v57 = vld [vmem:[#allocation2 + $0x70] sm:$0xff]  ;;  %v2080_v33 = vrot.slane %v2070_v15, 4  ;;  %v1983_v32 = vmul.f32 0.0, %v2981_v4 }
 0x5e6   : > { %1416 = vst [vmem:[#allocation2 + $0x1b8] sm:$0xf] %v1408_v55  ;;  %2363 = vmatpush1.msra.mxu0 %v2322_v57 }
 0x5e7   : > { %2038 = vrot.lane.b32.xlu0 %v2027_v17, %s4558_s8  ;;  %v1449_v14 = vpop.permute.xlu1 %1448  ;;  %v1945_v17 = vmul.f32 %v1937_v39, %v3408_v37  ;;  %v1993_v45 = vrot.slane %v1983_v32, 4 }
 0x5e8   : > { %v1445_v50 = vpop.permute.xlu0 %1444 }
 0x5e9   : > { %v1451_v56 = vsel %vm1196_vm3, %v1443_v60, %v1445_v50  ;;  %v1453_v59 = vsel %vm1196_vm3, %v1449_v14, %v1445_v50  ;;  %2083 = vrot.lane.b32.xlu1 %v2077_v44, %s4559_s23  ;;  %v1995_v44 = vrot.slane %v1985_v30, 4 }
 0x5ea   : > { %1459 = vst [vmem:[#allocation2 + $0x300] sm:$0xf0] %v1451_v56  ;;  %1461 = vst [vmem:[#allocation2 + $0x1b8] sm:$0xf0] %v1453_v59 }
 0x5eb   : > { %2044 = vrot.lane.b32.xlu0 %v2030_v0, %s4558_s8  ;;  %v1402_v24 = vpop.permute.xlu1 %1401 }
 0x5ec   : > { %v1407_v5 = vsel %vm1243_vm2, %v1402_v24, %v1404_v31  ;;  %v1396_v3 = vpop.permute.xlu0 %1395  ;;  %v1944_v24 = vmul.f32 %v4143_v22, %v3369_v11 }
 0x5ed   : > { %1415 = vst [vmem:[#allocation2 + $0x290] sm:$0xf] %v1407_v5  ;;  %v1405_v47 = vsel %vm1243_vm2, %v1396_v3, %v1398_v12  ;;  %2089 = vrot.lane.b32.xlu1 %v2080_v33, %s4559_s23  ;;  %v1984_v33 = vmul.f32 %v4133_v52, %v3369_v11  ;;  %v2991_v5 = vunpack.i.h.bf16 %v4002_v29  ;;  %v4173_v3 = vunpack.i.l.bf16 %v4002_v29 }
 0x5ee   : > { %1413 = vst [vmem:[#allocation2 + $0x108] sm:$0xf] %v1405_v47  ;;  %vm4579_vm2 = vcmask 629760  }
 0x5ef   : > { %2085 = vrot.lane.b32.xlu0 %v2078_v46, %s4559_s23  ;;  %v1447_v58 = vpop.permute.xlu1 %1446  ;;  %v1892_v29 = vsel %vm735_vm5, %v4173_v3, %v2991_v5  ;;  %vm4580_vm4 = vmmov %vm4579_vm2 }
 0x5f0   : > { %v1452_v61 = vsel %vm1196_vm3, %v1447_v58, %v1449_v14  ;;  %v1441_v48 = vpop.permute.xlu0 %1440  ;;  %v1897_v52 = vmul.f32 %v1892_v29, %v3402_v35  ;;  %v1900_v28 = vmul.f32 %v1892_v29, %v3408_v37 }
 0x5f1   : > { %1460 = vst [vmem:[#allocation2 + $0x290] sm:$0xf0] %v1452_v61  ;;  %v1450_v53 = vsel %vm1196_vm3, %v1441_v48, %v1443_v60  ;;  %2042 = vrot.lane.b32.xlu1 %v2029_v43, %s4558_s8  ;;  %v2321_v7 = vld [vmem:[#allocation2 + $0x300] sm:$0xff]  ;;  %v2465_v9 = vld [vmem:[#allocation2 + $0x1b8] sm:$0xff]  ;;  %v1992_v60 = vrot.slane %v1982_v62, 4  ;;  %v1941_v43 = vmul.f32 %v4143_v22, %v3367_v10  ;;  %v1994_v61 = vrot.slane %v1984_v33, 4 }
 0x5f2   : > { %1458 = vst [vmem:[#allocation2 + $0x108] sm:$0xf0] %v1450_v53  ;;  %2364 = vmatprep.subr.mxu0 %v2321_v7  ;;  %2498 = vmatprep.subr.mxu1 %v2465_v9  ;;  %v1991_v7 = vrot.slane %v1981_v54, 4  ;;  %vm4567_vm3 = vcmask 105472  }
 0x5f3   : > { %2036 = vrot.lane.b32.xlu0 %v2026_v63, %s4558_s8  ;;  %v1360_v8 = vpop.permute.xlu1 %1359  ;;  %vm4568_vm5 = vmmov %vm4567_vm3  ;;  %s2706_s8 = sshll.u32 %s3251_s16, 9  ;;  %s3084_s16 = scalar_lea.vmem %s4411_s26, 512 }
 0x5f4   : > { %v1358_v42 = vpop.permute.xlu0 %1357  ;;  %vm4572_vm10 = vmmov %vm4567_vm3  ;;  %p3085_p12 = scmp.ne.s32.totalorder %s4411_s26, %s3084_s16 }
 0x5f5   : > { %v1366_v19 = vsel %vm1285_vm1, %v1358_v42, %v1360_v8  ;;  %2087 = vrot.lane.b32.xlu1 %v2079_v18, %s4559_s23  ;;  %v1907_v18 = vrot.slane %v1897_v52, 4  ;;  %vm4573_vm11 = vmmov %vm4567_vm3 }
 0x5f6   : > { %1374 = vst [vmem:[#allocation2 + $0x30] sm:$0xf0] %v1366_v19  ;;  %v1898_v19 = vmul.f32 0.0, %v2991_v5  ;;  %p3086_p7 = pnand %p3085_p12, %p4647_p1 }
 0x5f7   : > { %2081 = vrot.lane.b32.xlu0 %v2076_v25, %s4559_s23  ;;  %v1356_v2 = vpop.permute.xlu1 %1355 }
 0x5f8   : > { %v1365_v40 = vsel %vm1285_vm1, %v1356_v2, %v1358_v42  ;;  %v1364_v6 = vpop.permute.xlu0 %1363  ;;  %v2464_v23 = vld [vmem:[#allocation2 + $0x290] sm:$0xff]  ;;  %v1910_v2 = vrot.slane %v1900_v28, 4  ;;  %p3087_p8 = pneg %p3086_p7 }
 0x5f9   : > { %1373 = vst [vmem:[#allocation2 + $0x1c0] sm:$0xf0] %v1365_v40  ;;  %v1368_v12 = vsel %vm1285_vm1, %v1364_v6, %v1360_v8  ;;  %2499 = vmatpush1.msra.mxu1 %v2464_v23  ;;  %1955 = vrot.lane.b32.xlu1 %v1943_v51, %s4560_s20  ;;  %v2320_v16 = vld [vmem:[#allocation2 + $0x108] sm:$0xff]  ;;  %v1908_v40 = vrot.slane %v1898_v19, 4 }
 0x5fa   : > { %1376 = vst [vmem:[#allocation2 + $0x58] sm:$0xf0] %v1368_v12  ;;  %2365 = vmatpush1.msra.mxu0 %v2320_v16  ;;  %v1899_v16 = vmul.f32 %v4173_v3, %v3369_v11 }
 0x5fb   : > { %1953 = vrot.lane.b32.xlu0 %v1942_v26, %s4560_s20  ;;  %v1261_v49 = vpop.permute.xlu1 %1260  ;;  %v3001_v26 = vunpack.i.h.bf16 %v4013_v21 }
 0x5fc   : > { %v1362_v31 = vpop.permute.xlu0 %1361 }
 0x5fd   : > { %v1367_v55 = vsel %vm1285_vm1, %v1362_v31, %v1364_v6  ;;  %1998 = vrot.lane.b32.xlu1 %v1992_v60, %s4561_s17  ;;  %v2319_v57 = vld [vmem:[#allocation2 + $0x30] sm:$0xff]  ;;  %vm4565_vm1 = vmmov %vm4563_vm0 }
 0x5fe   : > { %1375 = vst [vmem:[#allocation2 + $0x18] sm:$0xf0] %v1367_v55  ;;  %2366 = vmatprep.subr.mxu0 %v2319_v57  ;;  %v1896_v55 = vmul.f32 %v4173_v3, %v3367_v10  ;;  %v3011_v57 = vunpack.i.h.bf16 %v4023_v34 }
 0x5ff   : > { %1959 = vrot.lane.b32.xlu0 %v1945_v17, %s4560_s20  ;;  %v1265_v14 = vpop.permute.xlu1 %1264  ;;  %v3010_v17 = vunpack.i.l.bf16 %v4023_v34 }
 0x600   : > { %v1263_v15 = vpop.permute.xlu0 %1262  ;;  %v2318_v50 = vld [vmem:[#allocation2 + $0x1c0] sm:$0xff]  ;;  %v1790_v34 = vmul.f32 0.0, %v3011_v57 }
 0x601   : > { %v1270_v56 = vsel %vm1268_vm14, %v1261_v49, %v1263_v15  ;;  %2367 = vmatpush1.msra.mxu0 %v2318_v50  ;;  %2004 = vrot.lane.b32.xlu1 %v1995_v44, %s4561_s17  ;;  %v2463_v59 = vld [vmem:[#allocation2 + $0x58] sm:$0xff] }
 0x602   : > { %1278 = vst [vmem:[#allocation2 + $0x218] sm:$0xf] %v1270_v56  ;;  %2500 = vmatprep.subr.mxu1 %v2463_v59  ;;  %v1784_v56 = vsel %vm4571_vm9, %v3010_v17, %v3011_v57 }
 0x603   : > { %2000 = vrot.lane.b32.xlu0 %v1993_v45, %s4561_s17  ;;  %v1308_v0 = vpop.permute.xlu1 %1307  ;;  %v1906_v45 = vrot.slane %v1896_v55, 4  ;;  %v2455_v55 = vld [vmem:[#allocation2 + $0x270] sm:$0xff] }
 0x604   : > { %v1267_v46 = vpop.permute.xlu0 %1266 }
 0x605   : > { %v1272_v47 = vsel %vm1268_vm14, %v1265_v14, %v1267_v46  ;;  %1957 = vrot.lane.b32.xlu1 %v1944_v24, %s4560_s20  ;;  %v2462_v58 = vld [vmem:[#allocation2 + $0x18] sm:$0xff]  ;;  %v1789_v46 = vmul.f32 %v1784_v56, %v3402_v35 }
 0x606   : > { %1280 = vst [vmem:[#allocation2 + $0x150] sm:$0xf] %v1272_v47  ;;  %2501 = vmatpush1.msra.mxu1 %v2462_v58 }
 0x607   : > { %1951 = vrot.lane.b32.xlu0 %v1941_v43, %s4560_s20  ;;  %v1312_v4 = vpop.permute.xlu1 %1311 }
 0x608   : > { %v1310_v48 = vpop.permute.xlu0 %1309 }
 0x609   : > { %v1317_v53 = vsel %vm4562_vm15, %v1308_v0, %v1310_v48  ;;  %2002 = vrot.lane.b32.xlu1 %v1994_v61, %s4561_s17  ;;  %v1792_v48 = vmul.f32 %v1784_v56, %v3408_v37  ;;  %vm4581_vm15 = vmmov %vm4579_vm2  ;;  %v2453_v56 = vld [vmem:[#allocation2 + $0x240] sm:$0xff] }
 0x60a   : > { %1325 = vst [vmem:[#allocation2 + $0x218] sm:$0xf0] %v1317_v53 }
 0x60b   : > { %1996 = vrot.lane.b32.xlu0 %v1991_v7, %s4561_s17  ;;  %v1259_v9 = vpop.permute.xlu1 %1258  ;;  %s4416_s17 = scalar_lea.hbm %s4463_s3, %s2706_s8 }
 0x60c   : > { %v1269_v63 = vsel %vm1268_vm14, %v1259_v9, %v1261_v49  ;;  %v1271_v13 = vsel %vm1268_vm14, %v1259_v9, %v1265_v14  ;;  %v1314_v38 = vpop.permute.xlu0 %1313  ;;  %vm4564_vm14 = vmmov %vm4563_vm0  ;;  %v4208_v49 = vunpack.i.l.bf16 %v4013_v21  ;;  %v1909_v14 = vrot.slane %v1899_v16, 4  ;;  %v2457_v16 = vld [vmem:[#allocation2 + $0x1d0] sm:$0xff] }
 0x60d   : > { %1277 = vst [vmem:[#allocation2 + $0x2d8] sm:$0xf] %v1269_v63  ;;  %1279 = vst [vmem:[#allocation2 + $0x8] sm:$0xf] %v1271_v13  ;;  %v1319_v22 = vsel %vm4563_vm0, %v1312_v4, %v1314_v38  ;;  %1869 = vrot.lane.b32.xlu1 %v3158_v1, %s3206_s28 }
 0x60e   : > { %1327 = vst [vmem:[#allocation2 + $0x150] sm:$0xf0] %v1319_v22  ;;  %v1824_v44 = vsel %vm4569_vm7, %v4208_v49, %v3001_v26  ;;  %v1831_v28 = vmul.f32 %v4208_v49, %v3369_v11  ;;  %vm4582_vm0 = vmmov %vm4579_vm2  ;;  %vm4588_vm7 = vcmask 637952  }
 0x60f   : > { %1867 = vrot.lane.b32.xlu0 %v3402_v35, %s3206_s28  ;;  %v1172_v8 = vpop.permute.xlu1 %1171  ;;  %v1832_v43 = vmul.f32 %v1824_v44, %v3408_v37 }
 0x610   : > { %v1306_v42 = vpop.permute.xlu0 %1305 }
 0x611   : > { %v1316_v25 = vsel %vm4564_vm14, %v1306_v42, %v1308_v0  ;;  %v1318_v39 = vsel %vm4565_vm1, %v1306_v42, %v1312_v4  ;;  %1913 = vrot.lane.b32.xlu1 %v1907_v18, %s4566_s19  ;;  %v2317_v51 = vld [vmem:[#allocation2 + $0x218] sm:$0xff]  ;;  %v1829_v0 = vmul.f32 %v1824_v44, %v3402_v35  ;;  %v1830_v4 = vmul.f32 0.0, %v3001_v26  ;;  %v2454_v44 = vld [vmem:[#allocation2 + $0xe0] sm:$0xff] }
 0x612   : > { %1324 = vst [vmem:[#allocation2 + $0x2d8] sm:$0xf0] %v1316_v25  ;;  %1326 = vst [vmem:[#allocation2 + $0x8] sm:$0xf0] %v1318_v39  ;;  %2368 = vmatprep.subr.mxu0 %v2317_v51  ;;  %v1842_v9 = vrot.slane %v1832_v43, 4  ;;  %v1791_v18 = vmul.f32 %v3010_v17, %v3369_v11  ;;  %v1788_v39 = vmul.f32 %v3010_v17, %v3367_v10  ;;  %vm4583_vm14 = vcmask 646144  }
 0x613   : > { %1873 = vrot.lane.b32.xlu0 %v3408_v37, %s3206_s28  ;;  %v1176_v1 = vpop.permute.xlu1 %1175  ;;  %v1839_v58 = vrot.slane %v1829_v0, 4  ;;  %v1840_v63 = vrot.slane %v1830_v4, 4  ;;  %vm4584_vm1 = vcmask 236544   ;;  %v2450_v43 = vld [vmem:[#allocation2 + $0xe8] sm:$0xff] }
 0x614   : > { %v1174_v62 = vpop.permute.xlu0 %1173 }
 0x615   : > { %v1181_v6 = vsel %vm4567_vm3, %v1172_v8, %v1174_v62  ;;  %1919 = vrot.lane.b32.xlu1 %v1910_v2, %s4566_s19  ;;  %v2461_v23 = vld [vmem:[#allocation2 + $0x150] sm:$0xff]  ;;  %v1828_v2 = vmul.f32 %v4208_v49, %v3367_v10  ;;  %v3006_v62 = vunpack.i.h.bf16 %v4010_v20  ;;  %v2312_v49 = vld [vmem:[#allocation2 + $0x1d8] sm:$0xff]  ;;  %vm4585_vm3 = vcmask 154624  }
 0x616   : > { %1189 = vst [vmem:[#allocation2 + $0x2a0] sm:$0xf] %v1181_v6  ;;  %2502 = vmatprep.subr.mxu1 %v2461_v23  ;;  %v2313_v6 = vld [vmem:[#allocation2 + $0xd0] sm:$0xff]  ;;  %v3021_v23 = vunpack.i.h.bf16 %v4032_v41 }
 0x617   : > { %1915 = vrot.lane.b32.xlu0 %v1908_v40, %s4566_s19  ;;  %v1219_v12 = vpop.permute.xlu1 %1218  ;;  %v4253_v40 = vunpack.i.l.bf16 %v4010_v20  ;;  %v1838_v57 = vrot.slane %v1828_v2, 4  ;;  %v2300_v20 = vld [vmem:[#allocation2 + $0x160] sm:$0xff]  ;;  %v2444_v2 = vld [vmem:[#allocation2 + $0x318] sm:$0xff] }
 0x618   : > { %v1178_v60 = vpop.permute.xlu0 %1177 }
 0x619   : > { %v1183_v30 = vsel %vm4568_vm5, %v1176_v1, %v1178_v60  ;;  %1871 = vrot.lane.b32.xlu1 %v3369_v11, %s3206_s28  ;;  %v2316_v31 = vld [vmem:[#allocation2 + $0x2d8] sm:$0xff]  ;;  %v2460_v32 = vld [vmem:[#allocation2 + $0x8] sm:$0xff]  ;;  %v1841_v60 = vrot.slane %v1831_v28, 4  ;;  %v1739_v17 = vsel %vm4584_vm1, %v4253_v40, %v3006_v62  ;;  %vm4586_vm5 = vmmov %vm4583_vm14 }
 0x61a   : > { %1191 = vst [vmem:[#allocation2 + $0xf0] sm:$0xf] %v1183_v30  ;;  %2369 = vmatpush1.msra.mxu0 %v2316_v31  ;;  %2503 = vmatpush1.msra.mxu1 %v2460_v32  ;;  %v2456_v31 = vld [vmem:[#allocation2 + $0x110] sm:$0xff]  ;;  %vm4591_vm9 = vmmov %vm4586_vm5 }
 0x61b   : > { %1865 = vrot.lane.b32.xlu0 %v3367_v10, %s3206_s28  ;;  %v1223_v21 = vpop.permute.xlu1 %1222  ;;  %s2573_s28 = scalar_lea.sflag [#allocation5], %s3350_s27 }
 0x61c   : > { %v1221_v15 = vpop.permute.xlu0 %1220 }
 0x61d   : > { %v1228_v50 = vsel %vm4570_vm8, %v1219_v12, %v1221_v15  ;;  %1917 = vrot.lane.b32.xlu1 %v1909_v14, %s4566_s19  ;;  %v2309_v15 = vld [vmem:[#allocation2 + $0x2b0] sm:$0xff]  ;;  %vm4589_vm8 = vmmov %vm4588_vm7 }
 0x61e   : > { %1236 = vst [vmem:[#allocation2 + $0x2a0] sm:$0xf0] %v1228_v50 }
 0x61f   : > { %1911 = vrot.lane.b32.xlu0 %v1906_v45, %s4566_s19  ;;  %v1170_v59 = vpop.permute.xlu1 %1169  ;;  %v1705_v45 = vmul.f32 0.0, %v3021_v23  ;;  %s3208_s19 = smov [#allocation8]  }
 0x620   : > { %v1180_v24 = vsel %vm4572_vm10, %v1170_v59, %v1172_v8  ;;  %v1182_v33 = vsel %vm4573_vm11, %v1170_v59, %v1176_v1  ;;  %v1225_v5 = vpop.permute.xlu0 %1224  ;;  %v2308_v59 = vld [vmem:[#allocation2 + $0x2c0] sm:$0xff]  ;;  %vm4592_vm10 = vmmov %vm4586_vm5 }
 0x621   : > { %1188 = vst [vmem:[#allocation2 + $0xd8] sm:$0xf] %v1180_v24  ;;  %1190 = vst [vmem:[#allocation2 + $0x138] sm:$0xf] %v1182_v33  ;;  %v1230_v3 = vsel %vm4574_vm12, %v1223_v21, %v1225_v5  ;;  %1802 = vrot.lane.b32.xlu1 %v1790_v34, %s4575_s9  ;;  %v2452_v24 = vld [vmem:[#allocation2 + $0xa8] sm:$0xff]  ;;  %v1744_v33 = vmul.f32 %v1739_v17, %v3402_v35  ;;  %v2307_v5 = vld [vmem:[#allocation2 + $0x210] sm:$0xff] }
 0x622   : > { %1238 = vst [vmem:[#allocation2 + $0xf0] sm:$0xf0] %v1230_v3  ;;  %v2451_v3 = vld [vmem:[#allocation2 + $0x2a8] sm:$0xff]  ;;  %vm4593_vm11 = vmmov %vm4588_vm7 }
 0x623   : > { %1800 = vrot.lane.b32.xlu0 %v1789_v46, %s4575_s9  ;;  %v2272_v47 = vpop.permute.xlu1 %2271  ;;  %vm4594_vm12 = vmmov %vm4588_vm7 }
 0x624   : > { %v1217_v54 = vpop.permute.xlu0 %1216 }
 0x625   : > { %v1227_v61 = vsel %vm4576_vm13, %v1217_v54, %v1219_v12  ;;  %v1229_v29 = vsel %vm4577_vm6, %v1217_v54, %v1223_v21  ;;  %1845 = vrot.lane.b32.xlu1 %v1839_v58, %s4578_s29  ;;  %v2315_v53 = vld [vmem:[#allocation2 + $0x2a0] sm:$0xff]  ;;  %v4257_v12 = vunpack.i.l.bf16 %v4032_v41  ;;  %v2311_v41 = vld [vmem:[#allocation2 + $0x308] sm:$0xff]  ;;  %vm2353_vm13 = vcmask 1043456  }
 0x626   : > { %1235 = vst [vmem:[#allocation2 + $0xd8] sm:$0xf0] %v1227_v61  ;;  %1237 = vst [vmem:[#allocation2 + $0x138] sm:$0xf0] %v1229_v29  ;;  %2370 = vmatprep.subr.mxu0 %v2315_v53  ;;  %v2310_v21 = vld [vmem:[#allocation2 + $0x1e0] sm:$0xff]  ;;  %v2304_v53 = vld [vmem:[#allocation2 + $0x130] sm:$0xff] }
 0x627   : > { %1806 = vrot.lane.b32.xlu0 %v1792_v48, %s4575_s9  ;;  %v2278_v7 = vpop.permute.xlu1 %2277  ;;  %v1699_v14 = vsel %vm4585_vm3, %v4257_v12, %v3021_v23  ;;  %v2305_v54 = vld [vmem:[#allocation2 + $0x80] sm:$0xff]  ;;  %vm4595_vm6 = vcmask 662528   ;;  %vm4603_vm3 = vcmask 678912  }
 0x628   : > { %v2274_v52 = vpop.permute.xlu0 %2273  ;;  %v1704_v46 = vmul.f32 %v1699_v14, %v3402_v35  ;;  %v2449_v61 = vld [vmem:[#allocation2 + $0x120] sm:$0xff] }
 0x629   : > { %v2280_v13 = vsel %vm4579_vm2, %v2272_v47, %v2274_v52  ;;  %v2282_v38 = vsel %vm4580_vm4, %v2278_v7, %v2274_v52  ;;  %1851 = vrot.lane.b32.xlu1 %v1842_v9, %s4578_s29  ;;  %v2459_v22 = vld [vmem:[#allocation2 + $0xf0] sm:$0xff]  ;;  %v2448_v9 = vld [vmem:[#allocation2 + $0x40] sm:$0xff]  ;;  %v1747_v52 = vmul.f32 %v1739_v17, %v3408_v37  ;;  %vm4596_vm2 = vcmask 146432   ;;  %vm4597_vm4 = vmmov %vm4595_vm6 }
 0x62a   : > { %2288 = vst [vmem:[#allocation2 + $0x268] sm:$0xf] %v2280_v13  ;;  %2290 = vst [vmem:[#allocation2 + $0x118] sm:$0xf] %v2282_v38  ;;  %2504 = vmatprep.subr.mxu1 %v2459_v22  ;;  %v2447_v13 = vld [vmem:[#allocation2 + $0x168] sm:$0xff]  ;;  %v1707_v38 = vmul.f32 %v1699_v14, %v3408_v37  ;;  %v2299_v23 = vld [vmem:[#allocation2 + $0x220] sm:$0xff]  ;;  %v1746_v14 = vmul.f32 %v4253_v40, %v3369_v11 }
 0x62b   : > { %1847 = vrot.lane.b32.xlu0 %v1840_v63, %s4578_s29  ;;  %v2276_v8 = vpop.permute.xlu1 %2275  ;;  %v2303_v63 = vld [vmem:[#allocation2 + $0x250] sm:$0xff]  ;;  %vm4602_vm1 = vmmov %vm4597_vm4 }
 0x62c   : > { %v2281_v42 = vsel %vm4581_vm15, %v2276_v8, %v2278_v7  ;;  %v2270_v19 = vpop.permute.xlu0 %2269  ;;  %v1754_v7 = vrot.slane %v1744_v33, 4  ;;  %v1745_v8 = vmul.f32 0.0, %v3006_v62  ;;  %v3026_v33 = vunpack.i.h.bf16 %v4029_v36 }
 0x62d   : > { %2289 = vst [vmem:[#allocation2 + $0x248] sm:$0xf] %v2281_v42  ;;  %v2279_v25 = vsel %vm4582_vm0, %v2270_v19, %v2272_v47  ;;  %1804 = vrot.lane.b32.xlu1 %v1791_v18, %s4575_s9  ;;  %v2314_v51 = vld [vmem:[#allocation2 + $0xd8] sm:$0xff]  ;;  %v2306_v47 = vld [vmem:[#allocation2 + $0x60] sm:$0xff]  ;;  %v2301_v19 = vld [vmem:[#allocation2 + $0x310] sm:$0xff]  ;;  %vm4598_vm15 = vcmask 138240  }
 0x62e   : > { %v2458_v1 = vld [vmem:[#allocation2 + $0x138] sm:$0xff]  ;;  %2287 = vst [vmem:[#allocation2 + $0x2f0] sm:$0xf] %v2279_v25  ;;  %2371 = vmatpush1.msra.mxu0 %v2314_v51  ;;  %v2302_v18 = vld [vmem:[#allocation2 + $0xc0] sm:$0xff]  ;;  %vm2153_vm0 = vcmask 654336  }
 0x62f   : > { %2505 = vmatpush1.msra.mxu1 %v2458_v1  ;;  %1798 = vrot.lane.b32.xlu0 %v1788_v39, %s4575_s9  ;;  %v2189_v26 = vpop.permute.xlu1 %2188  ;;  %v2446_v42 = vld [vmem:[#allocation2 + $0xa0] sm:$0xff]  ;;  %v2445_v39 = vld [vmem:[#allocation2 + $0x2e8] sm:$0xff]  ;;  %v1757_v1 = vrot.slane %v1747_v52, 4  ;;  %s3088_s9 = sshll.u32 %s3208_s19, 4  ;;  %s3089_s9 = int_to_ptr.vmem [resolvable:$false] %s3088_s9 }
 0x630   : > { %2372 = vmatprep.subr.mxu0 %v2313_v6  ;;  %2506 = vmatprep.subr.mxu1 %v2457_v16  ;;  %v4260_v30 = vpop.permute.xlu0 %2186  ;;  %v1755_v6 = vrot.slane %v1745_v8, 4  ;;  %v2443_v16 = vld [vmem:[#allocation2 + $0x20] sm:$0xff]  ;;  %p3091_p9 = scmp.lt.s32.totalorder %s4411_s26, %s3089_s9 }
 0x631   : > { %2373 = vmatpush1.msra.mxu0 %v2312_v49  ;;  %v2195_v32 = vsel %vm4583_vm14, %v4260_v30, %v2189_v26  ;;  %2507 = vmatpush1.msra.mxu1 %v2456_v31  ;;  %v2298_v49 = vld [vmem:[#allocation2 + $0x180] sm:$0xff]  ;;  %vm4600_vm14 = vmmov %vm4597_vm4 }
 0x632   : > { %1849 = vrot.lane.b32.xlu1 %v1841_v60, %s4578_s29  ;;  %2203 = vst [vmem:[#allocation2 + $0x148] sm:$0xf] %v2195_v32  ;;  %2374 = vmatprep.subr.mxu0 %v2311_v41  ;;  %v2297_v31 = vld [vmem:[#allocation2 + $0x200] sm:$0xff]  ;;  %v2441_v41 = vld [vmem:[#allocation2 + $0x1c8] sm:$0xff] }
 0x633   : > { %2508 = vmatprep.subr.mxu1 %v2455_v55  ;;  %1843 = vrot.lane.b32.xlu0 %v1838_v57, %s4578_s29  ;;  %v4272_v50 = vpop.permute.xlu1 %2231  ;;  %v2296_v55 = vld [vmem:[#allocation2 + $0x1a0] sm:$0xff]  ;;  %v1706_v57 = vmul.f32 %v4257_v12, %v3369_v11  ;;  %s3090_s29 = scalar_lea.vmem %s3089_s9, 1024 }
 0x634   : > { %2375 = vmatpush1.msra.mxu0 %v2310_v21  ;;  %2509 = vmatpush1.msra.mxu1 %v2454_v44  ;;  %v2193_v34 = vpop.permute.xlu0 %2192  ;;  %v2440_v21 = vld [vmem:[#allocation2 + $0x208] sm:$0xff]  ;;  %v3016_v44 = vunpack.i.h.bf16 %v4020_v27  ;;  %p3092_p10 = scmp.lt.s32.totalorder %s3090_s29, %s3084_s16 }
 0x635   : > { %2376 = vmatprep.subr.mxu0 %v2309_v15  ;;  %2510 = vmatprep.subr.mxu1 %v2453_v56  ;;  %v2197_v0 = vsel %vm4586_vm5, %v2193_v34, %v2189_v26  ;;  %v4302_v15 = vunpack.i.l.bf16 %v4020_v27  ;;  %v1703_v56 = vmul.f32 %v4257_v12, %v3367_v10  ;;  %v2343_v12 = vld [vmem:[#allocation2 + $0x268] sm:$0xf]  ;;  %vm2349_vm5 = vcmask 556032  }
 0x636   : > { %2377 = vmatpush1.msra.mxu0 %v2308_v59  ;;  %2205 = vst [vmem:[#allocation2 + $0x228] sm:$0xf] %v2197_v0  ;;  %2511 = vmatpush1.msra.mxu1 %v2452_v24  ;;  %v2294_v59 = vld [vmem:[#allocation2 + $0x2e0] sm:$0xff]  ;;  %v1743_v24 = vmul.f32 %v4253_v40, %v3367_v10  ;;  %p3093_p2 = por %p3092_p10, %p3091_p9 }
 0x637   : > { %1717 = vrot.lane.b32.xlu1 %v1705_v45, %s4587_s7  ;;  %2378 = vmatprep.subr.mxu0 %v2307_v5  ;;  %v2238_v58 = vpop.permute.xlu1 %2237  ;;  %v2439_v45 = vld [vmem:[#allocation2 + $0x28] sm:$0xff]  ;;  %v4312_v5 = vunpack.i.l.bf16 %v4029_v36  ;;  %v1654_v40 = vsel %vm4596_vm2, %v4302_v15, %v3016_v44 }
 0x638   : > { %2512 = vmatprep.subr.mxu1 %v2451_v3  ;;  %1715 = vrot.lane.b32.xlu0 %v1704_v46, %s4587_s7  ;;  %v2234_v4 = vpop.permute.xlu0 %2233  ;;  %v2438_v3 = vld [vmem:[#allocation2 + $0x190] sm:$0xff]  ;;  %v2486_v36 = vld [vmem:[#allocation2 + $0x248] sm:$0xf]  ;;  %p3094_p0 = pnand %p3093_p2, %p3087_p8 }
 0x639   : > { %2379 = vmatpush1.msra.mxu0 %v2306_v47  ;;  %2513 = vmatpush1.msra.mxu1 %v2450_v43  ;;  %v2240_v29 = vsel %vm4588_vm7, %v4272_v50, %v2234_v4  ;;  %v2242_v48 = vsel %vm4589_vm8, %v2238_v58, %v2234_v4  ;;  %v2487_v47 = vld [vmem:[#allocation2 + $0x118] sm:$0xf]  ;;  %v1756_v43 = vrot.slane %v1746_v14, 4  ;;  %vm4604_vm7 = vmmov %vm4603_vm3  ;;  %vm4605_vm8 = vcmask 670720  }
 0x63a   : > { %2380 = vmatprep.subr.mxu0 %v2305_v54  ;;  %2514 = vmatprep.subr.mxu1 %v2449_v61  ;;  %2248 = vst [vmem:[#allocation2 + $0x148] sm:$0xf0] %v2240_v29  ;;  %2250 = vst [vmem:[#allocation2 + $0x228] sm:$0xf0] %v2242_v48  ;;  %v1753_v48 = vrot.slane %v1743_v24, 4 }
 0x63b   : > { %2381 = vmatpush1.msra.mxu0 %v2304_v53  ;;  %2515 = vmatpush1.msra.mxu1 %v2448_v9  ;;  %v2191_v22 = vpop.permute.xlu1 %2190  ;;  %v1614_v9 = vsel %vm4598_vm15, %v4312_v5, %v3026_v33 }
 0x63c   : > { %1760 = vrot.lane.b32.xlu1 %v1754_v7, %s4590_s10  ;;  %2382 = vmatprep.subr.mxu0 %v2303_v63  ;;  %v2196_v28 = vsel %vm4591_vm9, %v2191_v22, %v2193_v34  ;;  %v1620_v63 = vmul.f32 0.0, %v3026_v33  ;;  %v1619_v22 = vmul.f32 %v1614_v9, %v3402_v35  ;;  %vm4606_vm9 = vmmov %vm4605_vm8 }
 0x63d   : > { %2516 = vmatprep.subr.mxu1 %v2447_v13  ;;  %1721 = vrot.lane.b32.xlu0 %v1707_v38, %s4587_s7  ;;  %2204 = vst [vmem:[#allocation2 + $0x230] sm:$0xf] %v2196_v28  ;;  %v2185_v25 = vpop.permute.xlu0 %2184  ;;  %v1659_v13 = vmul.f32 %v1654_v40, %v3402_v35  ;;  %v1622_v35 = vmul.f32 %v1614_v9, %v3408_v37 }
 0x63e   : > { %2383 = vmatpush1.msra.mxu0 %v2302_v18  ;;  %2517 = vmatpush1.msra.mxu1 %v2446_v42  ;;  %v2194_v51 = vsel %vm4592_vm10, %v2185_v25, %v4260_v30  ;;  %v2442_v30 = vld [vmem:[#allocation2 + $0x78] sm:$0xff]  ;;  %v1662_v25 = vmul.f32 %v1654_v40, %v3408_v37  ;;  %vm4607_vm10 = vmmov %vm4603_vm3 }
 0x63f   : > { %2384 = vmatprep.subr.mxu0 %v2301_v19  ;;  %2518 = vmatprep.subr.mxu1 %v2445_v39  ;;  %2202 = vst [vmem:[#allocation2 + $0x140] sm:$0xf] %v2194_v51  ;;  %v2236_v62 = vpop.permute.xlu1 %2235  ;;  %v1669_v42 = vrot.slane %v1659_v13, 4  ;;  %v1660_v51 = vmul.f32 0.0, %v3016_v44 }
 0x640   : > { %2385 = vmatpush1.msra.mxu0 %v2300_v20  ;;  %2519 = vmatpush1.msra.mxu1 %v2444_v2  ;;  %v2241_v26 = vsel %vm4593_vm11, %v2236_v62, %v2238_v58  ;;  %v2342_v58 = vld [vmem:[#allocation2 + $0x2f0] sm:$0xf]  ;;  %v1672_v2 = vrot.slane %v1662_v25, 4  ;;  %vm4608_vm11 = vmmov %vm4603_vm3 }
 0x641   : > { %1766 = vrot.lane.b32.xlu1 %v1757_v1, %s4590_s10  ;;  %2386 = vmatprep.subr.mxu0 %v2299_v23  ;;  %2249 = vst [vmem:[#allocation2 + $0x230] sm:$0xf0] %v2241_v26  ;;  %v2230_v60 = vpop.permute.xlu0 %2229  ;;  %v2341_v61 = vld [vmem:[#allocation2 + $0x148] sm:$0xff]  ;;  %v1670_v23 = vrot.slane %v1660_v51, 4 }
 0x642   : > { %2520 = vmatprep.subr.mxu1 %v2443_v16  ;;  %1762 = vrot.lane.b32.xlu0 %v1755_v6, %s4590_s10  ;;  %v2239_v32 = vsel %vm4594_vm12, %v2230_v60, %v4272_v50  ;;  %v2295_v50 = vld [vmem:[#allocation2 + $0x1f0] sm:$0xff]  ;;  %v2485_v29 = vld [vmem:[#allocation2 + $0x228] sm:$0xff]  ;;  %v1661_v60 = vmul.f32 %v4302_v15, %v3369_v11  ;;  %vm4609_vm12 = vmmov %vm4605_vm8 }
 0x643   : > { %2387 = vmatpush1.msra.mxu0 %v2298_v49  ;;  %2521 = vmatpush1.msra.mxu1 %v2442_v30  ;;  %2247 = vst [vmem:[#allocation2 + $0x140] sm:$0xf0] %v2239_v32  ;;  %v2126_v17 = vpop.permute.xlu1 %2125  ;;  %v1621_v49 = vmul.f32 %v4312_v5, %v3369_v11 }
 0x644   : > { %2388 = vmatprep.subr.mxu0 %v2297_v31  ;;  %2522 = vmatprep.subr.mxu1 %v2441_v41  ;;  %v1618_v31 = vmul.f32 %v4312_v5, %v3367_v10  ;;  %v1658_v41 = vmul.f32 %v4302_v15, %v3367_v10  ;;  %v1671_v11 = vrot.slane %v1661_v60, 4 }
 0x645   : > { %2389 = vmatpush1.msra.mxu0 %v2296_v55  ;;  %2523 = vmatpush1.msra.mxu1 %v2440_v21  ;;  %v2124_v34 = vpop.permute.xlu0 %2123  ;;  %v2292_v55 = vld [vmem:[#allocation6 + $0x8] sm:$0xff] }
 0x646   : > { %1719 = vrot.lane.b32.xlu1 %v1706_v57, %s4587_s7  ;;  %2390 = vmatprep.subr.mxu0 %v2295_v50  ;;  %v2132_v0 = vsel %vm4595_vm6, %v2124_v34, %v2126_v17  ;;  %v1668_v14 = vrot.slane %v1658_v41, 4  ;;  %vm4611_vm6 = vcmask 769024  }
 0x647   : > { %2524 = vmatprep.subr.mxu1 %v2439_v45  ;;  %1713 = vrot.lane.b32.xlu0 %v1703_v56, %s4587_s7  ;;  %2140 = vst [vmem:[#allocation2 + $0x1f8] sm:$0xf] %v2132_v0  ;;  %v2146_v46 = vpop.permute.xlu1 %2145  ;;  %v3207_v45 = vmov 0   ;;  %v2293_v56 = vld [vmem:[%s4462_s2] sm:$0xff]  ;;  %vm4612_vm2 = vmmov %vm4611_vm6 }
 0x648   : > { %2391 = vmatpush1.msra.mxu0 %v2294_v59  ;;  %2525 = vmatpush1.msra.mxu1 %v2438_v3  ;;  %v2484_v4 = vld [vmem:[#allocation2 + $0x230] sm:$0xff] }
 0x649   : > { %2692 = vmatprep.subr.msk.mxu0 %vm2353_vm13, %v2343_v12  ;;  %2695 = vmatprep.subr.msk.mxu1 %vm2353_vm13, %v2487_v47  ;;  %v2130_v54 = vpop.permute.xlu0 %2129 }
 0x64a   : > { %2693 = vmatpush2.msk.msra.mxu0 %vm2353_vm13, %v2342_v58  ;;  %2696 = vmatpush2.msk.msra.mxu1 %vm2353_vm13, %v2486_v36  ;;  %v2134_v53 = vsel %vm4597_vm4, %v2130_v54, %v2126_v17  ;;  %v2340_v7 = vld [vmem:[#allocation2 + $0x140] sm:$0xff]  ;;  %vm4610_vm13 = vmmov %vm4605_vm8  ;;  %vm4613_vm4 = vcmask 760832  }
 0x64b   : > { %1764 = vrot.lane.b32.xlu1 %v1756_v43, %s4590_s10  ;;  %2408 = vmatprep.subr.mxu0 %v2341_v61  ;;  %2142 = vst [vmem:[#allocation2 + $0x188] sm:$0xf] %v2134_v53  ;;  %v2152_v52 = vpop.permute.xlu1 %2151  ;;  %vm4614_vm15 = vmmov %vm4613_vm4 }
 0x64c   : > { %2542 = vmatprep.subr.mxu1 %v2485_v29  ;;  %1758 = vrot.lane.b32.xlu0 %v1753_v48, %s4590_s10 }
 0x64d   : > { %2543 = vmatpush2.msra.mxu1 %v2484_v4  ;;  %2409 = vmatpush2.msra.mxu0 %v2340_v7  ;;  %v2148_v38 = vpop.permute.xlu0 %2147 }
 0x64e   : > { %v2155_v8 = vsel %vm2153_vm0, %v2146_v46, %v2148_v38  ;;  %v2157_v18 = vsel %vm2153_vm0, %v2152_v52, %v2148_v38  ;;  %2697 = vmatprep.mubr.msk.f32.mxu1 %vm2349_vm5, %v2292_v55  ;;  %2694 = vmatprep.mubr.msk.f32.mxu0 %vm2349_vm5, %v2292_v55  ;;  %vm1875_vm5 = vcmask 785408  }
 0x64f   : > { %1632 = vrot.lane.b32.xlu1 %v1620_v63, %s4599_s5  ;;  %2163 = vst [vmem:[#allocation2 + $0x1f8] sm:$0xf0] %v2155_v8  ;;  %2165 = vst [vmem:[#allocation2 + $0x188] sm:$0xf0] %v2157_v18  ;;  %v2128_v28 = vpop.permute.xlu1 %2127  ;;  %3027 = vset.pattern.permute.xlu0 %v3207_v45 }
 0x650   : > { %1630 = vrot.lane.b32.xlu0 %v1619_v22, %s4599_s5  ;;  %v2133_v19 = vsel %vm4600_vm14, %v2128_v28, %v2130_v54 }
 0x651   : > { %2141 = vst [vmem:[#allocation2 + $0x288] sm:$0xf] %v2133_v19  ;;  %v2122_v39 = vpop.permute.xlu0 %2121 }
 0x652   : > { %v2131_v20 = vsel %vm4602_vm1, %v2122_v39, %v2124_v34  ;;  %vm4617_vm1 = vmmov %vm4613_vm4 }
 0x653   : > { %1675 = vrot.lane.b32.xlu1 %v1669_v42, %s4601_s4  ;;  %2139 = vst [vmem:[#allocation2 + $0x198] sm:$0xf] %v2131_v20  ;;  %v2150_v1 = vpop.permute.xlu1 %2149 }
 0x654   : > { %1636 = vrot.lane.b32.xlu0 %v1622_v35, %s4599_s5  ;;  %v2156_v62 = vsel %vm2153_vm0, %v2150_v1, %v2152_v52 }
 0x655   : > { %2164 = vst [vmem:[#allocation2 + $0x288] sm:$0xf0] %v2156_v62  ;;  %v2144_v6 = vpop.permute.xlu0 %2143 }
 0x656   : > { %v2154_v27 = vsel %vm2153_vm0, %v2144_v6, %v2146_v46  ;;  %v2339_v16 = vld [vmem:[#allocation2 + $0x1f8] sm:$0xff]  ;;  %v2483_v26 = vld [vmem:[#allocation2 + $0x188] sm:$0xff]  ;;  %vm4615_vm0 = vmmov %vm4612_vm2 }
 0x657   : > { %1681 = vrot.lane.b32.xlu1 %v1672_v2, %s4601_s4  ;;  %2162 = vst [vmem:[#allocation2 + $0x198] sm:$0xf0] %v2154_v27  ;;  %2410 = vmatprep.subr.mxu0 %v2339_v16  ;;  %v2041_v37 = vpop.permute.xlu1 %2040  ;;  %vm4616_vm14 = vmmov %vm4615_vm0 }
 0x658   : > { %2544 = vmatprep.subr.mxu1 %v2483_v26  ;;  %1677 = vrot.lane.b32.xlu0 %v1670_v23, %s4601_s4 }
 0x659   : > { %v2039_v30 = vpop.permute.xlu0 %2038 }
 0x65a   : > { %v2047_v32 = vsel %vm4603_vm3, %v2039_v30, %v2041_v37  ;;  %vm4618_vm3 = vmmov %vm4617_vm1 }
 0x65b   : > { %1634 = vrot.lane.b32.xlu1 %v1621_v49, %s4599_s5  ;;  %2055 = vst [vmem:[#allocation2 + $0x48] sm:$0xf] %v2047_v32  ;;  %v2084_v57 = vpop.permute.xlu1 %2083 }
 0x65c   : > { %1628 = vrot.lane.b32.xlu0 %v1618_v31, %s4599_s5  ;;  %v2482_v17 = vld [vmem:[#allocation2 + $0x288] sm:$0xff] }
 0x65d   : > { %v2045_v21 = vpop.permute.xlu0 %2044  ;;  %2545 = vmatpush2.msra.mxu1 %v2482_v17 }
 0x65e   : > { %v2049_v44 = vsel %vm4604_vm7, %v2045_v21, %v2041_v37  ;;  %v2338_v50 = vld [vmem:[#allocation2 + $0x198] sm:$0xff]  ;;  %vm4619_vm7 = vcmask 777216  }
 0x65f   : > { %1679 = vrot.lane.b32.xlu1 %v1671_v11, %s4601_s4  ;;  %2057 = vst [vmem:[#allocation2 + $0x10] sm:$0xf] %v2049_v44  ;;  %2411 = vmatpush2.msra.mxu0 %v2338_v50  ;;  %v2090_v10 = vpop.permute.xlu1 %2089 }
 0x660   : > { %1673 = vrot.lane.b32.xlu0 %v1668_v14, %s4601_s4 }
 0x661   : > { %v2086_v15 = vpop.permute.xlu0 %2085 }
 0x662   : > { %v2092_v34 = vsel %vm4605_vm8, %v2084_v57, %v2086_v15  ;;  %v2094_v59 = vsel %vm4606_vm9, %v2090_v10, %v2086_v15  ;;  %vm4620_vm8 = vmmov %vm4619_vm7 }
 0x663   : > { %2100 = vst [vmem:[#allocation2 + $0x48] sm:$0xf0] %v2092_v34  ;;  %2102 = vst [vmem:[#allocation2 + $0x10] sm:$0xf0] %v2094_v59  ;;  %v2043_v0 = vpop.permute.xlu1 %2042 }
 0x664   : > { %v2048_v24 = vsel %vm4607_vm10, %v2043_v0, %v2045_v21  ;;  %2346 = vperm.xlu0 %3027, %v2293_v56   ;;  %vm4621_vm9 = vmmov %vm4619_vm7 }
 0x665   : > { %2056 = vst [vmem:[#allocation2 + $0xc8] sm:$0xf] %v2048_v24  ;;  %v2037_v33 = vpop.permute.xlu0 %2036  ;;  %vm4622_vm10 = vmmov %vm4619_vm7 }
 0x666   : > { %v2046_v5 = vsel %vm4608_vm11, %v2037_v33, %v2039_v30  ;;  %vm4623_vm11 = vcmask 801792  }
 0x667   : > { %2054 = vst [vmem:[#allocation2 + $0x1e8] sm:$0xf] %v2046_v5  ;;  %v2088_v3 = vpop.permute.xlu1 %2087 }
 0x668   : > { %v2093_v12 = vsel %vm4609_vm12, %v2088_v3, %v2090_v10  ;;  %vm4624_vm12 = vmmov %vm4623_vm11 }
 0x669   : > { %2101 = vst [vmem:[#allocation2 + $0xc8] sm:$0xf0] %v2093_v12  ;;  %v2082_v46 = vpop.permute.xlu0 %2081 }
 0x66a   : > { %v2091_v47 = vsel %vm4610_vm13, %v2082_v46, %v2084_v57  ;;  %v2337_v58 = vld [vmem:[#allocation2 + $0x48] sm:$0xff]  ;;  %v2481_v43 = vld [vmem:[#allocation2 + $0x10] sm:$0xff]  ;;  %vm4625_vm13 = vcmask 793600  }
 0x66b   : > { %2099 = vst [vmem:[#allocation2 + $0x1e8] sm:$0xf0] %v2091_v47  ;;  %2412 = vmatprep.subr.mxu0 %v2337_v58  ;;  %2546 = vmatprep.subr.mxu1 %v2481_v43  ;;  %v1956_v40 = vpop.permute.xlu1 %1955 }
 0x66d   : > { %v1954_v36 = vpop.permute.xlu0 %1953 }
 0x66e   : > { %v1962_v54 = vsel %vm4611_vm6, %v1954_v36, %v1956_v40  ;;  %vm4626_vm6 = vmmov %vm4625_vm13 }
 0x66f   : > { %1970 = vst [vmem:[#allocation2 + $0x1b0] sm:$0xf] %v1962_v54  ;;  %v1999_v4 = vpop.permute.xlu1 %1998 }
 0x670   : > { %v2480_v61 = vld [vmem:[#allocation2 + $0xc8] sm:$0xff] }
 0x671   : > { %v1960_v29 = vpop.permute.xlu0 %1959  ;;  %2547 = vmatpush2.msra.mxu1 %v2480_v61 }
 0x672   : > { %v1964_v48 = vsel %vm4612_vm2, %v1960_v29, %v1956_v40  ;;  %v2336_v53 = vld [vmem:[#allocation2 + $0x1e8] sm:$0xff]  ;;  %vm4627_vm2 = vmmov %vm4623_vm11 }
 0x673   : > { %1972 = vst [vmem:[#allocation2 + $0x88] sm:$0xf] %v1964_v48  ;;  %2413 = vmatpush2.msra.mxu0 %v2336_v53  ;;  %v2005_v7 = vpop.permute.xlu1 %2004 }
 0x675   : > { %v2001_v9 = vpop.permute.xlu0 %2000 }
 0x676   : > { %v2007_v52 = vsel %vm4613_vm4, %v1999_v4, %v2001_v9  ;;  %v2009_v63 = vsel %vm4614_vm15, %v2005_v7, %v2001_v9  ;;  %vm4628_vm4 = vmmov %vm4627_vm2 }
 0x677   : > { %2015 = vst [vmem:[#allocation2 + $0x1b0] sm:$0xf0] %v2007_v52  ;;  %2017 = vst [vmem:[#allocation2 + $0x88] sm:$0xf0] %v2009_v63  ;;  %v1958_v13 = vpop.permute.xlu1 %1957 }
 0x678   : > { %v1963_v38 = vsel %vm4615_vm0, %v1958_v13, %v1960_v29  ;;  %vm4629_vm15 = vmmov %vm4626_vm6 }
 0x679   : > { %1971 = vst [vmem:[#allocation2 + $0x158] sm:$0xf] %v1963_v38  ;;  %v1952_v22 = vpop.permute.xlu0 %1951  ;;  %vm4630_vm0 = vmmov %vm4626_vm6 }
 0x67a   : > { %v1961_v8 = vsel %vm4616_vm14, %v1952_v22, %v1954_v36  ;;  %vm4631_vm14 = vcmask 891904  }
 0x67b   : > { %1969 = vst [vmem:[#allocation2 + $0xf8] sm:$0xf] %v1961_v8  ;;  %v2003_v18 = vpop.permute.xlu1 %2002 }
 0x67c   : > { %v2008_v28 = vsel %vm4617_vm1, %v2003_v18, %v2005_v7  ;;  %vm4632_vm1 = vmmov %vm4631_vm14 }
 0x67d   : > { %2016 = vst [vmem:[#allocation2 + $0x158] sm:$0xf0] %v2008_v28  ;;  %v1997_v42 = vpop.permute.xlu0 %1996 }
 0x67e   : > { %v2006_v19 = vsel %vm4618_vm3, %v1997_v42, %v1999_v4  ;;  %v2335_v25 = vld [vmem:[#allocation2 + $0x1b0] sm:$0xff]  ;;  %v2479_v39 = vld [vmem:[#allocation2 + $0x88] sm:$0xff]  ;;  %vm4633_vm3 = vcmask 809984  }
 0x67f   : > { %2014 = vst [vmem:[#allocation2 + $0xf8] sm:$0xf0] %v2006_v19  ;;  %2414 = vmatprep.subr.mxu0 %v2335_v25  ;;  %2548 = vmatprep.subr.mxu1 %v2479_v39  ;;  %v1870_v51 = vpop.permute.xlu1 %1869 }
 0x681   : > { %v1868_v35 = vpop.permute.xlu0 %1867 }
 0x682   : > { %v1877_v20 = vsel %vm1875_vm5, %v1868_v35, %v1870_v51 }
 0x683   : > { %1885 = vst [vmem:[#allocation2 + $0x278] sm:$0xf] %v1877_v20  ;;  %v1914_v1 = vpop.permute.xlu1 %1913 }
 0x684   : > { %v2478_v2 = vld [vmem:[#allocation2 + $0x158] sm:$0xff] }
 0x685   : > { %v1874_v62 = vpop.permute.xlu0 %1873  ;;  %2549 = vmatpush2.msra.mxu1 %v2478_v2 }
 0x686   : > { %v1879_v6 = vsel %vm1875_vm5, %v1874_v62, %v1870_v51  ;;  %v2334_v23 = vld [vmem:[#allocation2 + $0xf8] sm:$0xff] }
 0x687   : > { %1887 = vst [vmem:[#allocation2 + $0x280] sm:$0xf] %v1879_v6  ;;  %2415 = vmatpush2.msra.mxu0 %v2334_v23  ;;  %v1920_v27 = vpop.permute.xlu1 %1919 }
 0x689   : > { %v1916_v16 = vpop.permute.xlu0 %1915 }
 0x68a   : > { %v1922_v26 = vsel %vm4619_vm7, %v1914_v1, %v1916_v16  ;;  %v1924_v37 = vsel %vm4620_vm8, %v1920_v27, %v1916_v16  ;;  %vm4635_vm7 = vmmov %vm4632_vm1 }
 0x68b   : > { %1930 = vst [vmem:[#allocation2 + $0x278] sm:$0xf0] %v1922_v26  ;;  %1932 = vst [vmem:[#allocation2 + $0x280] sm:$0xf0] %v1924_v37  ;;  %v1872_v49 = vpop.permute.xlu1 %1871 }
 0x68c   : > { %v1878_v60 = vsel %vm1875_vm5, %v1872_v49, %v1874_v62  ;;  %vm4636_vm8 = vmmov %vm4632_vm1 }
 0x68d   : > { %1886 = vst [vmem:[#allocation2 + $0x178] sm:$0xf] %v1878_v60  ;;  %v1866_v30 = vpop.permute.xlu0 %1865 }
 0x68e   : > { %v1876_v31 = vsel %vm1875_vm5, %v1866_v30, %v1868_v35  ;;  %vm4634_vm5 = vmmov %vm4633_vm3 }
 0x68f   : > { %1884 = vst [vmem:[#allocation2 + $0x100] sm:$0xf] %v1876_v31  ;;  %v1918_v32 = vpop.permute.xlu1 %1917 }
 0x690   : > { %v1923_v41 = vsel %vm4621_vm9, %v1918_v32, %v1920_v27  ;;  %vm4637_vm9 = vmmov %vm4633_vm3 }
 0x691   : > { %1931 = vst [vmem:[#allocation2 + $0x178] sm:$0xf0] %v1923_v41  ;;  %v1912_v55 = vpop.permute.xlu0 %1911 }
 0x692   : > { %v1921_v57 = vsel %vm4622_vm10, %v1912_v55, %v1914_v1  ;;  %v2333_v11 = vld [vmem:[#allocation2 + $0x278] sm:$0xff]  ;;  %v2477_v17 = vld [vmem:[#allocation2 + $0x280] sm:$0xff]  ;;  %vm4638_vm10 = vmmov %vm4633_vm3 }
 0x693   : > { %1929 = vst [vmem:[#allocation2 + $0x100] sm:$0xf0] %v1921_v57  ;;  %2416 = vmatprep.subr.mxu0 %v2333_v11  ;;  %2550 = vmatprep.subr.mxu1 %v2477_v17  ;;  %v1803_v21 = vpop.permute.xlu1 %1802 }
 0x695   : > { %v1801_v14 = vpop.permute.xlu0 %1800 }
 0x696   : > { %v1809_v44 = vsel %vm4623_vm11, %v1801_v14, %v1803_v21  ;;  %vm4639_vm11 = vcmask 908288  }
 0x697   : > { %1817 = vst [vmem:[#allocation2] sm:$0xf] %v1809_v44  ;;  %v1846_v50 = vpop.permute.xlu1 %1845  ;;  %v2291_v44 = vld [vmem:[#allocation6] sm:$0xff] }
 0x698   : > { %v2476_v45 = vld [vmem:[#allocation2 + $0x178] sm:$0xff] }
 0x699   : > { %v1807_v10 = vpop.permute.xlu0 %1806  ;;  %2551 = vmatpush2.msra.mxu1 %v2476_v45 }
 0x69a   : > { %v1811_v15 = vsel %vm4624_vm12, %v1807_v10, %v1803_v21  ;;  %v2332_v56 = vld [vmem:[#allocation2 + $0x100] sm:$0xff]  ;;  %vm4640_vm12 = vmmov %vm4639_vm11 }
 0x69b   : > { %1819 = vst [vmem:[#allocation2 + $0x38] sm:$0xf] %v1811_v15  ;;  %2417 = vmatpush2.msra.mxu0 %v2332_v56  ;;  %v1852_v34 = vpop.permute.xlu1 %1851 }
 0x69d   : > { %v1848_v59 = vpop.permute.xlu0 %1847 }
 0x69e   : > { %v1854_v0 = vsel %vm4625_vm13, %v1846_v50, %v1848_v59  ;;  %v1856_v24 = vsel %vm4626_vm6, %v1852_v34, %v1848_v59  ;;  %vm4641_vm13 = vcmask 900096  }
 0x69f   : > { %1862 = vst [vmem:[#allocation2] sm:$0xf0] %v1854_v0  ;;  %1864 = vst [vmem:[#allocation2 + $0x38] sm:$0xf0] %v1856_v24  ;;  %v1805_v33 = vpop.permute.xlu1 %1804 }
 0x6a0   : > { %v1810_v5 = vsel %vm4627_vm2, %v1805_v33, %v1807_v10  ;;  %vm4642_vm6 = vmmov %vm4641_vm13 }
 0x6a1   : > { %1818 = vst [vmem:[#allocation2 + $0x90] sm:$0xf] %v1810_v5  ;;  %v1799_v3 = vpop.permute.xlu0 %1798  ;;  %vm4643_vm2 = vmmov %vm4639_vm11 }
 0x6a2   : > { %v1808_v12 = vsel %vm4628_vm4, %v1799_v3, %v1801_v14  ;;  %vm4644_vm4 = vmmov %vm4643_vm2 }
 0x6a3   : > { %1816 = vst [vmem:[#allocation2 + $0x2d0] sm:$0xf] %v1808_v12 }
 0x6a4   : > { %v1850_v46 = vpop.permute.xlu1 %1849 }
 0x6a5   : > { %v1855_v47 = vsel %vm4629_vm15, %v1850_v46, %v1852_v34  ;;  %v1844_v58 = vpop.permute.xlu0 %1843  ;;  %vm4645_vm15 = vmmov %vm4642_vm6 }
 0x6a6   : > { %1863 = vst [vmem:[#allocation2 + $0x90] sm:$0xf0] %v1855_v47  ;;  %v1853_v43 = vsel %vm4630_vm0, %v1844_v58, %v1846_v50  ;;  %v2331_v40 = vld [vmem:[#allocation2] sm:$0xff]  ;;  %v2475_v36 = vld [vmem:[#allocation2 + $0x38] sm:$0xff]  ;;  %vm4646_vm0 = vmmov %vm4642_vm6 }
 0x6a7   : > { %1861 = vst [vmem:[#allocation2 + $0x2d0] sm:$0xf0] %v1853_v43  ;;  %2418 = vmatprep.subr.mxu0 %v2331_v40  ;;  %2552 = vmatprep.subr.mxu1 %v2475_v36 }
 0x6a9   : > { %v1718_v54 = vpop.permute.xlu1 %1717 }
 0x6aa   : > { %v1716_v4 = vpop.permute.xlu0 %1715 }
 0x6ab   : > { %v1724_v61 = vsel %vm4631_vm14, %v1716_v4, %v1718_v54 }
 0x6ac   : > { %1732 = vst [vmem:[#allocation2 + $0xb0] sm:$0xf] %v1724_v61 }
 0x6ad   : > { %v2474_v29 = vld [vmem:[#allocation2 + $0x90] sm:$0xff] }
 0x6ae   : > { %v1761_v48 = vpop.permute.xlu1 %1760  ;;  %2553 = vmatpush2.msra.mxu1 %v2474_v29  ;;  %v2330_v53 = vld [vmem:[#allocation2 + $0x2d0] sm:$0xff] }
 0x6af   : > { %v1722_v7 = vpop.permute.xlu0 %1721  ;;  %2419 = vmatpush2.msra.mxu0 %v2330_v53 }
 0x6b0   : > { %v1726_v9 = vsel %vm4632_vm1, %v1722_v7, %v1718_v54 }
 0x6b1   : > { %1734 = vst [vmem:[#allocation2 + $0x170] sm:$0xf] %v1726_v9 }
 0x6b3   : > { %v1767_v52 = vpop.permute.xlu1 %1766 }
 0x6b4   : > { %v1763_v63 = vpop.permute.xlu0 %1762 }
 0x6b5   : > { %v1769_v13 = vsel %vm4633_vm3, %v1761_v48, %v1763_v63  ;;  %v1771_v38 = vsel %vm4634_vm5, %v1767_v52, %v1763_v63 }
 0x6b6   : > { %1777 = vst [vmem:[#allocation2 + $0xb0] sm:$0xf0] %v1769_v13  ;;  %1779 = vst [vmem:[#allocation2 + $0x170] sm:$0xf0] %v1771_v38 }
 0x6b8   : > { %v1720_v22 = vpop.permute.xlu1 %1719 }
 0x6b9   : > { %v1725_v8 = vsel %vm4635_vm7, %v1720_v22, %v1722_v7  ;;  %v1714_v18 = vpop.permute.xlu0 %1713 }
 0x6ba   : > { %1733 = vst [vmem:[#allocation2 + $0x2b8] sm:$0xf] %v1725_v8  ;;  %v1723_v28 = vsel %vm4636_vm8, %v1714_v18, %v1716_v4 }
 0x6bb   : > { %1731 = vst [vmem:[#allocation2 + $0x128] sm:$0xf] %v1723_v28 }
 0x6bd   : > { %v1765_v42 = vpop.permute.xlu1 %1764  ;;  %v2329_v25 = vld [vmem:[#allocation2 + $0xb0] sm:$0xff] }
 0x6be   : > { %v1770_v19 = vsel %vm4637_vm9, %v1765_v42, %v1767_v52  ;;  %v2473_v39 = vld [vmem:[#allocation2 + $0x170] sm:$0xff]  ;;  %v1759_v51 = vpop.permute.xlu0 %1758  ;;  %2420 = vmatprep.subr.mxu0 %v2329_v25 }
 0x6bf   : > { %1778 = vst [vmem:[#allocation2 + $0x2b8] sm:$0xf0] %v1770_v19  ;;  %2554 = vmatprep.subr.mxu1 %v2473_v39  ;;  %v1768_v35 = vsel %vm4638_vm10, %v1759_v51, %v1761_v48 }
 0x6c0   : > { %1776 = vst [vmem:[#allocation2 + $0x128] sm:$0xf0] %v1768_v35 }
 0x6c1   : > { %v1633_v20 = vpop.permute.xlu1 %1632 }
 0x6c2   : > { %v1631_v1 = vpop.permute.xlu0 %1630 }
 0x6c3   : > { %v1639_v2 = vsel %vm4639_vm11, %v1631_v1, %v1633_v20 }
 0x6c4   : > { %1647 = vst [vmem:[#allocation2 + $0x98] sm:$0xf] %v1639_v2 }
 0x6c5   : > { %v1676_v62 = vpop.permute.xlu1 %1675 }
 0x6c6   : > { %v2472_v6 = vld [vmem:[#allocation2 + $0x2b8] sm:$0xff]  ;;  %v1637_v23 = vpop.permute.xlu0 %1636 }
 0x6c7   : > { %2555 = vmatpush2.msra.mxu1 %v2472_v6  ;;  %v1641_v27 = vsel %vm4640_vm12, %v1637_v23, %v1633_v20  ;;  %v2328_v16 = vld [vmem:[#allocation2 + $0x128] sm:$0xff] }
 0x6c8   : > { %1649 = vst [vmem:[#allocation2 + $0x68] sm:$0xf] %v1641_v27  ;;  %2421 = vmatpush2.msra.mxu0 %v2328_v16 }
 0x6c9   : > { %v1682_v26 = vpop.permute.xlu1 %1681 }
 0x6ca   : > { %v1678_v37 = vpop.permute.xlu0 %1677 }
 0x6cb   : > { %v1684_v49 = vsel %vm4641_vm13, %v1676_v62, %v1678_v37  ;;  %v1686_v60 = vsel %vm4642_vm6, %v1682_v26, %v1678_v37 }
 0x6cc   : > { %1692 = vst [vmem:[#allocation2 + $0x98] sm:$0xf0] %v1684_v49  ;;  %1694 = vst [vmem:[#allocation2 + $0x68] sm:$0xf0] %v1686_v60 }
 0x6cd   : > { %v1635_v30 = vpop.permute.xlu1 %1634 }
 0x6ce   : > { %v1640_v31 = vsel %vm4643_vm2, %v1635_v30, %v1637_v23  ;;  %v1629_v32 = vpop.permute.xlu0 %1628 }
 0x6cf   : > { %1648 = vst [vmem:[#allocation2 + $0x298] sm:$0xf] %v1640_v31  ;;  %v1638_v41 = vsel %vm4644_vm4, %v1629_v32, %v1631_v1 }
 0x6d0   : > { %1646 = vst [vmem:[#allocation2 + $0x50] sm:$0xf] %v1638_v41 }
 0x6d1   : > { %v1680_v55 = vpop.permute.xlu1 %1679 }
 0x6d2   : > { %v1685_v57 = vsel %vm4645_vm15, %v1680_v55, %v1682_v26  ;;  %v1674_v11 = vpop.permute.xlu0 %1673 }
 0x6d3   : > { %1693 = vst [vmem:[#allocation2 + $0x298] sm:$0xf0] %v1685_v57  ;;  %v1683_v17 = vsel %vm4646_vm0, %v1674_v11, %v1676_v62  ;;  %v2327_v21 = vld [vmem:[#allocation2 + $0x98] sm:$0xff]  ;;  %v2471_v14 = vld [vmem:[#allocation2 + $0x68] sm:$0xff] }
 0x6d4   : > { %1691 = vst [vmem:[#allocation2 + $0x50] sm:$0xf0] %v1683_v17  ;;  %2422 = vmatprep.subr.mxu0 %v2327_v21  ;;  %2556 = vmatprep.subr.mxu1 %v2471_v14 }
 0x6da   : > { %v2470_v50 = vld [vmem:[#allocation2 + $0x298] sm:$0xff] }
 0x6db   : > { %2557 = vmatpush2.msra.mxu1 %v2470_v50  ;;  %v2326_v45 = vld [vmem:[#allocation2 + $0x50] sm:$0xff] }
 0x6dc   : > { %2559 = vmatmul.mubr.f32.vlgmr.msra.gmra.mxu1 %v2291_v44  ;;  %2423 = vmatpush2.msra.mxu0 %v2326_v45 }
 0x6dd   : > { %2425 = vmatmul.mubr.f32.vlgmr.msra.gmra.mxu0 %v2291_v44 }
 0x6df   : > { %v2347_v10 = vpop.permute.xlu0 %2346 }
 0x79c   : > { %v2560_v15 = vpop.f32.mrf.mxu1 }
 0x79d   : > { %v2561_v56 = vadd.f32 %v2560_v15, %v2347_v10  ;;  %v2426_v34 = vpop.f32.mrf.mxu0 }
 0x79e   : > { %v2562_v59 = vpop.f32.mrf.mxu1  ;;  %v2427_v24 = vadd.f32 %v2426_v34, %v2347_v10 }
 0x79f   : > { %v2565_v0 = vmul.f32 0.01, %v2561_v56  ;;  %v2563_v33 = vadd.f32 %v2562_v59, %v2347_v10  ;;  %v2428_v5 = vpop.f32.mrf.mxu0 }
 0x7a0   : > { %v2431_v12 = vmul.f32 0.01, %v2427_v24  ;;  %v2429_v47 = vadd.f32 %v2428_v5, %v2347_v10 }
 0x7a1   : > { %v2567_v3 = vmax.f32 %v2561_v56, %v2565_v0  ;;  %v2566_v46 = vmul.f32 0.01, %v2563_v33 }
 0x7a2   : > { %v2433_v58 = vmax.f32 %v2427_v24, %v2431_v12  ;;  %v2432_v40 = vmul.f32 0.01, %v2429_v47 }
 0x7a3   : > { %2698 = vst [vmem:[%s201_s30 + $0x10] sm:$0xff] %v2567_v3  ;;  %v2568_v43 = vmax.f32 %v2563_v33, %v2566_v46 }
 0x7a4   : > { %2435 = vst [vmem:[%s201_s30] sm:$0xff] %v2433_v58  ;;  %v2434_v36 = vmax.f32 %v2429_v47, %v2432_v40 }
 0x7a5   : > { %2699 = vst [vmem:[%s201_s30 + $0x18] sm:$0xff] %v2568_v43 }
 0x7a6   : > { %2436 = vst [vmem:[%s201_s30 + $0x8] sm:$0xff] %v2434_v36 }
 0x7a7   : > { %3097 = shalt.err (!%p3094_p0)
}
 0x7a8   : > { %s3098_s7 = scalar_lea.hbm %s4416_s17, 512  ;;  %s3102_s4 = scalar_lea.hbm %s4463_s3, 1024 }
 0x7a9   : > { %p3099_p4 = scmp.ne.s32.totalorder %s4416_s17, %s3098_s7  ;;  %p3103_p6 = scmp.lt.s32.totalorder %s4416_s17, %s4463_s3 }
 0x7aa   : > { %p3104_p13 = scmp.lt.s32.totalorder %s3102_s4, %s3098_s7 }
 0x7ab   : > { %p3100_p11 = pnand %p3099_p4, %p4647_p1 }
 0x7ac   : > { %p3105_p3 = por %p3104_p13, %p3103_p6 }
 0x7ad   : > { %p3101_p5 = pneg %p3100_p11 }
 0x7af   : > { %p3106_p12 = pnand %p3105_p3, %p3101_p5 }
 0x7b1   : > { %3109 = shalt.err (!%p3106_p12)
}
 0x7b2   : > { %s3209_s6 = smov 256   ;;  %s4648_s30 = smov 16  }
 0x7b3   : > { %2713 = dma.vmem_to_hbm [thread:$0]  (%p4647_p1), %s4411_s26, 512, %s4416_s17, %s2573_s28, %s3209_s6, %s3209_s6, %s4648_s30  }
 0x7b4 PF: > { %s2601_s8 = sand.u32 1, %s3140_s12   ;;  %p4649_p7 = scmp.ne.s32.totalorder %s4537_s25, 0 }
 0x7b5   : > { %p4650_p8 = scmp.ge.s32.totalorder %s3152_s15, 2  ;;  %s2602_s23 = scalar_lea.sflag [#allocation5], %s2601_s8 }
 0x7b7   : > { %p2724_p9 = pnand %p4650_p8, %p4649_p7 }
 0x7b9   : > { %p2725_p10 = pneg %p2724_p9 }
 0x7bb   : > { %3135 = dma.done.wait (%p2725_p10), %s2602_s23, 512  }
 0x7bc   : > { %3137 = vsyncadd (%p2725_p10), %s2602_s23, 4294966784  ;;  %p17_p2 = scmp.ge.s32.totalorder %s3255_s18, 4   ;;  %s4651_s12 = smov %s3144_s13 }
 0x7bd   : > { %s4652_s13 = smov %s3148_s14  ;;  %s4653_s14 = smov %s3267_s21 }
 0x7be   : > { %s4654_s15 = smov %s3255_s18  ;;  %19 = sbr.rel (!%p17_p2) target bundleno = 6 (0x6), region = 83 }
 0x7c3   :  { %2607 = vsyncpa [#allocation4], 1 }
 0x7c4   :  { %2609 = vsyncpa [#allocation4 + $0x1], 1 }
 0x7c5   :  { %2610 = vsyncpa [#allocation7], 1 }
 0x7c6   :  { %2611 = vsyncpa [#allocation5], 1 }
 0x7c7   :  { %2613 = vsyncpa [#allocation5 + $0x1], 1 }

</bundles_post_ra>
